<compile_context>
chip_gen: v5e
topology: v5e:2x2
jax: 0.10.0
libtpu: 0.0.40
codegen_flags: <defaults>
</compile_context>

<pallas_src>
import math
import functools

import jax
import jax.numpy as jnp
from jax.experimental import pallas as pl
from jax.experimental.pallas import tpu as pltpu

EPS = 1e-5  # torch.nn.LayerNorm default


def _ln(v, g, b):
    mu = jnp.mean(v, axis=-1, keepdims=True)
    var = jnp.mean(jnp.square(v - mu), axis=-1, keepdims=True)
    return (v - mu) * jax.lax.rsqrt(var + EPS) * g + b


# ----------------------------------------------------------------------------
# Fused kernel: grid = (B_pad // Bt, L)
#   l == 0      : act = x + positional_embedding
#   every l     : act = ResidualAttentionBlock_l(act)   (pre-LN MHA + QuickGELU MLP)
#   l == L - 1  : out[block] = LN_final(onehot-gathered EOT rows) @ text_projection
# ----------------------------------------------------------------------------
def fused_kernel(x_ref, pos_ref, mask_ref, onehot_ref,
                 ln1_g, ln1_b, wqkv, bqkv, wo, bo,
                 ln2_g, ln2_b, wfc, bfc, wpr, bpr,
                 lnf_g, lnf_b, proj_ref,
                 o_ref,
                 act_ref,                      # VMEM scratch [Bt, S, D] f32
                 *, n_heads):
    l = pl.program_id(1)

    @pl.when(l == 0)
    def _():
        act_ref[...] = (x_ref[...].astype(jnp.float32)
                        + pos_ref[...].astype(jnp.float32)[None])

    x3 = act_ref[...]                          # (Bt, S, D) f32
    Bt, S, D = x3.shape
    BtS = Bt * S
    H = n_heads
    hd = D // H
    x2 = x3.reshape(BtS, D)                    # leading-dim merge only (cheap)

    mask = mask_ref[...]                       # (S, S) f32, 0 / -1e30 (hoisted constant)

    # ---- pre-LN multi-head self attention (causal) ----
    h2 = _ln(x2, ln1_g[0], ln1_b[0])
    # 1/sqrt(hd) is already folded into the Q slice of wqkv/bqkv.
    qkv = jnp.dot(h2.astype(jnp.bfloat16), wqkv[0],
                  preferred_element_type=jnp.float32) + bqkv[0]      # (BtS, 3D) f32

    attn = jnp.zeros((BtS, D), jnp.float32)
    for hi in range(H):                                              # static unroll
        q_h = qkv[:, hi * hd:(hi + 1) * hd].astype(jnp.bfloat16).reshape(Bt, S, hd)
        k_h = qkv[:, D + hi * hd:D + (hi + 1) * hd].astype(jnp.bfloat16).reshape(Bt, S, hd)
        v_h = qkv[:, 2 * D + hi * hd:2 * D + (hi + 1) * hd].astype(jnp.bfloat16).reshape(Bt, S, hd)

        s = jnp.einsum("bqd,bkd->bqk", q_h, k_h,
                       preferred_element_type=jnp.float32)           # (Bt, S, S) f32
        s = s + mask[None]
        s = s - jnp.max(s, axis=-1, keepdims=True)
        pr = jnp.exp(s)
        pr = pr * pl.reciprocal(jnp.sum(pr, axis=-1, keepdims=True), approx=True)
        o_h = jnp.einsum("bqk,bkd->bqd", pr.astype(jnp.bfloat16), v_h,
                         preferred_element_type=jnp.float32)         # (Bt, S, hd) f32
        # fold this head's slice of the output projection (avoids any head concat)
        attn = attn + jnp.dot(o_h.reshape(BtS, hd).astype(jnp.bfloat16),
                              wo[0, hi * hd:(hi + 1) * hd, :],
                              preferred_element_type=jnp.float32)
    x2 = x2 + attn + bo[0]

    # ---- MLP with QuickGELU ----
    h2 = _ln(x2, ln2_g[0], ln2_b[0])
    h2 = jnp.dot(h2.astype(jnp.bfloat16), wfc[0],
                 preferred_element_type=jnp.float32) + bfc[0]
    h2 = h2 * jax.nn.sigmoid(1.702 * h2)                             # QuickGELU (f32)
    h2 = jnp.dot(h2.astype(jnp.bfloat16), wpr[0],
                 preferred_element_type=jnp.float32) + bpr[0]
    x2 = x2 + h2

    act_ref[...] = x2.reshape(Bt, S, D)

    # ---- final stage: one-hot EOT gather + ln_final + text_projection ----
    @pl.when(l == pl.num_programs(1) - 1)
    def _():
        act3 = x2.reshape(Bt, S, D)
        sel = jnp.sum(act3 * onehot_ref[...][:, :, None], axis=1)    # (Bt, D) f32
        sel = _ln(sel, lnf_g[...], lnf_b[...])
        o_ref[...] = jnp.dot(sel.astype(jnp.bfloat16), proj_ref[...],
                             preferred_element_type=jnp.float32).astype(o_ref.dtype)


# ----------------------------------------------------------------------------
# One-time parameter preparation: transpose torch [out,in] weights, fold the
# attention scale into the Q projection, stack layers, cast matmul weights to
# bf16 (LN params / biases stay f32 for accurate elementwise math).
# ----------------------------------------------------------------------------
def prepare_params(pos, layers, lnf_g, lnf_b, proj, n_heads,
                   matmul_dtype=jnp.bfloat16):
    D = pos.shape[-1]
    hd = D // n_heads
    scale = 1.0 / math.sqrt(hd)

    def stack(fn):
        return jnp.stack([fn(p) for p in layers], axis=0)

    wqkv = stack(lambda p: p["w_qkv"].T.astype(jnp.float32))         # [L, D, 3D]
    wqkv = wqkv.at[:, :, :D].multiply(scale)
    bqkv = stack(lambda p: p["b_qkv"].reshape(1, -1).astype(jnp.float32))
    bqkv = bqkv.at[:, :, :D].multiply(scale)

    return dict(
        pos=pos.astype(jnp.float32),
        ln1_g=stack(lambda p: p["ln1_g"].reshape(1, -1).astype(jnp.float32)),
        ln1_b=stack(lambda p: p["ln1_b"].reshape(1, -1).astype(jnp.float32)),
        wqkv=wqkv.astype(matmul_dtype),
        bqkv=bqkv,
        wo=stack(lambda p: p["w_o"].T).astype(matmul_dtype),
        bo=stack(lambda p: p["b_o"].reshape(1, -1).astype(jnp.float32)),
        ln2_g=stack(lambda p: p["ln2_g"].reshape(1, -1).astype(jnp.float32)),
        ln2_b=stack(lambda p: p["ln2_b"].reshape(1, -1).astype(jnp.float32)),
        wfc=stack(lambda p: p["w_fc"].T).astype(matmul_dtype),
        bfc=stack(lambda p: p["b_fc"].reshape(1, -1).astype(jnp.float32)),
        wpr=stack(lambda p: p["w_pr"].T).astype(matmul_dtype),
        bpr=stack(lambda p: p["b_pr"].reshape(1, -1).astype(jnp.float32)),
        lnf_g=lnf_g.reshape(1, -1).astype(jnp.float32),
        lnf_b=lnf_b.reshape(1, -1).astype(jnp.float32),
        proj=proj.astype(matmul_dtype),
    )


def _vmem_limit_bytes():
    # ~56 MiB on v7x (64 MiB physical), capped at 112 MiB on v5e/v6e (128 MiB).
    try:
        cap = pltpu.get_tpu_info().vmem_capacity_bytes
    except Exception:
        cap = 64 * 1024 * 1024
    return int(min(cap * 7 // 8, 112 * 1024 * 1024))


# ----------------------------------------------------------------------------
# Forward wrapper: single pallas_call, batch-blocked grid
# ----------------------------------------------------------------------------
def partial_transformer_forward(x, eot_indices, params, n_heads, bt_max=8):
    B, S, D = x.shape
    p = params
    L = p["wqkv"].shape[0]
    E = p["proj"].shape[1]

    # pad sequence length to a multiple of 8 (sublane alignment); padded key
    # columns are never attended by real rows (causal) and padded query rows
    # are never selected by the one-hot EOT gather.
    S_pad = ((S + 7) // 8) * 8
    pos = p["pos"]
    if S_pad != S:
        x = jnp.pad(x, ((0, 0), (0, S_pad - S), (0, 0)))
        pos = jnp.pad(pos, ((0, S_pad - S), (0, 0)))

    # batch block size Bt: either Bt == B_pad (small batches) or Bt a multiple
    # of 8 (keeps (Bt, S)/(Bt, E) block shapes legal).
    if B <= bt_max:
        Bt, B_pad = B, B
    else:
        Bt = max(8, (bt_max // 8) * 8)
        B_pad = ((B + Bt - 1) // Bt) * Bt
    if B_pad != B:
        x = jnp.pad(x, ((0, B_pad - B), (0, 0), (0, 0)))
        eot_indices = jnp.pad(eot_indices, (0, B_pad - B))

    eot = eot_indices.astype(jnp.int32)
    onehot = (jnp.arange(S_pad, dtype=jnp.int32)[None, :]
              == eot[:, None]).astype(jnp.float32)                   # (B_pad, S_pad)
    causal = jnp.where(jnp.triu(jnp.ones((S_pad, S_pad), dtype=bool), 1),
                       jnp.float32(-1e30), jnp.float32(0.0))         # (S_pad, S_pad)

    n_bblk = B_pad // Bt

    def layer_spec(a):          # stacked [L, ...] weight, indexed by layer axis
        zeros = (0,) * (a.ndim - 1)
        return pl.BlockSpec((1,) + a.shape[1:], lambda bi, l, z=zeros: (l,) + z)

    def const_spec(a):          # grid-invariant array, loaded once
        zeros = (0,) * a.ndim
        return pl.BlockSpec(a.shape, lambda bi, l, z=zeros: z)

    gs = pltpu.PrefetchScalarGridSpec(
        num_scalar_prefetch=0,
        grid=(n_bblk, L),
        in_specs=[
            pl.BlockSpec((Bt, S_pad, D), lambda bi, l: (bi, 0, 0)),   # x (per batch block)
            const_spec(pos),
            const_spec(causal),
            pl.BlockSpec((Bt, S_pad), lambda bi, l: (bi, 0)),         # one-hot EOT rows
            layer_spec(p["ln1_g"]), layer_spec(p["ln1_b"]),
            layer_spec(p["wqkv"]), layer_spec(p["bqkv"]),
            layer_spec(p["wo"]), layer_spec(p["bo"]),
            layer_spec(p["ln2_g"]), layer_spec(p["ln2_b"]),
            layer_spec(p["wfc"]), layer_spec(p["bfc"]),
            layer_spec(p["wpr"]), layer_spec(p["bpr"]),
            const_spec(p["lnf_g"]), const_spec(p["lnf_b"]),
            const_spec(p["proj"]),
        ],
        out_specs=pl.BlockSpec((Bt, E), lambda bi, l: (bi, 0)),
        scratch_shapes=[pltpu.VMEM((Bt, S_pad, D), jnp.float32)],
    )
    out = pl.pallas_call(
        functools.partial(fused_kernel, n_heads=n_heads),
        out_shape=jax.ShapeDtypeStruct((B_pad, E), x.dtype),
        grid_spec=gs,
        compiler_params=pltpu.CompilerParams(
            dimension_semantics=("parallel", "arbitrary"),
            vmem_limit_bytes=_vmem_limit_bytes(),
        ),
    )(x, pos, causal, onehot,
      p["ln1_g"], p["ln1_b"], p["wqkv"], p["bqkv"], p["wo"], p["bo"],
      p["ln2_g"], p["ln2_b"], p["wfc"], p["bfc"], p["wpr"], p["bpr"],
      p["lnf_g"], p["lnf_b"], p["proj"])
    return out[:B]


# ----------------------------------------------------------------------------
# Pure-JAX f32 reference for validation
# ----------------------------------------------------------------------------
def _ref_block(x, p, n_heads):
    B, S, D = x.shape
    hd = D // n_heads
    h = _ln(x, p["ln1_g"], p["ln1_b"])
    qkv = h @ p["w_qkv"].T + p["b_qkv"]
    q, k, v = jnp.split(qkv, 3, axis=-1)
    q = q.reshape(B, S, n_heads, hd)
    k = k.reshape(B, S, n_heads, hd)
    v = v.reshape(B, S, n_heads, hd)
    s = jnp.einsum("bqhd,bkhd->bhqk", q, k) / math.sqrt(hd)
    mask = jnp.where(jnp.triu(jnp.ones((S, S), bool), 1), -jnp.inf, 0.0)
    s = s + mask
    pa = jax.nn.softmax(s, axis=-1)
    o = jnp.einsum("bhqk,bkhd->bqhd", pa, v).reshape(B, S, D)
    x = x + (o @ p["w_o"].T + p["b_o"])
    h = _ln(x, p["ln2_g"], p["ln2_b"])
    h = h @ p["w_fc"].T + p["b_fc"]
    h = h * jax.nn.sigmoid(1.702 * h)
    return x + (h @ p["w_pr"].T + p["b_pr"])


def reference_forward(x, eot_indices, pos, layers, lnf_g, lnf_b, proj, n_heads):
    x = x + pos[None]
    for p in layers:
        x = _ref_block(x, p, n_heads)
    x = _ln(x, lnf_g, lnf_b)
    sel = x[jnp.arange(x.shape[0]), eot_indices]
    return sel @ proj


# ----------------------------------------------------------------------------
if __name__ == "__main__":
    # small shapes; S deliberately NOT a multiple of 8 to exercise the padding path
    B, S, D, H, L, E = 4, 13, 128, 4, 2, 128
    key = jax.random.PRNGKey(0)
    ks = iter(jax.random.split(key, 64))

    def nrm(shape, scale=0.02):
        return (scale * jax.random.normal(next(ks), shape)).astype(jnp.float32)

    x = nrm((B, S, D), scale=1.0)
    eot_indices = jax.random.randint(next(ks), (B,), 0, S).astype(jnp.int32)
    pos = nrm((S, D), scale=0.1)

    layers = []
    for _ in range(L):
        layers.append(dict(
            ln1_g=1.0 + nrm((D,), 0.1), ln1_b=nrm((D,), 0.1),
            w_qkv=nrm((3 * D, D)),      b_qkv=nrm((3 * D,), 0.1),
            w_o=nrm((D, D)),            b_o=nrm((D,), 0.1),
            ln2_g=1.0 + nrm((D,), 0.1), ln2_b=nrm((D,), 0.1),
            w_fc=nrm((4 * D, D)),       b_fc=nrm((4 * D,), 0.1),
            w_pr=nrm((D, 4 * D)),       b_pr=nrm((D,), 0.1),
        ))
    lnf_g = 1.0 + nrm((D,), 0.1)
    lnf_b = nrm((D,), 0.1)
    text_projection = nrm((D, E), 0.05)

    params = prepare_params(pos, layers, lnf_g, lnf_b, text_projection, H)
    out = partial_transformer_forward(x, eot_indices, params, H)
    out = jax.block_until_ready(out)

    ref = reference_forward(x, eot_indices, pos, layers, lnf_g, lnf_b,
                            text_projection, H)
    assert out.shape == (B, E)
    # bf16 matmul operands (f32 accumulation) + approx reciprocal -> loose tol;
    # also check relative error against the reference's scale.
    abs_err = jnp.max(jnp.abs(out - ref))
    rel_err = abs_err / (jnp.max(jnp.abs(ref)) + 1e-8)
    assert jnp.allclose(out, ref, atol=2e-2, rtol=2e-2), f"mismatch: abs={abs_err} rel={rel_err}"
    assert rel_err < 5e-2, f"relative mismatch: {rel_err}"

    print("KERNEL_OK")
</pallas_src>

<mosaic_0001>
module attributes {stable_mosaic.version = 11 : i64} {
  func.func @fused_kernel(%arg0: i32, %arg1: i32, %arg2: memref<4x16x128xf32, #tpu.memory_space<vmem>>, %arg3: memref<16x128xf32, #tpu.memory_space<vmem>>, %arg4: memref<16x16xf32, #tpu.memory_space<vmem>>, %arg5: memref<4x16xf32, #tpu.memory_space<vmem>>, %arg6: memref<1x1x128xf32, #tpu.memory_space<vmem>>, %arg7: memref<1x1x128xf32, #tpu.memory_space<vmem>>, %arg8: memref<1x128x384xbf16, #tpu.memory_space<vmem>>, %arg9: memref<1x1x384xf32, #tpu.memory_space<vmem>>, %arg10: memref<1x128x128xbf16, #tpu.memory_space<vmem>>, %arg11: memref<1x1x128xf32, #tpu.memory_space<vmem>>, %arg12: memref<1x1x128xf32, #tpu.memory_space<vmem>>, %arg13: memref<1x1x128xf32, #tpu.memory_space<vmem>>, %arg14: memref<1x128x512xbf16, #tpu.memory_space<vmem>>, %arg15: memref<1x1x512xf32, #tpu.memory_space<vmem>>, %arg16: memref<1x512x128xbf16, #tpu.memory_space<vmem>>, %arg17: memref<1x1x128xf32, #tpu.memory_space<vmem>>, %arg18: memref<1x128xf32, #tpu.memory_space<vmem>>, %arg19: memref<1x128xf32, #tpu.memory_space<vmem>>, %arg20: memref<128x128xbf16, #tpu.memory_space<vmem>>, %arg21: memref<4x128xf32, #tpu.memory_space<vmem>>, %arg22: memref<4x16x128xf32, #tpu.memory_space<vmem>>) attributes {dimension_semantics = [#tpu.dimension_semantics<parallel>, #tpu.dimension_semantics<arbitrary>], iteration_bounds = array<i64: 1, 2>, scalar_prefetch = 0 : i64, scratch_operands = 1 : i64, tpu.core_type = #tpu.core_type<tc>, window_params = [{transform_indices = @transform_0, window_bounds = array<i64: 4, 16, 128>}, {pipeline_mode = #tpu.pipeline_mode<synchronous>, transform_indices = @transform_1, window_bounds = array<i64: 16, 128>}, {pipeline_mode = #tpu.pipeline_mode<synchronous>, transform_indices = @transform_2, window_bounds = array<i64: 16, 16>}, {transform_indices = @transform_3, window_bounds = array<i64: 4, 16>}, {transform_indices = @transform_4, window_bounds = array<i64: 1, 1, 128>}, {transform_indices = @transform_5, window_bounds = array<i64: 1, 1, 128>}, {transform_indices = @transform_6, window_bounds = array<i64: 1, 128, 384>}, {transform_indices = @transform_7, window_bounds = array<i64: 1, 1, 384>}, {transform_indices = @transform_8, window_bounds = array<i64: 1, 128, 128>}, {transform_indices = @transform_9, window_bounds = array<i64: 1, 1, 128>}, {transform_indices = @transform_10, window_bounds = array<i64: 1, 1, 128>}, {transform_indices = @transform_11, window_bounds = array<i64: 1, 1, 128>}, {transform_indices = @transform_12, window_bounds = array<i64: 1, 128, 512>}, {transform_indices = @transform_13, window_bounds = array<i64: 1, 1, 512>}, {transform_indices = @transform_14, window_bounds = array<i64: 1, 512, 128>}, {transform_indices = @transform_15, window_bounds = array<i64: 1, 1, 128>}, {pipeline_mode = #tpu.pipeline_mode<synchronous>, transform_indices = @transform_16, window_bounds = array<i64: 1, 128>}, {pipeline_mode = #tpu.pipeline_mode<synchronous>, transform_indices = @transform_17, window_bounds = array<i64: 1, 128>}, {pipeline_mode = #tpu.pipeline_mode<synchronous>, transform_indices = @transform_18, window_bounds = array<i64: 128, 128>}, {transform_indices = @transform_19, window_bounds = array<i64: 4, 128>}]} {
    %c0_i32 = arith.constant 0 : i32
    %0 = arith.cmpi eq, %arg1, %c0_i32 : i32
    %1 = arith.extui %0 : i1 to i32
    %c0_i32_0 = arith.constant 0 : i32
    %2 = arith.cmpi ne, %1, %c0_i32_0 : i32
    scf.if %2 {
      %c0_86 = arith.constant 0 : index
      %c0_87 = arith.constant 0 : index
      %c0_88 = arith.constant 0 : index
      %226 = vector.load %arg2[%c0_86, %c0_87, %c0_88] : memref<4x16x128xf32, #tpu.memory_space<vmem>>, vector<4x16x128xf32>
      %c0_89 = arith.constant 0 : index
      %c0_90 = arith.constant 0 : index
      %227 = vector.load %arg3[%c0_89, %c0_90] : memref<16x128xf32, #tpu.memory_space<vmem>>, vector<16x128xf32>
      %228 = vector.shape_cast %227 : vector<16x128xf32> to vector<1x16x128xf32>
      %229 = vector.broadcast %228 : vector<1x16x128xf32> to vector<4x16x128xf32>
      %230 = arith.addf %226, %229 : vector<4x16x128xf32>
      %c0_91 = arith.constant 0 : index
      %c0_92 = arith.constant 0 : index
      %c0_93 = arith.constant 0 : index
      %231 = vector.load %arg22[%c0_91, %c0_92, %c0_93] : memref<4x16x128xf32, #tpu.memory_space<vmem>>, vector<4x16x128xf32>
      tpu.vector_store %arg22[%c0_91, %c0_92, %c0_93], %230 {strides = array<i32>} : memref<4x16x128xf32, #tpu.memory_space<vmem>>, vector<4x16x128xf32>,
    } else {
    }
    %c0 = arith.constant 0 : index
    %c0_1 = arith.constant 0 : index
    %c0_2 = arith.constant 0 : index
    %3 = vector.load %arg22[%c0, %c0_1, %c0_2] : memref<4x16x128xf32, #tpu.memory_space<vmem>>, vector<4x16x128xf32>
    %4 = vector.shape_cast %3 : vector<4x16x128xf32> to vector<64x128xf32>
    %c0_3 = arith.constant 0 : index
    %c0_4 = arith.constant 0 : index
    %5 = vector.load %arg4[%c0_3, %c0_4] : memref<16x16xf32, #tpu.memory_space<vmem>>, vector<16x16xf32>
    %c0_5 = arith.constant 0 : index
    %c0_6 = arith.constant 0 : index
    %c0_7 = arith.constant 0 : index
    %6 = vector.load %arg6[%c0_5, %c0_6, %c0_7] : memref<1x1x128xf32, #tpu.memory_space<vmem>>, vector<1x1x128xf32>
    %7 = vector.shape_cast %6 : vector<1x1x128xf32> to vector<1x128xf32>
    %c0_8 = arith.constant 0 : index
    %c0_9 = arith.constant 0 : index
    %c0_10 = arith.constant 0 : index
    %8 = vector.load %arg7[%c0_8, %c0_9, %c0_10] : memref<1x1x128xf32, #tpu.memory_space<vmem>>, vector<1x1x128xf32>
    %9 = vector.shape_cast %8 : vector<1x1x128xf32> to vector<1x128xf32>
    %cst = arith.constant dense<0.000000e+00> : vector<64xf32>
    %10 = vector.multi_reduction <add>, %4, %cst [1] : vector<64x128xf32> to vector<64xf32>
    %11 = vector.shape_cast %10 : vector<64xf32> to vector<64x1xf32>
    %cst_11 = arith.constant 1.280000e+02 : f32
    %12 = vector.broadcast %cst_11 : f32 to vector<64x1xf32>
    %13 = arith.divf %11, %12 : vector<64x1xf32>
    %14 = vector.broadcast %13 : vector<64x1xf32> to vector<64x128xf32>
    %15 = arith.subf %4, %14 : vector<64x128xf32>
    %16 = arith.mulf %15, %15 : vector<64x128xf32>
    %cst_12 = arith.constant dense<0.000000e+00> : vector<64xf32>
    %17 = vector.multi_reduction <add>, %16, %cst_12 [1] : vector<64x128xf32> to vector<64xf32>
    %18 = vector.shape_cast %17 : vector<64xf32> to vector<64x1xf32>
    %cst_13 = arith.constant 1.280000e+02 : f32
    %19 = vector.broadcast %cst_13 : f32 to vector<64x1xf32>
    %20 = arith.divf %18, %19 : vector<64x1xf32>
    %21 = vector.broadcast %13 : vector<64x1xf32> to vector<64x128xf32>
    %22 = arith.subf %4, %21 : vector<64x128xf32>
    %cst_14 = arith.constant 9.99999974E-6 : f32
    %23 = vector.broadcast %cst_14 : f32 to vector<64x1xf32>
    %24 = arith.addf %20, %23 : vector<64x1xf32>
    %25 = math.rsqrt %24 : vector<64x1xf32>
    %26 = vector.broadcast %25 : vector<64x1xf32> to vector<64x128xf32>
    %27 = arith.mulf %22, %26 : vector<64x128xf32>
    %28 = vector.broadcast %7 : vector<1x128xf32> to vector<64x128xf32>
    %29 = arith.mulf %27, %28 : vector<64x128xf32>
    %30 = vector.broadcast %9 : vector<1x128xf32> to vector<64x128xf32>
    %31 = arith.addf %29, %30 : vector<64x128xf32>
    %32 = arith.truncf %31 : vector<64x128xf32> to vector<64x128xbf16>
    %c0_15 = arith.constant 0 : index
    %c0_16 = arith.constant 0 : index
    %c0_17 = arith.constant 0 : index
    %33 = vector.load %arg8[%c0_15, %c0_16, %c0_17] : memref<1x128x384xbf16, #tpu.memory_space<vmem>>, vector<1x128x384xbf16>
    %34 = vector.shape_cast %33 : vector<1x128x384xbf16> to vector<128x384xbf16>
    %cst_18 = arith.constant dense<0.000000e+00> : vector<64x384xf32>
    %35 = tpu.matmul %32, %34, %cst_18 {dimension_numbers = #tpu.dot_dimension_numbers<[1], [0], [0], [1], [0, 0, 1, 1], [], []>} : vector<64x128xbf16>, vector<128x384xbf16>, vector<64x384xf32> -> vector<64x384xf32>
    %c0_19 = arith.constant 0 : index
    %c0_20 = arith.constant 0 : index
    %c0_21 = arith.constant 0 : index
    %36 = vector.load %arg9[%c0_19, %c0_20, %c0_21] : memref<1x1x384xf32, #tpu.memory_space<vmem>>, vector<1x1x384xf32>
    %37 = vector.shape_cast %36 : vector<1x1x384xf32> to vector<1x384xf32>
    %38 = vector.broadcast %37 : vector<1x384xf32> to vector<64x384xf32>
    %39 = arith.addf %35, %38 : vector<64x384xf32>
    %cst_22 = arith.constant 0.000000e+00 : f32
    %40 = vector.broadcast %cst_22 : f32 to vector<64x128xf32>
    %41 = vector.extract_strided_slice %39 {offsets = [0, 0], sizes = [64, 32], strides = [1, 1]} : vector<64x384xf32> to vector<64x32xf32>
    %42 = arith.truncf %41 : vector<64x32xf32> to vector<64x32xbf16>
    %43 = vector.shape_cast %42 : vector<64x32xbf16> to vector<4x16x32xbf16>
    %44 = vector.extract_strided_slice %39 {offsets = [0, 128], sizes = [64, 32], strides = [1, 1]} : vector<64x384xf32> to vector<64x32xf32>
    %45 = arith.truncf %44 : vector<64x32xf32> to vector<64x32xbf16>
    %46 = vector.shape_cast %45 : vector<64x32xbf16> to vector<4x16x32xbf16>
    %47 = vector.extract_strided_slice %39 {offsets = [0, 256], sizes = [64, 32], strides = [1, 1]} : vector<64x384xf32> to vector<64x32xf32>
    %48 = arith.truncf %47 : vector<64x32xf32> to vector<64x32xbf16>
    %49 = vector.shape_cast %48 : vector<64x32xbf16> to vector<4x16x32xbf16>
    "tpu.trace_start"() <{level = 10 : i32, message = "bqd,bkd->bqk"}> : () -> ()
    %cst_23 = arith.constant dense<0.000000e+00> : vector<4x16x16xf32>
    %50 = tpu.matmul %43, %46, %cst_23 {dimension_numbers = #tpu.dot_dimension_numbers<[2], [2], [1], [1], [0, 0, 0, 1, 1, 1], [0], [0]>} : vector<4x16x32xbf16>, vector<4x16x32xbf16>, vector<4x16x16xf32> -> vector<4x16x16xf32>
    "tpu.trace_stop"() : () -> ()
    %51 = vector.shape_cast %5 : vector<16x16xf32> to vector<1x16x16xf32>
    %52 = vector.broadcast %51 : vector<1x16x16xf32> to vector<4x16x16xf32>
    %53 = arith.addf %50, %52 : vector<4x16x16xf32>
    %cst_24 = arith.constant dense<0xFF800000> : vector<4x16xf32>
    %54 = vector.multi_reduction <maximumf>, %53, %cst_24 [2] : vector<4x16x16xf32> to vector<4x16xf32>
    %55 = vector.shape_cast %54 : vector<4x16xf32> to vector<4x16x1xf32>
    %56 = vector.broadcast %55 : vector<4x16x1xf32> to vector<4x16x16xf32>
    %57 = arith.subf %53, %56 : vector<4x16x16xf32>
    %58 = math.exp %57 : vector<4x16x16xf32>
    %cst_25 = arith.constant dense<0.000000e+00> : vector<4x16xf32>
    %59 = vector.multi_reduction <add>, %58, %cst_25 [2] : vector<4x16x16xf32> to vector<4x16xf32>
    %60 = vector.shape_cast %59 : vector<4x16xf32> to vector<4x16x1xf32>
    %61 = tpu.reciprocal %60 {approx = true} : vector<4x16x1xf32> -> vector<4x16x1xf32>
    %62 = vector.broadcast %61 : vector<4x16x1xf32> to vector<4x16x16xf32>
    %63 = arith.mulf %58, %62 : vector<4x16x16xf32>
    %64 = arith.truncf %63 : vector<4x16x16xf32> to vector<4x16x16xbf16>
    "tpu.trace_start"() <{level = 10 : i32, message = "bqk,bkd->bqd"}> : () -> ()
    %cst_26 = arith.constant dense<0.000000e+00> : vector<4x16x32xf32>
    %65 = tpu.matmul %64, %49, %cst_26 {dimension_numbers = #tpu.dot_dimension_numbers<[2], [1], [1], [2], [0, 0, 0, 1, 1, 2], [0], [0]>} : vector<4x16x16xbf16>, vector<4x16x32xbf16>, vector<4x16x32xf32> -> vector<4x16x32xf32>
    "tpu.trace_stop"() : () -> ()
    %66 = vector.shape_cast %65 : vector<4x16x32xf32> to vector<64x32xf32>
    %67 = arith.truncf %66 : vector<64x32xf32> to vector<64x32xbf16>
    %c0_27 = arith.constant 0 : index
    %c0_28 = arith.constant 0 : index
    %c0_29 = arith.constant 0 : index
    %68 = vector.load %arg10[%c0_27, %c0_28, %c0_29] : memref<1x128x128xbf16, #tpu.memory_space<vmem>>, vector<1x32x128xbf16>
    %69 = vector.shape_cast %68 : vector<1x32x128xbf16> to vector<32x128xbf16>
    %cst_30 = arith.constant dense<0.000000e+00> : vector<64x128xf32>
    %70 = tpu.matmul %67, %69, %cst_30 {dimension_numbers = #tpu.dot_dimension_numbers<[1], [0], [0], [1], [0, 0, 1, 1], [], []>} : vector<64x32xbf16>, vector<32x128xbf16>, vector<64x128xf32> -> vector<64x128xf32>
    %71 = arith.addf %40, %70 : vector<64x128xf32>
    %72 = vector.extract_strided_slice %39 {offsets = [0, 32], sizes = [64, 32], strides = [1, 1]} : vector<64x384xf32> to vector<64x32xf32>
    %73 = arith.truncf %72 : vector<64x32xf32> to vector<64x32xbf16>
    %74 = vector.shape_cast %73 : vector<64x32xbf16> to vector<4x16x32xbf16>
    %75 = vector.extract_strided_slice %39 {offsets = [0, 160], sizes = [64, 32], strides = [1, 1]} : vector<64x384xf32> to vector<64x32xf32>
    %76 = arith.truncf %75 : vector<64x32xf32> to vector<64x32xbf16>
    %77 = vector.shape_cast %76 : vector<64x32xbf16> to vector<4x16x32xbf16>
    %78 = vector.extract_strided_slice %39 {offsets = [0, 288], sizes = [64, 32], strides = [1, 1]} : vector<64x384xf32> to vector<64x32xf32>
    %79 = arith.truncf %78 : vector<64x32xf32> to vector<64x32xbf16>
    %80 = vector.shape_cast %79 : vector<64x32xbf16> to vector<4x16x32xbf16>
    "tpu.trace_start"() <{level = 10 : i32, message = "bqd,bkd->bqk"}> : () -> ()
    %cst_31 = arith.constant dense<0.000000e+00> : vector<4x16x16xf32>
    %81 = tpu.matmul %74, %77, %cst_31 {dimension_numbers = #tpu.dot_dimension_numbers<[2], [2], [1], [1], [0, 0, 0, 1, 1, 1], [0], [0]>} : vector<4x16x32xbf16>, vector<4x16x32xbf16>, vector<4x16x16xf32> -> vector<4x16x16xf32>
    "tpu.trace_stop"() : () -> ()
    %82 = vector.shape_cast %5 : vector<16x16xf32> to vector<1x16x16xf32>
    %83 = vector.broadcast %82 : vector<1x16x16xf32> to vector<4x16x16xf32>
    %84 = arith.addf %81, %83 : vector<4x16x16xf32>
    %cst_32 = arith.constant dense<0xFF800000> : vector<4x16xf32>
    %85 = vector.multi_reduction <maximumf>, %84, %cst_32 [2] : vector<4x16x16xf32> to vector<4x16xf32>
    %86 = vector.shape_cast %85 : vector<4x16xf32> to vector<4x16x1xf32>
    %87 = vector.broadcast %86 : vector<4x16x1xf32> to vector<4x16x16xf32>
    %88 = arith.subf %84, %87 : vector<4x16x16xf32>
    %89 = math.exp %88 : vector<4x16x16xf32>
    %cst_33 = arith.constant dense<0.000000e+00> : vector<4x16xf32>
    %90 = vector.multi_reduction <add>, %89, %cst_33 [2] : vector<4x16x16xf32> to vector<4x16xf32>
    %91 = vector.shape_cast %90 : vector<4x16xf32> to vector<4x16x1xf32>
    %92 = tpu.reciprocal %91 {approx = true} : vector<4x16x1xf32> -> vector<4x16x1xf32>
    %93 = vector.broadcast %92 : vector<4x16x1xf32> to vector<4x16x16xf32>
    %94 = arith.mulf %89, %93 : vector<4x16x16xf32>
    %95 = arith.truncf %94 : vector<4x16x16xf32> to vector<4x16x16xbf16>
    "tpu.trace_start"() <{level = 10 : i32, message = "bqk,bkd->bqd"}> : () -> ()
    %cst_34 = arith.constant dense<0.000000e+00> : vector<4x16x32xf32>
    %96 = tpu.matmul %95, %80, %cst_34 {dimension_numbers = #tpu.dot_dimension_numbers<[2], [1], [1], [2], [0, 0, 0, 1, 1, 2], [0], [0]>} : vector<4x16x16xbf16>, vector<4x16x32xbf16>, vector<4x16x32xf32> -> vector<4x16x32xf32>
    "tpu.trace_stop"() : () -> ()
    %97 = vector.shape_cast %96 : vector<4x16x32xf32> to vector<64x32xf32>
    %98 = arith.truncf %97 : vector<64x32xf32> to vector<64x32xbf16>
    %c0_35 = arith.constant 0 : index
    %c32 = arith.constant 32 : index
    %c0_36 = arith.constant 0 : index
    %99 = vector.load %arg10[%c0_35, %c32, %c0_36] : memref<1x128x128xbf16, #tpu.memory_space<vmem>>, vector<1x32x128xbf16>
    %100 = vector.shape_cast %99 : vector<1x32x128xbf16> to vector<32x128xbf16>
    %cst_37 = arith.constant dense<0.000000e+00> : vector<64x128xf32>
    %101 = tpu.matmul %98, %100, %cst_37 {dimension_numbers = #tpu.dot_dimension_numbers<[1], [0], [0], [1], [0, 0, 1, 1], [], []>} : vector<64x32xbf16>, vector<32x128xbf16>, vector<64x128xf32> -> vector<64x128xf32>
    %102 = arith.addf %71, %101 : vector<64x128xf32>
    %103 = vector.extract_strided_slice %39 {offsets = [0, 64], sizes = [64, 32], strides = [1, 1]} : vector<64x384xf32> to vector<64x32xf32>
    %104 = arith.truncf %103 : vector<64x32xf32> to vector<64x32xbf16>
    %105 = vector.shape_cast %104 : vector<64x32xbf16> to vector<4x16x32xbf16>
    %106 = vector.extract_strided_slice %39 {offsets = [0, 192], sizes = [64, 32], strides = [1, 1]} : vector<64x384xf32> to vector<64x32xf32>
    %107 = arith.truncf %106 : vector<64x32xf32> to vector<64x32xbf16>
    %108 = vector.shape_cast %107 : vector<64x32xbf16> to vector<4x16x32xbf16>
    %109 = vector.extract_strided_slice %39 {offsets = [0, 320], sizes = [64, 32], strides = [1, 1]} : vector<64x384xf32> to vector<64x32xf32>
    %110 = arith.truncf %109 : vector<64x32xf32> to vector<64x32xbf16>
    %111 = vector.shape_cast %110 : vector<64x32xbf16> to vector<4x16x32xbf16>
    "tpu.trace_start"() <{level = 10 : i32, message = "bqd,bkd->bqk"}> : () -> ()
    %cst_38 = arith.constant dense<0.000000e+00> : vector<4x16x16xf32>
    %112 = tpu.matmul %105, %108, %cst_38 {dimension_numbers = #tpu.dot_dimension_numbers<[2], [2], [1], [1], [0, 0, 0, 1, 1, 1], [0], [0]>} : vector<4x16x32xbf16>, vector<4x16x32xbf16>, vector<4x16x16xf32> -> vector<4x16x16xf32>
    "tpu.trace_stop"() : () -> ()
    %113 = vector.shape_cast %5 : vector<16x16xf32> to vector<1x16x16xf32>
    %114 = vector.broadcast %113 : vector<1x16x16xf32> to vector<4x16x16xf32>
    %115 = arith.addf %112, %114 : vector<4x16x16xf32>
    %cst_39 = arith.constant dense<0xFF800000> : vector<4x16xf32>
    %116 = vector.multi_reduction <maximumf>, %115, %cst_39 [2] : vector<4x16x16xf32> to vector<4x16xf32>
    %117 = vector.shape_cast %116 : vector<4x16xf32> to vector<4x16x1xf32>
    %118 = vector.broadcast %117 : vector<4x16x1xf32> to vector<4x16x16xf32>
    %119 = arith.subf %115, %118 : vector<4x16x16xf32>
    %120 = math.exp %119 : vector<4x16x16xf32>
    %cst_40 = arith.constant dense<0.000000e+00> : vector<4x16xf32>
    %121 = vector.multi_reduction <add>, %120, %cst_40 [2] : vector<4x16x16xf32> to vector<4x16xf32>
    %122 = vector.shape_cast %121 : vector<4x16xf32> to vector<4x16x1xf32>
    %123 = tpu.reciprocal %122 {approx = true} : vector<4x16x1xf32> -> vector<4x16x1xf32>
    %124 = vector.broadcast %123 : vector<4x16x1xf32> to vector<4x16x16xf32>
    %125 = arith.mulf %120, %124 : vector<4x16x16xf32>
    %126 = arith.truncf %125 : vector<4x16x16xf32> to vector<4x16x16xbf16>
    "tpu.trace_start"() <{level = 10 : i32, message = "bqk,bkd->bqd"}> : () -> ()
    %cst_41 = arith.constant dense<0.000000e+00> : vector<4x16x32xf32>
    %127 = tpu.matmul %126, %111, %cst_41 {dimension_numbers = #tpu.dot_dimension_numbers<[2], [1], [1], [2], [0, 0, 0, 1, 1, 2], [0], [0]>} : vector<4x16x16xbf16>, vector<4x16x32xbf16>, vector<4x16x32xf32> -> vector<4x16x32xf32>
    "tpu.trace_stop"() : () -> ()
    %128 = vector.shape_cast %127 : vector<4x16x32xf32> to vector<64x32xf32>
    %129 = arith.truncf %128 : vector<64x32xf32> to vector<64x32xbf16>
    %c0_42 = arith.constant 0 : index
    %c64 = arith.constant 64 : index
    %c0_43 = arith.constant 0 : index
    %130 = vector.load %arg10[%c0_42, %c64, %c0_43] : memref<1x128x128xbf16, #tpu.memory_space<vmem>>, vector<1x32x128xbf16>
    %131 = vector.shape_cast %130 : vector<1x32x128xbf16> to vector<32x128xbf16>
    %cst_44 = arith.constant dense<0.000000e+00> : vector<64x128xf32>
    %132 = tpu.matmul %129, %131, %cst_44 {dimension_numbers = #tpu.dot_dimension_numbers<[1], [0], [0], [1], [0, 0, 1, 1], [], []>} : vector<64x32xbf16>, vector<32x128xbf16>, vector<64x128xf32> -> vector<64x128xf32>
    %133 = arith.addf %102, %132 : vector<64x128xf32>
    %134 = vector.extract_strided_slice %39 {offsets = [0, 96], sizes = [64, 32], strides = [1, 1]} : vector<64x384xf32> to vector<64x32xf32>
    %135 = arith.truncf %134 : vector<64x32xf32> to vector<64x32xbf16>
    %136 = vector.shape_cast %135 : vector<64x32xbf16> to vector<4x16x32xbf16>
    %137 = vector.extract_strided_slice %39 {offsets = [0, 224], sizes = [64, 32], strides = [1, 1]} : vector<64x384xf32> to vector<64x32xf32>
    %138 = arith.truncf %137 : vector<64x32xf32> to vector<64x32xbf16>
    %139 = vector.shape_cast %138 : vector<64x32xbf16> to vector<4x16x32xbf16>
    %140 = vector.extract_strided_slice %39 {offsets = [0, 352], sizes = [64, 32], strides = [1, 1]} : vector<64x384xf32> to vector<64x32xf32>
    %141 = arith.truncf %140 : vector<64x32xf32> to vector<64x32xbf16>
    %142 = vector.shape_cast %141 : vector<64x32xbf16> to vector<4x16x32xbf16>
    "tpu.trace_start"() <{level = 10 : i32, message = "bqd,bkd->bqk"}> : () -> ()
    %cst_45 = arith.constant dense<0.000000e+00> : vector<4x16x16xf32>
    %143 = tpu.matmul %136, %139, %cst_45 {dimension_numbers = #tpu.dot_dimension_numbers<[2], [2], [1], [1], [0, 0, 0, 1, 1, 1], [0], [0]>} : vector<4x16x32xbf16>, vector<4x16x32xbf16>, vector<4x16x16xf32> -> vector<4x16x16xf32>
    "tpu.trace_stop"() : () -> ()
    %144 = vector.shape_cast %5 : vector<16x16xf32> to vector<1x16x16xf32>
    %145 = vector.broadcast %144 : vector<1x16x16xf32> to vector<4x16x16xf32>
    %146 = arith.addf %143, %145 : vector<4x16x16xf32>
    %cst_46 = arith.constant dense<0xFF800000> : vector<4x16xf32>
    %147 = vector.multi_reduction <maximumf>, %146, %cst_46 [2] : vector<4x16x16xf32> to vector<4x16xf32>
    %148 = vector.shape_cast %147 : vector<4x16xf32> to vector<4x16x1xf32>
    %149 = vector.broadcast %148 : vector<4x16x1xf32> to vector<4x16x16xf32>
    %150 = arith.subf %146, %149 : vector<4x16x16xf32>
    %151 = math.exp %150 : vector<4x16x16xf32>
    %cst_47 = arith.constant dense<0.000000e+00> : vector<4x16xf32>
    %152 = vector.multi_reduction <add>, %151, %cst_47 [2] : vector<4x16x16xf32> to vector<4x16xf32>
    %153 = vector.shape_cast %152 : vector<4x16xf32> to vector<4x16x1xf32>
    %154 = tpu.reciprocal %153 {approx = true} : vector<4x16x1xf32> -> vector<4x16x1xf32>
    %155 = vector.broadcast %154 : vector<4x16x1xf32> to vector<4x16x16xf32>
    %156 = arith.mulf %151, %155 : vector<4x16x16xf32>
    %157 = arith.truncf %156 : vector<4x16x16xf32> to vector<4x16x16xbf16>
    "tpu.trace_start"() <{level = 10 : i32, message = "bqk,bkd->bqd"}> : () -> ()
    %cst_48 = arith.constant dense<0.000000e+00> : vector<4x16x32xf32>
    %158 = tpu.matmul %157, %142, %cst_48 {dimension_numbers = #tpu.dot_dimension_numbers<[2], [1], [1], [2], [0, 0, 0, 1, 1, 2], [0], [0]>} : vector<4x16x16xbf16>, vector<4x16x32xbf16>, vector<4x16x32xf32> -> vector<4x16x32xf32>
    "tpu.trace_stop"() : () -> ()
    %159 = vector.shape_cast %158 : vector<4x16x32xf32> to vector<64x32xf32>
    %160 = arith.truncf %159 : vector<64x32xf32> to vector<64x32xbf16>
    %c0_49 = arith.constant 0 : index
    %c96 = arith.constant 96 : index
    %c0_50 = arith.constant 0 : index
    %161 = vector.load %arg10[%c0_49, %c96, %c0_50] : memref<1x128x128xbf16, #tpu.memory_space<vmem>>, vector<1x32x128xbf16>
    %162 = vector.shape_cast %161 : vector<1x32x128xbf16> to vector<32x128xbf16>
    %cst_51 = arith.constant dense<0.000000e+00> : vector<64x128xf32>
    %163 = tpu.matmul %160, %162, %cst_51 {dimension_numbers = #tpu.dot_dimension_numbers<[1], [0], [0], [1], [0, 0, 1, 1], [], []>} : vector<64x32xbf16>, vector<32x128xbf16>, vector<64x128xf32> -> vector<64x128xf32>
    %164 = arith.addf %133, %163 : vector<64x128xf32>
    %165 = arith.addf %4, %164 : vector<64x128xf32>
    %c0_52 = arith.constant 0 : index
    %c0_53 = arith.constant 0 : index
    %c0_54 = arith.constant 0 : index
    %166 = vector.load %arg11[%c0_52, %c0_53, %c0_54] : memref<1x1x128xf32, #tpu.memory_space<vmem>>, vector<1x1x128xf32>
    %167 = vector.shape_cast %166 : vector<1x1x128xf32> to vector<1x128xf32>
    %168 = vector.broadcast %167 : vector<1x128xf32> to vector<64x128xf32>
    %169 = arith.addf %165, %168 : vector<64x128xf32>
    %c0_55 = arith.constant 0 : index
    %c0_56 = arith.constant 0 : index
    %c0_57 = arith.constant 0 : index
    %170 = vector.load %arg12[%c0_55, %c0_56, %c0_57] : memref<1x1x128xf32, #tpu.memory_space<vmem>>, vector<1x1x128xf32>
    %171 = vector.shape_cast %170 : vector<1x1x128xf32> to vector<1x128xf32>
    %c0_58 = arith.constant 0 : index
    %c0_59 = arith.constant 0 : index
    %c0_60 = arith.constant 0 : index
    %172 = vector.load %arg13[%c0_58, %c0_59, %c0_60] : memref<1x1x128xf32, #tpu.memory_space<vmem>>, vector<1x1x128xf32>
    %173 = vector.shape_cast %172 : vector<1x1x128xf32> to vector<1x128xf32>
    %cst_61 = arith.constant dense<0.000000e+00> : vector<64xf32>
    %174 = vector.multi_reduction <add>, %169, %cst_61 [1] : vector<64x128xf32> to vector<64xf32>
    %175 = vector.shape_cast %174 : vector<64xf32> to vector<64x1xf32>
    %cst_62 = arith.constant 1.280000e+02 : f32
    %176 = vector.broadcast %cst_62 : f32 to vector<64x1xf32>
    %177 = arith.divf %175, %176 : vector<64x1xf32>
    %178 = vector.broadcast %177 : vector<64x1xf32> to vector<64x128xf32>
    %179 = arith.subf %169, %178 : vector<64x128xf32>
    %180 = arith.mulf %179, %179 : vector<64x128xf32>
    %cst_63 = arith.constant dense<0.000000e+00> : vector<64xf32>
    %181 = vector.multi_reduction <add>, %180, %cst_63 [1] : vector<64x128xf32> to vector<64xf32>
    %182 = vector.shape_cast %181 : vector<64xf32> to vector<64x1xf32>
    %cst_64 = arith.constant 1.280000e+02 : f32
    %183 = vector.broadcast %cst_64 : f32 to vector<64x1xf32>
    %184 = arith.divf %182, %183 : vector<64x1xf32>
    %185 = vector.broadcast %177 : vector<64x1xf32> to vector<64x128xf32>
    %186 = arith.subf %169, %185 : vector<64x128xf32>
    %cst_65 = arith.constant 9.99999974E-6 : f32
    %187 = vector.broadcast %cst_65 : f32 to vector<64x1xf32>
    %188 = arith.addf %184, %187 : vector<64x1xf32>
    %189 = math.rsqrt %188 : vector<64x1xf32>
    %190 = vector.broadcast %189 : vector<64x1xf32> to vector<64x128xf32>
    %191 = arith.mulf %186, %190 : vector<64x128xf32>
    %192 = vector.broadcast %171 : vector<1x128xf32> to vector<64x128xf32>
    %193 = arith.mulf %191, %192 : vector<64x128xf32>
    %194 = vector.broadcast %173 : vector<1x128xf32> to vector<64x128xf32>
    %195 = arith.addf %193, %194 : vector<64x128xf32>
    %196 = arith.truncf %195 : vector<64x128xf32> to vector<64x128xbf16>
    %c0_66 = arith.constant 0 : index
    %c0_67 = arith.constant 0 : index
    %c0_68 = arith.constant 0 : index
    %197 = vector.load %arg14[%c0_66, %c0_67, %c0_68] : memref<1x128x512xbf16, #tpu.memory_space<vmem>>, vector<1x128x512xbf16>
    %198 = vector.shape_cast %197 : vector<1x128x512xbf16> to vector<128x512xbf16>
    %cst_69 = arith.constant dense<0.000000e+00> : vector<64x512xf32>
    %199 = tpu.matmul %196, %198, %cst_69 {dimension_numbers = #tpu.dot_dimension_numbers<[1], [0], [0], [1], [0, 0, 1, 1], [], []>} : vector<64x128xbf16>, vector<128x512xbf16>, vector<64x512xf32> -> vector<64x512xf32>
    %c0_70 = arith.constant 0 : index
    %c0_71 = arith.constant 0 : index
    %c0_72 = arith.constant 0 : index
    %200 = vector.load %arg15[%c0_70, %c0_71, %c0_72] : memref<1x1x512xf32, #tpu.memory_space<vmem>>, vector<1x1x512xf32>
    %201 = vector.shape_cast %200 : vector<1x1x512xf32> to vector<1x512xf32>
    %202 = vector.broadcast %201 : vector<1x512xf32> to vector<64x512xf32>
    %203 = arith.addf %199, %202 : vector<64x512xf32>
    %cst_73 = arith.constant 1.702000e+00 : f32
    %204 = vector.broadcast %cst_73 : f32 to vector<64x512xf32>
    %205 = arith.mulf %204, %203 : vector<64x512xf32>
    %206 = arith.negf %205 : vector<64x512xf32>
    %207 = math.exp %206 : vector<64x512xf32>
    %cst_74 = arith.constant 1.000000e+00 : f32
    %208 = vector.broadcast %cst_74 : f32 to vector<64x512xf32>
    %209 = arith.addf %208, %207 : vector<64x512xf32>
    %210 = arith.divf %208, %209 : vector<64x512xf32>
    %211 = arith.mulf %203, %210 : vector<64x512xf32>
    %212 = arith.truncf %211 : vector<64x512xf32> to vector<64x512xbf16>
    %c0_75 = arith.constant 0 : index
    %c0_76 = arith.constant 0 : index
    %c0_77 = arith.constant 0 : index
    %213 = vector.load %arg16[%c0_75, %c0_76, %c0_77] : memref<1x512x128xbf16, #tpu.memory_space<vmem>>, vector<1x512x128xbf16>
    %214 = vector.shape_cast %213 : vector<1x512x128xbf16> to vector<512x128xbf16>
    %cst_78 = arith.constant dense<0.000000e+00> : vector<64x128xf32>
    %215 = tpu.matmul %212, %214, %cst_78 {dimension_numbers = #tpu.dot_dimension_numbers<[1], [0], [0], [1], [0, 0, 1, 1], [], []>} : vector<64x512xbf16>, vector<512x128xbf16>, vector<64x128xf32> -> vector<64x128xf32>
    %c0_79 = arith.constant 0 : index
    %c0_80 = arith.constant 0 : index
    %c0_81 = arith.constant 0 : index
    %216 = vector.load %arg17[%c0_79, %c0_80, %c0_81] : memref<1x1x128xf32, #tpu.memory_space<vmem>>, vector<1x1x128xf32>
    %217 = vector.shape_cast %216 : vector<1x1x128xf32> to vector<1x128xf32>
    %218 = vector.broadcast %217 : vector<1x128xf32> to vector<64x128xf32>
    %219 = arith.addf %215, %218 : vector<64x128xf32>
    %220 = arith.addf %169, %219 : vector<64x128xf32>
    %221 = vector.shape_cast %220 : vector<64x128xf32> to vector<4x16x128xf32>
    %c0_82 = arith.constant 0 : index
    %c0_83 = arith.constant 0 : index
    %c0_84 = arith.constant 0 : index
    %222 = vector.load %arg22[%c0_82, %c0_83, %c0_84] : memref<4x16x128xf32, #tpu.memory_space<vmem>>, vector<4x16x128xf32>
    tpu.vector_store %arg22[%c0_82, %c0_83, %c0_84], %221 {strides = array<i32>} : memref<4x16x128xf32, #tpu.memory_space<vmem>>, vector<4x16x128xf32>,
    %c1_i32 = arith.constant 1 : i32
    %223 = arith.cmpi eq, %arg1, %c1_i32 : i32
    %224 = arith.extui %223 : i1 to i32
    %c0_i32_85 = arith.constant 0 : i32
    %225 = arith.cmpi ne, %224, %c0_i32_85 : i32
    scf.if %225 {
      %226 = vector.shape_cast %220 : vector<64x128xf32> to vector<4x16x128xf32>
      %c0_86 = arith.constant 0 : index
      %c0_87 = arith.constant 0 : index
      %227 = vector.load %arg5[%c0_86, %c0_87] : memref<4x16xf32, #tpu.memory_space<vmem>>, vector<4x16xf32>
      %228 = vector.shape_cast %227 : vector<4x16xf32> to vector<4x16x1xf32>
      %229 = vector.broadcast %228 : vector<4x16x1xf32> to vector<4x16x128xf32>
      %230 = arith.mulf %226, %229 : vector<4x16x128xf32>
      %cst_88 = arith.constant dense<0.000000e+00> : vector<4x128xf32>
      %231 = vector.multi_reduction <add>, %230, %cst_88 [1] : vector<4x16x128xf32> to vector<4x128xf32>
      %c0_89 = arith.constant 0 : index
      %c0_90 = arith.constant 0 : index
      %232 = vector.load %arg18[%c0_89, %c0_90] : memref<1x128xf32, #tpu.memory_space<vmem>>, vector<1x128xf32>
      %c0_91 = arith.constant 0 : index
      %c0_92 = arith.constant 0 : index
      %233 = vector.load %arg19[%c0_91, %c0_92] : memref<1x128xf32, #tpu.memory_space<vmem>>, vector<1x128xf32>
      %cst_93 = arith.constant dense<0.000000e+00> : vector<4xf32>
      %234 = vector.multi_reduction <add>, %231, %cst_93 [1] : vector<4x128xf32> to vector<4xf32>
      %235 = vector.shape_cast %234 : vector<4xf32> to vector<4x1xf32>
      %cst_94 = arith.constant 1.280000e+02 : f32
      %236 = vector.broadcast %cst_94 : f32 to vector<4x1xf32>
      %237 = arith.divf %235, %236 : vector<4x1xf32>
      %238 = vector.broadcast %237 : vector<4x1xf32> to vector<4x128xf32>
      %239 = arith.subf %231, %238 : vector<4x128xf32>
      %240 = arith.mulf %239, %239 : vector<4x128xf32>
      %cst_95 = arith.constant dense<0.000000e+00> : vector<4xf32>
      %241 = vector.multi_reduction <add>, %240, %cst_95 [1] : vector<4x128xf32> to vector<4xf32>
      %242 = vector.shape_cast %241 : vector<4xf32> to vector<4x1xf32>
      %cst_96 = arith.constant 1.280000e+02 : f32
      %243 = vector.broadcast %cst_96 : f32 to vector<4x1xf32>
      %244 = arith.divf %242, %243 : vector<4x1xf32>
      %245 = vector.broadcast %237 : vector<4x1xf32> to vector<4x128xf32>
      %246 = arith.subf %231, %245 : vector<4x128xf32>
      %cst_97 = arith.constant 9.99999974E-6 : f32
      %247 = vector.broadcast %cst_97 : f32 to vector<4x1xf32>
      %248 = arith.addf %244, %247 : vector<4x1xf32>
      %249 = math.rsqrt %248 : vector<4x1xf32>
      %250 = vector.broadcast %249 : vector<4x1xf32> to vector<4x128xf32>
      %251 = arith.mulf %246, %250 : vector<4x128xf32>
      %252 = vector.broadcast %232 : vector<1x128xf32> to vector<4x128xf32>
      %253 = arith.mulf %251, %252 : vector<4x128xf32>
      %254 = vector.broadcast %233 : vector<1x128xf32> to vector<4x128xf32>
      %255 = arith.addf %253, %254 : vector<4x128xf32>
      %256 = arith.truncf %255 : vector<4x128xf32> to vector<4x128xbf16>
      %c0_98 = arith.constant 0 : index
      %c0_99 = arith.constant 0 : index
      %257 = vector.load %arg20[%c0_98, %c0_99] : memref<128x128xbf16, #tpu.memory_space<vmem>>, vector<128x128xbf16>
      %cst_100 = arith.constant dense<0.000000e+00> : vector<4x128xf32>
      %258 = tpu.matmul %256, %257, %cst_100 {dimension_numbers = #tpu.dot_dimension_numbers<[1], [0], [0], [1], [0, 0, 1, 1], [], []>} : vector<4x128xbf16>, vector<128x128xbf16>, vector<4x128xf32> -> vector<4x128xf32>
      %c0_101 = arith.constant 0 : index
      %c0_102 = arith.constant 0 : index
      %259 = vector.load %arg21[%c0_101, %c0_102] : memref<4x128xf32, #tpu.memory_space<vmem>>, vector<4x128xf32>
      tpu.vector_store %arg21[%c0_101, %c0_102], %258 {strides = array<i32>} : memref<4x128xf32, #tpu.memory_space<vmem>>, vector<4x128xf32>,
    } else {
    }
    return
  }
  func.func @transform_0(%arg0: i32, %arg1: i32) -> (i32, i32, i32) {
    %c0_i32 = arith.constant 0 : i32
    %c0_i32_0 = arith.constant 0 : i32
    %c0_i32_1 = arith.constant 0 : i32
    return %arg0, %c0_i32, %c0_i32_0 : i32, i32, i32
  }
  func.func @transform_1(%arg0: i32, %arg1: i32) -> (i32, i32) {
    %c0_i32 = arith.constant 0 : i32
    %c0_i32_0 = arith.constant 0 : i32
    %c0_i32_1 = arith.constant 0 : i32
    return %c0_i32, %c0_i32_0 : i32, i32
  }
  func.func @transform_2(%arg0: i32, %arg1: i32) -> (i32, i32) {
    %c0_i32 = arith.constant 0 : i32
    %c0_i32_0 = arith.constant 0 : i32
    %c0_i32_1 = arith.constant 0 : i32
    return %c0_i32, %c0_i32_0 : i32, i32
  }
  func.func @transform_3(%arg0: i32, %arg1: i32) -> (i32, i32) {
    %c0_i32 = arith.constant 0 : i32
    %c0_i32_0 = arith.constant 0 : i32
    return %arg0, %c0_i32 : i32, i32
  }
  func.func @transform_4(%arg0: i32, %arg1: i32) -> (i32, i32, i32) {
    %c0_i32 = arith.constant 0 : i32
    %c0_i32_0 = arith.constant 0 : i32
    %c0_i32_1 = arith.constant 0 : i32
    return %arg1, %c0_i32, %c0_i32_0 : i32, i32, i32
  }
  func.func @transform_5(%arg0: i32, %arg1: i32) -> (i32, i32, i32) {
    %c0_i32 = arith.constant 0 : i32
    %c0_i32_0 = arith.constant 0 : i32
    %c0_i32_1 = arith.constant 0 : i32
    return %arg1, %c0_i32, %c0_i32_0 : i32, i32, i32
  }
  func.func @transform_6(%arg0: i32, %arg1: i32) -> (i32, i32, i32) {
    %c0_i32 = arith.constant 0 : i32
    %c0_i32_0 = arith.constant 0 : i32
    %c0_i32_1 = arith.constant 0 : i32
    return %arg1, %c0_i32, %c0_i32_0 : i32, i32, i32
  }
  func.func @transform_7(%arg0: i32, %arg1: i32) -> (i32, i32, i32) {
    %c0_i32 = arith.constant 0 : i32
    %c0_i32_0 = arith.constant 0 : i32
    %c0_i32_1 = arith.constant 0 : i32
    return %arg1, %c0_i32, %c0_i32_0 : i32, i32, i32
  }
  func.func @transform_8(%arg0: i32, %arg1: i32) -> (i32, i32, i32) {
    %c0_i32 = arith.constant 0 : i32
    %c0_i32_0 = arith.constant 0 : i32
    %c0_i32_1 = arith.constant 0 : i32
    return %arg1, %c0_i32, %c0_i32_0 : i32, i32, i32
  }
  func.func @transform_9(%arg0: i32, %arg1: i32) -> (i32, i32, i32) {
    %c0_i32 = arith.constant 0 : i32
    %c0_i32_0 = arith.constant 0 : i32
    %c0_i32_1 = arith.constant 0 : i32
    return %arg1, %c0_i32, %c0_i32_0 : i32, i32, i32
  }
  func.func @transform_10(%arg0: i32, %arg1: i32) -> (i32, i32, i32) {
    %c0_i32 = arith.constant 0 : i32
    %c0_i32_0 = arith.constant 0 : i32
    %c0_i32_1 = arith.constant 0 : i32
    return %arg1, %c0_i32, %c0_i32_0 : i32, i32, i32
  }
  func.func @transform_11(%arg0: i32, %arg1: i32) -> (i32, i32, i32) {
    %c0_i32 = arith.constant 0 : i32
    %c0_i32_0 = arith.constant 0 : i32
    %c0_i32_1 = arith.constant 0 : i32
    return %arg1, %c0_i32, %c0_i32_0 : i32, i32, i32
  }
  func.func @transform_12(%arg0: i32, %arg1: i32) -> (i32, i32, i32) {
    %c0_i32 = arith.constant 0 : i32
    %c0_i32_0 = arith.constant 0 : i32
    %c0_i32_1 = arith.constant 0 : i32
    return %arg1, %c0_i32, %c0_i32_0 : i32, i32, i32
  }
  func.func @transform_13(%arg0: i32, %arg1: i32) -> (i32, i32, i32) {
    %c0_i32 = arith.constant 0 : i32
    %c0_i32_0 = arith.constant 0 : i32
    %c0_i32_1 = arith.constant 0 : i32
    return %arg1, %c0_i32, %c0_i32_0 : i32, i32, i32
  }
  func.func @transform_14(%arg0: i32, %arg1: i32) -> (i32, i32, i32) {
    %c0_i32 = arith.constant 0 : i32
    %c0_i32_0 = arith.constant 0 : i32
    %c0_i32_1 = arith.constant 0 : i32
    return %arg1, %c0_i32, %c0_i32_0 : i32, i32, i32
  }
  func.func @transform_15(%arg0: i32, %arg1: i32) -> (i32, i32, i32) {
    %c0_i32 = arith.constant 0 : i32
    %c0_i32_0 = arith.constant 0 : i32
    %c0_i32_1 = arith.constant 0 : i32
    return %arg1, %c0_i32, %c0_i32_0 : i32, i32, i32
  }
  func.func @transform_16(%arg0: i32, %arg1: i32) -> (i32, i32) {
    %c0_i32 = arith.constant 0 : i32
    %c0_i32_0 = arith.constant 0 : i32
    %c0_i32_1 = arith.constant 0 : i32
    return %c0_i32, %c0_i32_0 : i32, i32
  }
  func.func @transform_17(%arg0: i32, %arg1: i32) -> (i32, i32) {
    %c0_i32 = arith.constant 0 : i32
    %c0_i32_0 = arith.constant 0 : i32
    %c0_i32_1 = arith.constant 0 : i32
    return %c0_i32, %c0_i32_0 : i32, i32
  }
  func.func @transform_18(%arg0: i32, %arg1: i32) -> (i32, i32) {
    %c0_i32 = arith.constant 0 : i32
    %c0_i32_0 = arith.constant 0 : i32
    %c0_i32_1 = arith.constant 0 : i32
    return %c0_i32, %c0_i32_0 : i32, i32
  }
  func.func @transform_19(%arg0: i32, %arg1: i32) -> (i32, i32) {
    %c0_i32 = arith.constant 0 : i32
    %c0_i32_0 = arith.constant 0 : i32
    return %arg0, %c0_i32 : i32, i32
  }
}

</mosaic_0001>

<bundles_post_ra>
// kernel: tpu_custom_call.1
= control target key start
LH: loop header
LB: loop body
LE: loop exit
PB: predicated region body
PF: predicated region fallthrough
CT: control target
= control target key end

     0   :  { %s9221_s0 = inlined_call_operand.hbm [shape: f32[4,16,128], index: 0, kind: input, shape index: {}]   ;;  %s9222_s1 = inlined_call_operand.hbm [shape: f32[16,128], index: 1, kind: input, shape index: {}]   ;;  %s9223_s2 = inlined_call_operand.hbm [shape: f32[16,16], index: 2, kind: input, shape index: {}]   ;;  %s9224_s3 = inlined_call_operand.hbm [shape: f32[4,16], index: 3, kind: input, shape index: {}]   ;;  %s9225_s4 = inlined_call_operand.vmem [shape: f32[2,1,128], index: 4, kind: input, shape index: {}]   ;;  %s9226_s5 = inlined_call_operand.vmem [shape: f32[2,1,128], index: 5, kind: input, shape index: {}]   ;;  %s9227_s6 = inlined_call_operand.hbm [shape: bf16[2,128,384], index: 6, kind: input, shape index: {}]   ;;  %s9228_s7 = inlined_call_operand.hbm [shape: f32[2,1,384], index: 7, kind: input, shape index: {}]   ;;  %s9229_s8 = inlined_call_operand.hbm [shape: bf16[2,128,128], index: 8, kind: input, shape index: {}]   ;;  %s9230_s9 = inlined_call_operand.hbm [shape: f32[2,1,128], index: 9, kind: input, shape index: {}]   ;;  %s9231_s10 = inlined_call_operand.hbm [shape: f32[2,1,128], index: 10, kind: input, shape index: {}]   ;;  %s9232_s11 = inlined_call_operand.hbm [shape: f32[2,1,128], index: 11, kind: input, shape index: {}]   ;;  %s9233_s12 = inlined_call_operand.hbm [shape: bf16[2,128,512], index: 12, kind: input, shape index: {}]   ;;  %s9234_s13 = inlined_call_operand.vmem [shape: f32[2,1,512], index: 13, kind: input, shape index: {}]   ;;  %s9235_s14 = inlined_call_operand.hbm [shape: bf16[2,512,128], index: 14, kind: input, shape index: {}]   ;;  %s9236_s15 = inlined_call_operand.vmem [shape: f32[2,1,128], index: 15, kind: input, shape index: {}]   ;;  %s9237_s16 = inlined_call_operand.vmem [shape: f32[1,128], index: 16, kind: input, shape index: {}]   ;;  %s9238_s17 = inlined_call_operand.vmem [shape: f32[1,128], index: 17, kind: input, shape index: {}]   ;;  %s9239_s18 = inlined_call_operand.hbm [shape: bf16[128,128], index: 18, kind: input, shape index: {}]   ;;  %s9240_s19 = inlined_call_operand.hbm [shape: f32[4,128], index: 19, kind: output, shape index: {}]  }
   0x1   :  { %9255 = sst [smem:[#allocation33_spill]] %s9221_s0 }
   0x2   :  { %9256 = sst [smem:[#allocation34_spill]] %s9222_s1 }
   0x3   :  { %9257 = sst [smem:[#allocation35_spill]] %s9223_s2 }
   0x4   :  { %9258 = sst [smem:[#allocation36_spill]] %s9224_s3 }
   0x5   :  { %9259 = sst [smem:[#allocation37_spill]] %s9225_s4 }
   0x6   :  { %9260 = sst [smem:[#allocation38_spill]] %s9226_s5 }
   0x7   :  { %9261 = sst [smem:[#allocation39_spill]] %s9227_s6 }
   0x8   :  { %9262 = sst [smem:[#allocation40_spill]] %s9228_s7 }
   0x9   :  { %9263 = sst [smem:[#allocation41_spill]] %s9229_s8 }
   0xa   :  { %9264 = sst [smem:[#allocation42_spill]] %s9230_s9 }
   0xb   :  { %9265 = sst [smem:[#allocation43_spill]] %s9231_s10 }
   0xc   :  { %9266 = sst [smem:[#allocation44_spill]] %s9232_s11 }
   0xd   :  { %9267 = sst [smem:[#allocation45_spill]] %s9234_s13 }
   0xe   :  { %9268 = sst [smem:[#allocation46_spill]] %s9236_s15 }
   0xf   :  { %9269 = sst [smem:[#allocation47_spill]] %s9237_s16 }
  0x10   :  { %9270 = sst [smem:[#allocation48_spill]] %s9238_s17 }
  0x11   :  { %9271 = sst [smem:[#allocation49_spill]] %s9240_s19 }
  0x12   :  { %24 = vsyncpa [#allocation4], 0 }
  0x13   :  { %25 = vsyncpa [#allocation7], 0 }
  0x14   :  { %26 = vsyncpa [#allocation10], 0 }
  0x15   :  { %27 = vsyncpa [#allocation5], 0  ;;  %s6913_s0 = smov 0   ;;  %s6915_s30 = smov 0  }
  0x16   :  { %s6917_s20 = smov 0   ;;  %s6919_s21 = smov 0  }
  0x17   :  { %s6921_s1 = smov 0   ;;  %s6923_s22 = smov 0  }
  0x18 LB: > { %9272 = sst [smem:[#allocation27_spill]] %s6777_s30  ;;  %s6942_s2 = sadd.s32 4294967295, %s6793_s22   ;;  %s6793_s22 = sphi %s6923_s22, %s33_s22   ;;  %s6789_s1 = sphi %s6921_s1, %s9418_s1   ;;  %s6785_s21 = sphi %s6919_s21, %s9417_s21   ;;  %s6781_s20 = sphi %s6917_s20, %s9416_s20   ;;  %s6777_s30 = sphi %s6915_s30, %s9415_s30   ;;  %s6773_s0 = sphi %s6913_s0, %s9412_s0  }
  0x19   : > { %9273 = sst [smem:[#allocation28_spill]] %s6785_s21  ;;  %p205_p0 = scmp.ne.s32.totalorder %s6781_s20, %s6777_s30 }
  0x1a   : > { %9274 = sst [smem:[#allocation29_spill]] %s6793_s22  ;;  %p206_p1 = scmp.eq.s32.totalorder %s6793_s22, 0 }
  0x1b   : > { %p211_p2 = scmp.ne.s32.totalorder %s6777_s30, %s6773_s0  ;;  %p212_p3 = scmp.eq.s32.totalorder %s6942_s2, 0 }
  0x1c   : > { %p6950_p4 = por %p206_p1, %p205_p0  ;;  %p5186_p5 = scmp.ge.s32.totalorder %s6793_s22, 1 }
  0x1d   : > { %p6957_p6 = por %p212_p3, %p211_p2  ;;  %p545_p7 = scmp.lt.s32.totalorder %s6793_s22, 3 }
  0x1e   : > { %s9278_s27 = sld [smem:[#allocation33_spill]]  ;;  %s6795_s0 = smov [#allocation3]  }
  0x1f   : > { %s9276_s25 = scalar_select %p6957_p6, 1, 0 }
  0x20   : > { %p6965_p8 = pnand %p5186_p5, %p545_p7  ;;  %s562_s23 = sshll.u32 %s6795_s0, 4  ;;  %s563_s23 = int_to_ptr.vmem [resolvable:$true] %s562_s23 }
  0x21   : > { %9277 = sst [smem:[#allocation30_spill]] %s9276_s25  ;;  %p5914_p11 = scmp.lt.s32.totalorder %s6793_s22, 2 }
  0x22   : > { %p5868_p9 = pneg %p6965_p8  ;;  %s9241_s3 = smov 128  }
  0x23   : > { %s9243_s26 = smov 8   ;;  %p6985_p12 = pnand %p5914_p11, %p6950_p4 }
  0x24   : > { %s560_s28 = sshll.u32 %s9278_s27, 4  ;;  %p6973_p10 = pnand %p5868_p9, %p212_p3  ;;  %s561_s28 = int_to_ptr.hbm [resolvable:$true] %s560_s28 }
  0x25   : > { %s42_s0 = sadd.s32 1, %s6789_s1  ;;  %s650_s17 = sand.u32 1, %s6793_s22  }
  0x26   : > { %5871 = dma.hbm_to_vmem [thread:$0]  (!%p6973_p10), %s561_s28, 1024, %s563_s23, [#allocation4], %s9241_s3, %s9241_s3, %s9243_s26  }
  0x27   : > { %p43_p13 = scmp.ge.s32.totalorder %s42_s0, 2  ;;  %s6994_s16 = sand.u32 1, %s6781_s20  }
  0x28   : > { %s5823_s13 = smul.u32 192, %s6789_s1  ;;  %s9283_s6 = sld [smem:[#allocation39_spill]] }
  0x29   : > { %s9420_s0 = smov (%p43_p13, %s42_s0), 0  ;;  %s5822_s23 = smul.u32 192, %s6994_s16 }
  0x2a   : > { %9282 = sst [smem:[#allocation31_spill]] %s9420_s0  ;;  %s195_s15 = ssub.s32 %s6789_s1, %s9420_s0 }
  0x2b   : > { %p196_p0 = scmp.eq.s32.totalorder %s195_s15, 0  ;;  %s9284_s5 = sadd.s32 1, %s6781_s20 }
  0x2c   : > { %s654_s4 = scalar_lea.vmem [#allocation11], %s5822_s23  ;;  %s5824_s25 = smul.u32 3, %s6994_s16 }
  0x2d   : > { %s7006_s22 = scalar_select %p196_p0, %s6781_s20, %s9284_s5  }
  0x2e   : > { %s659_s3 = scalar_lea.hbm %s9283_s6, %s5823_s13  ;;  %s662_s21 = sshll.u32 %s654_s4, 4  ;;  %s663_s21 = int_to_ptr.vmem [resolvable:$true] %s662_s21 }
  0x2f   : > { %s660_s26 = sshll.u32 %s659_s3, 4  ;;  %9285 = sst [smem:[#allocation32_spill]] %s7006_s22  ;;  %s661_s26 = int_to_ptr.hbm [resolvable:$true] %s660_s26 }
  0x30   : > { %s7009_s30 = scalar_lea.sflag [#allocation4], %s650_s17  ;;  %s6798_s15 = smov 192  }
  0x31   : > { %s6799_s0 = smov 12   ;;  %s5825_s13 = smul.u32 3, %s6789_s1 }
  0x32   : > { %5887 = dma.hbm_to_vmem [thread:$0]  (!%p6985_p12), %s661_s26, 3072, %s663_s21, %s7009_s30, %s6798_s15, %s6798_s15, %s6799_s0  }
  0x33   : > { %s676_s3 = scalar_lea.vmem [#allocation12], %s5824_s25  ;;  %s9286_s7 = sld [smem:[#allocation40_spill]] }
  0x34   : > { %s684_s5 = sshll.u32 %s676_s3, 4  ;;  %s5194_s23 = sshll.u32 %s6994_s16, 6  ;;  %s685_s5 = int_to_ptr.vmem [resolvable:$true] %s684_s5 }
  0x35   : > { %s5715_s6 = sshll.u32 %s6789_s1, 6  ;;  %s9287_s8 = sld [smem:[#allocation41_spill]] }
  0x36   : > { %s695_s26 = scalar_lea.vmem [#allocation13], %s5194_s23  ;;  %s9253_s3 = smov 4  }
  0x37   : > { %s703_s0 = sshll.u32 %s695_s26, 4  ;;  %s9288_s9 = sld [smem:[#allocation42_spill]]  ;;  %s704_s0 = int_to_ptr.vmem [resolvable:$true] %s703_s0 }
  0x38   : > { %s716_s24 = scalar_lea.vmem [#allocation14], %s6994_s16  ;;  %s9289_s10 = sld [smem:[#allocation43_spill]] }
  0x39   : > { %s680_s4 = scalar_lea.hbm %s9286_s7, %s5825_s13  ;;  %s9251_s13 = smov 64  }
  0x3a   : > { %s682_s17 = sshll.u32 %s680_s4, 4  ;;  %s723_s28 = sshll.u32 %s716_s24, 4  ;;  %s683_s17 = int_to_ptr.hbm [resolvable:$true] %s682_s17  ;;  %s724_s28 = int_to_ptr.vmem [resolvable:$true] %s723_s28 }
  0x3b   : > { %5890 = dma.hbm_to_vmem [thread:$0]  (!%p6985_p12), %s683_s17, 48, %s685_s5, %s7009_s30  }
  0x3c   : > { %s700_s25 = scalar_lea.hbm %s9287_s8, %s5715_s6  ;;  %s9290_s5 = sld [smem:[#allocation34_spill]] }
  0x3d   : > { %s701_s15 = sshll.u32 %s700_s25, 4  ;;  %s719_s6 = scalar_lea.hbm %s9288_s9, %s6789_s1  ;;  %s702_s15 = int_to_ptr.hbm [resolvable:$true] %s701_s15 }
  0x3e   : > { %5893 = dma.hbm_to_vmem [thread:$0]  (!%p6985_p12), %s702_s15, 1024, %s704_s0, %s7009_s30, %s9251_s13, %s9251_s13, %s9253_s3  }
  0x3f   : > { %s721_s4 = sshll.u32 %s719_s6, 4  ;;  %s736_s21 = scalar_lea.hbm %s9289_s10, %s6789_s1  ;;  %s722_s4 = int_to_ptr.hbm [resolvable:$true] %s721_s4 }
  0x40   : > { %5896 = dma.hbm_to_vmem [thread:$0]  (!%p6985_p12), %s722_s4, 16, %s724_s28, %s7009_s30  }
  0x41   : > { %s733_s25 = scalar_lea.vmem [#allocation15], %s6994_s16  ;;  %s738_s0 = sshll.u32 %s736_s21, 4  ;;  %s739_s0 = int_to_ptr.hbm [resolvable:$true] %s738_s0 }
  0x42   : > { %s740_s26 = sshll.u32 %s733_s25, 4  ;;  %s574_s6 = sshll.u32 %s9290_s5, 4  ;;  %s741_s26 = int_to_ptr.vmem [resolvable:$true] %s740_s26  ;;  %s575_s6 = int_to_ptr.hbm [resolvable:$true] %s574_s6 }
  0x43   : > { %5899 = dma.hbm_to_vmem [thread:$0]  (!%p6985_p12), %s739_s0, 16, %s741_s26, %s7009_s30  }
  0x44   : > { %s6802_s24 = smov [#allocation6]   ;;  %s9291_s11 = sld [smem:[#allocation44_spill]] }
  0x45   : > { %s576_s28 = sshll.u32 %s6802_s24, 4  ;;  %s9292_s21 = smov 8   ;;  %s577_s28 = int_to_ptr.vmem [resolvable:$true] %s576_s28 }
  0x46   : > { %s9293_s25 = smov 128   ;;  %s750_s22 = scalar_lea.vmem [#allocation16], %s6994_s16 }
  0x47   : > { %5874 = dma.hbm_to_vmem [thread:$0]  (!%p6973_p10), %s575_s6, 256, %s577_s28, [#allocation7], %s9293_s25, %s9293_s25, %s9292_s21  }
  0x48   : > { %s757_s26 = sshll.u32 %s750_s22, 4  ;;  %s9294_s24 = sld [smem:[#allocation35_spill]]  ;;  %s758_s26 = int_to_ptr.vmem [resolvable:$true] %s757_s26 }
  0x49   : > { %s6803_s4 = smov [#allocation8]   ;;  %s5197_s3 = sshll.u32 %s6994_s16, 8 }
  0x4a   : > { %s753_s23 = scalar_lea.hbm %s9291_s11, %s6789_s1  ;;  %s590_s17 = sshll.u32 %s6803_s4, 4  ;;  %s591_s17 = int_to_ptr.vmem [resolvable:$true] %s590_s17 }
  0x4b   : > { %s755_s15 = sshll.u32 %s753_s23, 4  ;;  %s5716_s6 = sshll.u32 %s6789_s1, 8  ;;  %s756_s15 = int_to_ptr.hbm [resolvable:$true] %s755_s15 }
  0x4c   : > { %5902 = dma.hbm_to_vmem [thread:$0]  (!%p6985_p12), %s756_s15, 16, %s758_s26, %s7009_s30  }
  0x4d   : > { %s773_s15 = scalar_lea.hbm %s9233_s12, %s5716_s6  ;;  %s768_s22 = scalar_lea.vmem [#allocation17], %s5197_s3 }
  0x4e   : > { %s588_s13 = sshll.u32 %s9294_s24, 4  ;;  %s776_s26 = sshll.u32 %s768_s22, 4  ;;  %s589_s13 = int_to_ptr.hbm [resolvable:$true] %s588_s13  ;;  %s777_s26 = int_to_ptr.vmem [resolvable:$true] %s776_s26 }
  0x4f   : > { %5877 = dma.hbm_to_vmem [thread:$0]  (!%p6973_p10), %s589_s13, 256, %s591_s17, [#allocation7], %s9293_s25, %s9293_s25, %s9292_s21  }
  0x50   : > { %s774_s0 = sshll.u32 %s773_s15, 4  ;;  %s9295_s4 = sld [smem:[#allocation36_spill]]  ;;  %s775_s0 = int_to_ptr.hbm [resolvable:$true] %s774_s0 }
  0x51   : > { %s6804_s8 = smov 256   ;;  %s6805_s9 = smov 16  }
  0x52   : > { %5905 = dma.hbm_to_vmem [thread:$0]  (!%p6985_p12), %s775_s0, 4096, %s777_s26, %s7009_s30, %s6804_s8, %s6804_s8, %s6805_s9  }
  0x53   : > { %s6806_s13 = smov [#allocation9]   ;;  %s622_s28 = sshll.u32 %s9239_s18, 4  ;;  %s623_s28 = int_to_ptr.hbm [resolvable:$true] %s622_s28 }
  0x54   : > { %s607_s21 = sshll.u32 %s6806_s13, 4  ;;  %s6807_s23 = smov [#allocation19]   ;;  %s608_s21 = int_to_ptr.vmem [resolvable:$true] %s607_s21 }
  0x55   : > { %s624_s15 = sshll.u32 %s6807_s23, 4  ;;  %s802_s24 = scalar_lea.hbm %s9235_s14, %s5716_s6  ;;  %s625_s15 = int_to_ptr.vmem [resolvable:$true] %s624_s15 }
  0x56   : > { %s605_s7 = sshll.u32 %s9295_s4, 4  ;;  %s803_s8 = sshll.u32 %s802_s24, 4  ;;  %s606_s7 = int_to_ptr.hbm [resolvable:$true] %s605_s7  ;;  %s804_s8 = int_to_ptr.hbm [resolvable:$true] %s803_s8 }
  0x57   : > { %5880 = dma.hbm_to_vmem [thread:$0]  (!%p6973_p10), %s606_s7, 64, %s608_s21, [#allocation10]  }
  0x58   : > { %s9296_s9 = smov 4   ;;  %s9297_s26 = smov 64  }
  0x59   : > { %5883 = dma.hbm_to_vmem [thread:$0]  (!%p6973_p10), %s623_s28, 1024, %s625_s15, [#allocation7], %s9297_s26, %s9297_s26, %s9296_s9  }
  0x5a   : > { %s797_s0 = scalar_lea.vmem [#allocation18], %s5197_s3  ;;  %823 = sbr.rel (%p6965_p8) target bundleno = 3955 (0xf73), region = 96 }
  0x5b   : > { %s805_s4 = sshll.u32 %s797_s0, 4  ;;  %s806_s4 = int_to_ptr.vmem [resolvable:$true] %s805_s4 }
  0x5c   : > { %5908 = dma.hbm_to_vmem [thread:$0]  (!%p6985_p12), %s804_s8, 4096, %s806_s4, %s7009_s30, %s9297_s26, %s9297_s26, %s9296_s9  }
  0x5f   : > { %6748 = dma.done.wait (%p212_p3), [#allocation4], 1024  }
  0x60   : > { %6750 = vsyncadd (%p212_p3), [#allocation4], 4294966272 }
  0x61   : > { %6752 = dma.done.wait (%p212_p3), [#allocation7], 512  }
  0x62   : > { %6754 = vsyncadd (%p212_p3), [#allocation7], 4294966784 }
  0x63   : > { %6756 = dma.done.wait (%p212_p3), [#allocation10], 64  }
  0x64   : > { %6758 = vsyncadd (%p212_p3), [#allocation10], 4294967232  ;;  %s9298_s7 = sld [smem:[#allocation27_spill]]  ;;  %s845_s19 = sand.u32 1, %s6942_s2  }
  0x65   : > { %s846_s27 = scalar_lea.sflag [#allocation4], %s845_s19 }
  0x6a   : > { %s7122_s30 = sand.u32 1, %s9298_s7  }
  0x6b   : > { %s5826_s29 = smul.u32 192, %s7122_s30 }
  0x6d   : > { %s7125_s3 = scalar_lea.vmem [#allocation11], %s5826_s29 }
  0x6e   : > { %6760 = dma.done.wait (%p6957_p6), %s846_s27, 12384  }
  0x6f   : > { %6762 = vsyncadd (%p6957_p6), %s846_s27, 4294954912  ;;  %s5827_s6 = smul.u32 3, %s7122_s30  ;;  %s5208_s13 = sshll.u32 %s7122_s30, 6 }
  0x70   : > { %s5209_s21 = sshll.u32 %s7122_s30, 8  ;;  %s7136_s17 = scalar_lea.vmem [#allocation13], %s5208_s13 }
  0x71   : > { %s7134_s25 = scalar_lea.vmem [#allocation12], %s5827_s6  ;;  %s7141_s22 = scalar_lea.vmem [#allocation17], %s5209_s21 }
  0x72   : > { %s7143_s5 = scalar_lea.vmem [#allocation18], %s5209_s21 }
  0x73   : > { %6764 = dma.done.wait (%p212_p3), [#allocation7], 1024  }
  0x74   : > { %6766 = vsyncadd (%p212_p3), [#allocation7], 4294966272  ;;  %s9300_s24 = sld [smem:[#allocation28_spill]] }
  0x75   : > { %s9301_s0 = sld [smem:[#allocation37_spill]] }
  0x76   : > { %s9302_s19 = sld [smem:[#allocation38_spill]] }
  0x77   : > { %s9303_s21 = sld [smem:[#allocation46_spill]] }
  0x78   : > { %s9304_s10 = sld [smem:[#allocation45_spill]] }
  0x7a   : > { %p1018_p1 = scmp.lt.s32.totalorder %s9300_s24, 1  ;;  %p5213_p2 = scmp.ne.s32.totalorder %s9300_s24, 0 }
  0x7c   : > { %s7151_s8 = scalar_select %p1018_p1, %s9300_s24, 1 }
  0x7d   : > { %1035 = sbr.rel (%p5213_p2) target bundleno = 142 (0x8e), region = 152 }
  0x7e   : > { %s1020_s4 = scalar_lea.vmem %s9301_s0, %s7151_s8  ;;  %s1023_s29 = scalar_lea.vmem %s9302_s19, %s7151_s8 }
  0x7f   : > { %s5212_s27 = sshll.u32 %s7151_s8, 2  ;;  %s1030_s15 = scalar_lea.vmem %s9303_s21, %s7151_s8 }
  0x80   : > { %s7169_s11 = scalar_lea.vmem %s9304_s10, %s5212_s27 }
  0x82   : > { %v1036_v0 = vld [vmem:[#allocation3] sm:$0xff]  ;;  %v1037_v2 = vld [vmem:[#allocation3 + $0x8] sm:$0xff]  ;;  %v1038_v5 = vld [vmem:[#allocation3 + $0x10] sm:$0xff] }
  0x83   : > { %v1044_v1 = vld [vmem:[#allocation6] sm:$0xff]  ;;  %v1045_v4 = vld [vmem:[#allocation6 + $0x8] sm:$0xff]  ;;  %v1039_v6 = vld [vmem:[#allocation3 + $0x18] sm:$0xff] }
  0x84   : > { %v1046_v3 = vadd.f32 %v1044_v1, %v1036_v0  ;;  %v1047_v7 = vadd.f32 %v1045_v4, %v1037_v2  ;;  %v1048_v8 = vadd.f32 %v1044_v1, %v1038_v5  ;;  %v1049_v9 = vadd.f32 %v1045_v4, %v1039_v6  ;;  %v1040_v10 = vld [vmem:[#allocation3 + $0x20] sm:$0xff]  ;;  %v1041_v11 = vld [vmem:[#allocation3 + $0x28] sm:$0xff]  ;;  %v1042_v12 = vld [vmem:[#allocation3 + $0x30] sm:$0xff] }
  0x85   : > { %v1050_v13 = vadd.f32 %v1044_v1, %v1040_v10  ;;  %v1043_v14 = vld [vmem:[#allocation3 + $0x38] sm:$0xff]  ;;  %v1051_v15 = vadd.f32 %v1045_v4, %v1041_v11  ;;  %v1052_v16 = vadd.f32 %v1044_v1, %v1042_v12 }
  0x86   : > { %1054 = vst [vmem:[#allocation2 + $0x30] sm:$0xff] %v1046_v3  ;;  %v1053_v17 = vadd.f32 %v1045_v4, %v1043_v14 }
  0x87   : > { %1055 = vst [vmem:[#allocation2] sm:$0xff] %v1047_v7 }
  0x88   : > { %1056 = vst [vmem:[#allocation2 + $0x18] sm:$0xff] %v1048_v8 }
  0x89   : > { %1057 = vst [vmem:[#allocation2 + $0x10] sm:$0xff] %v1049_v9 }
  0x8a   : > { %1058 = vst [vmem:[#allocation2 + $0x8] sm:$0xff] %v1050_v13 }
  0x8b   : > { %1059 = vst [vmem:[#allocation2 + $0x20] sm:$0xff] %v1051_v15 }
  0x8c   : > { %1060 = vst [vmem:[#allocation2 + $0x28] sm:$0xff] %v1052_v16 }
  0x8d   : > { %1061 = vst [vmem:[#allocation2 + $0x38] sm:$0xff] %v1053_v17 }
  0x8e PF: > { %v1062_v20 = vld [vmem:[#allocation2 + $0x30] sm:$0xff]  ;;  %v1063_v23 = vld [vmem:[#allocation2] sm:$0xff]  ;;  %v6808_v24 = vmov 128.0   ;;  %v5300_v57 = vld [vmem:[%s7125_s3 + $0xa8] sm:$0xf]  ;;  %s6810_s26 = smov 64  }
  0x8f   : > { %v1064_v19 = vld [vmem:[#allocation2 + $0x18] sm:$0xff]  ;;  %1074 = vadd.xlane.f32.xlu0 %v1062_v20  ;;  %5994 = vrcp.f32 %v6808_v24  ;;  %v5739_v59 = vld [vmem:[%s7125_s3 + $0xac] sm:$0xf]  ;;  %v5308_v62 = vld [vmem:[%s7125_s3 + $0xb0] sm:$0xf]  ;;  %s6811_s0 = smov 32  }
  0x90   : > { %1078 = vadd.xlane.f32.xlu1 %v1064_v19  ;;  %v1065_v22 = vld [vmem:[#allocation2 + $0x10] sm:$0xff]  ;;  %v5740_v58 = vld [vmem:[%s7125_s3 + $0xb0] sm:$0xf0]  ;;  %v5302_v61 = vld [vmem:[%s7125_s3 + $0xb4] sm:$0xf0] }
  0x91   : > { %v1066_v18 = vld [vmem:[#allocation2 + $0x8] sm:$0xff]  ;;  %v5301_v60 = vor.u32 %v5740_v58, %v5300_v57  ;;  %v5741_v63 = vld [vmem:[%s7125_s3 + $0xb8] sm:$0xf0]  ;;  %v5305_v0 = vor.u32 %v5739_v59, %v5302_v61  ;;  %v5288_v2 = vld [vmem:[%s7125_s3 + $0x90] sm:$0xf] }
  0x92   : > { %1082 = vadd.xlane.f32.xlu2 %v1066_v18  ;;  %v1067_v21 = vld [vmem:[#allocation2 + $0x20] sm:$0xff]  ;;  %v5309_v1 = vor.u32 %v5741_v63, %v5308_v62  ;;  %v5736_v4 = vld [vmem:[%s7125_s3 + $0x94] sm:$0xf]  ;;  %v5296_v7 = vld [vmem:[%s7125_s3 + $0x98] sm:$0xf] }
  0x93   : > { %v7204_v55 = vld [vmem:[#allocation2 + $0x28] sm:$0xff]  ;;  %1435 = vmatpush.bf16.msra.mxu0 %v5301_v60  ;;  %1464 = vmatpush.bf16.msra.mxu1 %v5305_v0  ;;  %v5737_v3 = vld [vmem:[%s7125_s3 + $0x98] sm:$0xf0]  ;;  %v5290_v6 = vld [vmem:[%s7125_s3 + $0x9c] sm:$0xf0] }
  0x94   : > { %v7207_v56 = vld [vmem:[#allocation2 + $0x38] sm:$0xff]  ;;  %1493 = vmatpush.bf16.msra.mxu2 %v5309_v1  ;;  %v5289_v5 = vor.u32 %v5737_v3, %v5288_v2  ;;  %v5738_v8 = vld [vmem:[%s7125_s3 + $0xa0] sm:$0xf0]  ;;  %v5293_v9 = vor.u32 %v5736_v4, %v5290_v6  ;;  %v5733_v13 = vld [vmem:[%s7125_s3 + $0x7c] sm:$0xf] }
  0x95   : > { %v5995_v25 = vpop.eup %5994  ;;  %v5297_v10 = vor.u32 %v5738_v8, %v5296_v7  ;;  %v5276_v11 = vld [vmem:[%s7125_s3 + $0x78] sm:$0xf]  ;;  %v5734_v12 = vld [vmem:[%s7125_s3 + $0x80] sm:$0xf0]  ;;  %v5278_v15 = vld [vmem:[%s7125_s3 + $0x84] sm:$0xf0] }
  0x96   : > { %v1091_v26 = vmul.f32 128.0, %v5995_v25  ;;  %vm1095_vm0 = vweird.f32 %v5995_v25  ;;  %v5277_v14 = vor.u32 %v5734_v12, %v5276_v11  ;;  %v5284_v16 = vld [vmem:[%s7125_s3 + $0x80] sm:$0xf]  ;;  %v5735_v17 = vld [vmem:[%s7125_s3 + $0x88] sm:$0xf0] }
  0x97   : > { %1076 = vadd.xlane.f32.xlu0 %v1063_v23  ;;  %1436 = vmatpush.bf16.msra.mxu0 %v5289_v5  ;;  %v5266_v24 = vld [vmem:[%s7125_s3 + $0x6c] sm:$0xf0]  ;;  %v5722_v57 = vld [vmem:[%s7125_s3 + $0x20] sm:$0xf0]  ;;  %v5721_v58 = vld [vmem:[%s7125_s3 + $0x1c] sm:$0xf] }
  0x98   : > { %1080 = vadd.xlane.f32.xlu1 %v1065_v22  ;;  %v1092_v27 = vsub.f32 1.0, %v1091_v26  ;;  %1465 = vmatpush.bf16.msra.mxu1 %v5293_v9  ;;  %v5732_v26 = vld [vmem:[%s7125_s3 + $0x70] sm:$0xf0]  ;;  %v5230_v61 = vld [vmem:[%s7125_s3 + $0x24] sm:$0xf0] }
  0x99   : > { %1494 = vmatpush.bf16.msra.mxu2 %v5297_v10  ;;  %v5236_v62 = vld [vmem:[%s7125_s3 + $0x20] sm:$0xf]  ;;  %v5723_v63 = vld [vmem:[%s7125_s3 + $0x28] sm:$0xf0]  ;;  %v5233_v1 = vor.u32 %v5721_v58, %v5230_v61  ;;  %v5718_v9 = vld [vmem:[%s7125_s3 + $0x4] sm:$0xf] }
  0x9a   : > { %1084 = vadd.xlane.f32.xlu2 %v1067_v21  ;;  %v1093_v28 = vmul.f32 %v5995_v25, %v1092_v27  ;;  %v5237_v2 = vor.u32 %v5723_v63, %v5236_v62  ;;  %v5216_v5 = vld [vmem:[%s7125_s3] sm:$0xf]  ;;  %v5719_v6 = vld [vmem:[%s7125_s3 + $0x8] sm:$0xf0]  ;;  %v5218_v10 = vld [vmem:[%s7125_s3 + $0xc] sm:$0xf0] }
  0x9b   : > { %1437 = vmatpush.bf16.msra.mxu0 %v5277_v14  ;;  %v5217_v8 = vor.u32 %v5719_v6, %v5216_v5  ;;  %v5221_v11 = vor.u32 %v5718_v9, %v5218_v10  ;;  %v5224_v12 = vld [vmem:[%s7125_s3 + $0x8] sm:$0xf]  ;;  %v7302_v63 = vld [vmem:[%s1020_s4] ss:$0 sm:$0xff]  ;;  %s9309_s4 = scalar_lea.vmem [#allocation16], %s7122_s30 }
  0x9c   : > { %v1094_v29 = vadd.f32 %v5995_v25, %v1093_v28  ;;  %v7313_v6 = vld [vmem:[%s1023_s29] ss:$0 sm:$0xff] }
  0x9e   : > { %v7172_v30 = vsel %vm1095_vm0, %v5995_v25, %v1094_v29  ;;  %v5272_v25 = vld [vmem:[%s7125_s3 + $0x68] sm:$0xf] }
  0x9f   : > { %v5273_v28 = vor.u32 %v5732_v26, %v5272_v25  ;;  %v5252_v29 = vld [vmem:[%s7125_s3 + $0x48] sm:$0xf] }
 0x102   : > { %v1075_v34 = vpop.xlane.xlu0 %1074 }
 0x103   : > { %v1079_v32 = vpop.xlane.xlu1 %1078  ;;  %v1097_v35 = vmul.f32 %v7172_v30, %v1075_v34  ;;  %v5254_v34 = vld [vmem:[%s7125_s3 + $0x54] sm:$0xf0] }
 0x104   : > { %v1099_v33 = vmul.f32 %v7172_v30, %v1079_v32  ;;  %v5727_v32 = vld [vmem:[%s7125_s3 + $0x4c] sm:$0xf] }
 0x105   : > { %v1083_v31 = vpop.xlane.xlu2 %1082  ;;  %v7178_v37 = vsub.f32 %v1062_v20, %v1097_v35  ;;  %v5264_v20 = vld [vmem:[%s7125_s3 + $0x60] sm:$0xf]  ;;  %v5260_v35 = vld [vmem:[%s7125_s3 + $0x50] sm:$0xf] }
 0x106   : > { %v7176_v36 = vsub.f32 %v1064_v19, %v1099_v33  ;;  %v1101_v48 = vmul.f32 %v7172_v30, %v1083_v31  ;;  %v5285_v19 = vor.u32 %v5735_v17, %v5284_v16  ;;  %v5728_v31 = vld [vmem:[%s7125_s3 + $0x50] sm:$0xf0] }
 0x107   : > { %v1113_v39 = vmul.f32 %v7178_v37, %v7178_v37  ;;  %v5253_v33 = vor.u32 %v5728_v31, %v5252_v29 }
 0x108   : > { %v1115_v38 = vmul.f32 %v7176_v36, %v7176_v36  ;;  %v7200_v53 = vsub.f32 %v1066_v18, %v1101_v48  ;;  %v5281_v18 = vor.u32 %v5733_v13, %v5278_v15  ;;  %1495 = vmatpush.bf16.msra.mxu2 %v5285_v19  ;;  %v5248_v48 = vld [vmem:[%s7125_s3 + $0x38] sm:$0xf]  ;;  %v5720_v13 = vld [vmem:[%s7125_s3 + $0x10] sm:$0xf0] }
 0x109   : > { %1121 = vadd.xlane.f32.xlu0 %v1113_v39  ;;  %v5257_v39 = vor.u32 %v5727_v32, %v5254_v34  ;;  %v5225_v14 = vor.u32 %v5720_v13, %v5224_v12 }
 0x10a   : > { %1125 = vadd.xlane.f32.xlu2 %v1115_v38  ;;  %v1077_v44 = vpop.xlane.xlu0 %1076  ;;  %v1117_v54 = vmul.f32 %v7200_v53, %v7200_v53  ;;  %1466 = vmatpush.bf16.msra.mxu1 %v5281_v18  ;;  %v5729_v38 = vld [vmem:[%s7125_s3 + $0x58] sm:$0xf0] }
 0x10b   : > { %v1081_v41 = vpop.xlane.xlu1 %1080  ;;  %v1098_v45 = vmul.f32 %v7172_v30, %v1077_v44 }
 0x10c   : > { %v1100_v43 = vmul.f32 %v7172_v30, %v1081_v41  ;;  %1496 = vmatpush.bf16.msra.mxu2 %v5273_v28  ;;  %v5240_v41 = vld [vmem:[%s7125_s3 + $0x30] sm:$0xf] }
 0x10d   : > { %v1085_v40 = vpop.xlane.xlu2 %1084  ;;  %v7192_v49 = vsub.f32 %v1063_v23, %v1098_v45  ;;  %v5242_v45 = vld [vmem:[%s7125_s3 + $0x3c] sm:$0xf0] }
 0x10e   : > { %v1102_v42 = vmul.f32 %v7172_v30, %v1085_v40  ;;  %v7189_v47 = vsub.f32 %v1065_v22, %v1100_v43  ;;  %v5730_v22 = vld [vmem:[%s7125_s3 + $0x64] sm:$0xf]  ;;  %v5261_v40 = vor.u32 %v5729_v38, %v5260_v35  ;;  %v5724_v43 = vld [vmem:[%s7125_s3 + $0x34] sm:$0xf] }
 0x10f   : > { %v1114_v52 = vmul.f32 %v7192_v49, %v7192_v49  ;;  %v5269_v27 = vor.u32 %v5730_v22, %v5266_v24 }
 0x110   : > { %v7187_v46 = vsub.f32 %v1067_v21, %v1102_v42  ;;  %v1116_v51 = vmul.f32 %v7189_v47, %v7189_v47  ;;  %v5731_v21 = vld [vmem:[%s7125_s3 + $0x68] sm:$0xf0]  ;;  %1497 = vmatpush.bf16.msra.mxu2 %v5261_v40  ;;  %v5725_v42 = vld [vmem:[%s7125_s3 + $0x38] sm:$0xf0] }
 0x111   : > { %1123 = vadd.xlane.f32.xlu1 %v1114_v52  ;;  %v5265_v23 = vor.u32 %v5731_v21, %v5264_v20  ;;  %1467 = vmatpush.bf16.msra.mxu1 %v5269_v27  ;;  %v5241_v44 = vor.u32 %v5725_v42, %v5240_v41 }
 0x112   : > { %v1118_v50 = vmul.f32 %v7187_v46, %v7187_v46  ;;  %1127 = vadd.xlane.f32.xlu0 %v1116_v51  ;;  %v5245_v51 = vor.u32 %v5724_v43, %v5242_v45 }
 0x113   : > { %1438 = vmatpush.bf16.msra.mxu0 %v5265_v23 }
 0x114   : > { %1131 = vadd.xlane.f32.xlu2 %v1118_v50  ;;  %v5726_v50 = vld [vmem:[%s7125_s3 + $0x40] sm:$0xf0] }
 0x115   : > { %1468 = vmatpush.bf16.msra.mxu1 %v5257_v39  ;;  %v5249_v52 = vor.u32 %v5726_v50, %v5248_v48 }
 0x117   : > { %1439 = vmatpush.bf16.msra.mxu0 %v5253_v33  ;;  %1498 = vmatpush.bf16.msra.mxu2 %v5249_v52 }
 0x119   : > { %1129 = vadd.xlane.f32.xlu1 %v1117_v54  ;;  %1469 = vmatpush.bf16.msra.mxu1 %v5245_v51  ;;  %v5228_v54 = vld [vmem:[%s7125_s3 + $0x18] sm:$0xf] }
 0x11a   : > { %1086 = vadd.xlane.f32.xlu0 %v7204_v55  ;;  %v5229_v60 = vor.u32 %v5722_v57, %v5228_v54 }
 0x11b   : > { %1440 = vmatpush.bf16.msra.mxu0 %v5241_v44  ;;  %1499 = vmatpush.bf16.msra.mxu2 %v5237_v2 }
 0x11d   : > { %1470 = vmatpush.bf16.msra.mxu1 %v5233_v1 }
 0x11f   : > { %1441 = vmatpush.bf16.msra.mxu0 %v5229_v60  ;;  %1500 = vmatpush.bf16.msra.mxu2 %v5225_v14 }
 0x121   : > { %1088 = vadd.xlane.f32.xlu1 %v7207_v56  ;;  %1471 = vmatpush.bf16.msra.mxu1 %v5221_v11 }
 0x123   : > { %1442 = vmatpush.bf16.msra.mxu0 %v5217_v8 }
 0x17c   : > { %v1122_v0 = vpop.xlane.xlu0 %1121 }
 0x17d   : > { %v1126_v59 = vpop.xlane.xlu2 %1125  ;;  %v1137_v3 = vmul.f32 %v1122_v0, %v7172_v30 }
 0x17e   : > { %v1139_v4 = vmul.f32 %v1126_v59, %v7172_v30 }
 0x17f   : > { %v1145_v7 = vadd.f32 1e-05, %v1137_v3 }
 0x180   : > { %v7260_v15 = vadd.f32 1e-05, %v1139_v4 }
 0x181   : > { %5996 = vrsqrt.f32 %v1145_v7  ;;  %vm1159_vm2 = vweird.f32 %v1145_v7 }
 0x182   : > { %5998 = vrsqrt.f32 %v7260_v15  ;;  %vm1179_vm9 = vweird.f32 %v7260_v15 }
 0x184   : > { %v1124_v16 = vpop.xlane.xlu1 %1123 }
 0x185   : > { %v1128_v17 = vpop.xlane.xlu0 %1127  ;;  %v1138_v18 = vmul.f32 %v1124_v16, %v7172_v30 }
 0x186   : > { %v1140_v19 = vmul.f32 %v1128_v17, %v7172_v30 }
 0x187   : > { %v5997_v20 = vpop.eup %5996  ;;  %v1146_v21 = vadd.f32 1e-05, %v1138_v18  ;;  %v1132_v25 = vpop.xlane.xlu2 %1131 }
 0x188   : > { %v7265_v22 = vadd.f32 1e-05, %v1140_v19  ;;  %v1154_v23 = vmul.f32 %v5997_v20, %v1145_v7  ;;  %v7268_v26 = vpop.eup %5998  ;;  %v1142_v38 = vmul.f32 %v1132_v25, %v7172_v30  ;;  %vm1160_vm1 = vweird.f32 %v5997_v20 }
 0x189   : > { %6000 = vrsqrt.f32 %v1146_v21  ;;  %v1174_v35 = vmul.f32 %v7268_v26, %v7260_v15  ;;  %vm1161_vm3 = vmor %vm1159_vm2, %vm1160_vm1  ;;  %vm1169_vm5 = vweird.f32 %v1146_v21  ;;  %vm1180_vm10 = vweird.f32 %v7268_v26 }
 0x18a   : > { %v1155_v24 = vmul.f32 %v5997_v20, %v1154_v23  ;;  %6002 = vrsqrt.f32 %v7265_v22  ;;  %v7284_v48 = vadd.f32 1e-05, %v1142_v38  ;;  %vm1189_vm7 = vweird.f32 %v7265_v22  ;;  %vm1181_vm12 = vmor %vm1179_vm9, %vm1180_vm10 }
 0x18b   : > { %v1175_v51 = vmul.f32 %v7268_v26, %v1174_v35  ;;  %vm1556_vm9 = vcmask 261120   ;;  %vm1667_vm10 = vcmask 130048  }
 0x18c   : > { %v1156_v27 = vmul.f32 0.5, %v1155_v24  ;;  %v1130_v28 = vpop.xlane.xlu1 %1129  ;;  %vm1209_vm15 = vweird.f32 %v7284_v48 }
 0x18d   : > { %v1087_v29 = vpop.xlane.xlu0 %1086  ;;  %v1141_v31 = vmul.f32 %v1130_v28, %v7172_v30  ;;  %v1176_v0 = vmul.f32 0.5, %v1175_v51 }
 0x18e   : > { %v1103_v32 = vmul.f32 %v7172_v30, %v1087_v29  ;;  %v1157_v33 = vsub.f32 1.5, %v1156_v27 }
 0x18f   : > { %v6001_v34 = vpop.eup %6000  ;;  %v7282_v44 = vadd.f32 1e-05, %v1141_v31  ;;  %v1177_v7 = vsub.f32 1.5, %v1176_v0  ;;  %v7345_v0 = vld [vmem:[%s7134_s25] sm:$0x7]  ;;  %s6809_s25 = smov 96  }
 0x190   : > { %v7275_v39 = vpop.eup %6002  ;;  %v1158_v40 = vmul.f32 %v5997_v20, %v1157_v33  ;;  %v1164_v41 = vmul.f32 %v6001_v34, %v1146_v21  ;;  %v7278_v42 = vsub.f32 %v7204_v55, %v1103_v32  ;;  %vm1170_vm4 = vweird.f32 %v6001_v34 }
 0x191   : > { %v1184_v43 = vmul.f32 %v7275_v39, %v7265_v22  ;;  %6004 = vrsqrt.f32 %v7282_v44  ;;  %vm1171_vm6 = vmor %vm1169_vm5, %vm1170_vm4  ;;  %vm1190_vm8 = vweird.f32 %v7275_v39  ;;  %v1178_v13 = vmul.f32 %v7268_v26, %v1177_v7 }
 0x192   : > { %v1165_v45 = vmul.f32 %v6001_v34, %v1164_v41  ;;  %v1162_v52 = vsel %vm1161_vm3, %v5997_v20, %v1158_v40  ;;  %v1119_v55 = vmul.f32 %v7278_v42, %v7278_v42  ;;  %6006 = vrsqrt.f32 %v7284_v48  ;;  %vm1191_vm11 = vmor %vm1189_vm7, %vm1190_vm8 }
 0x193   : > { %v1185_v50 = vmul.f32 %v7275_v39, %v1184_v43  ;;  %v1233_v61 = vmul.f32 %v1162_v52, %v7178_v37  ;;  %v1182_v18 = vsel %vm1181_vm12, %v7268_v26, %v1178_v13  ;;  %vm1199_vm13 = vweird.f32 %v7282_v44 }
 0x194   : > { %v1166_v54 = vmul.f32 0.5, %v1165_v45  ;;  %v1089_v57 = vpop.xlane.xlu1 %1088  ;;  %1133 = vadd.xlane.f32.xlu2 %v1119_v55  ;;  %v1235_v22 = vmul.f32 %v1182_v18, %v7176_v36 }
 0x195   : > { %v1104_v58 = vmul.f32 %v7172_v30, %v1089_v57  ;;  %v1186_v60 = vmul.f32 0.5, %v1185_v50 }
 0x196   : > { %v1167_v59 = vsub.f32 1.5, %v1166_v54  ;;  %v1246_v27 = vmul.f32 %v7302_v63, %v1235_v22 }
 0x197   : > { %v7295_v62 = vsub.f32 %v7207_v56, %v1104_v58  ;;  %v1187_v3 = vsub.f32 1.5, %v1186_v60  ;;  %v6005_v4 = vpop.eup %6004  ;;  %v1244_v56 = vmul.f32 %v7302_v63, %v1233_v61 }
 0x198   : > { %v1168_v1 = vmul.f32 %v6001_v34, %v1167_v59  ;;  %v6007_v8 = vpop.eup %6006  ;;  %v1194_v10 = vmul.f32 %v6005_v4, %v7282_v44  ;;  %vm1200_vm14 = vweird.f32 %v6005_v4 }
 0x199   : > { %v1120_v37 = vmul.f32 %v7295_v62, %v7295_v62  ;;  %v1255_v11 = vadd.f32 %v7313_v6, %v1244_v56  ;;  %v1204_v14 = vmul.f32 %v6007_v8, %v7284_v48  ;;  %vm1210_vm0 = vweird.f32 %v6007_v8  ;;  %vm1201_vm1 = vmor %vm1199_vm13, %vm1200_vm14 }
 0x19a   : > { %v1172_v2 = vsel %vm1171_vm6, %v6001_v34, %v1168_v1  ;;  %v1195_v15 = vmul.f32 %v6005_v4, %v1194_v10  ;;  %vm1211_vm2 = vmor %vm1209_vm15, %vm1210_vm0  ;;  %v7349_v56 = vperm.slane %v7345_v0, 1 }
 0x19b   : > { %v1234_v5 = vmul.f32 %v1172_v2, %v7192_v49  ;;  %1135 = vadd.xlane.f32.xlu0 %v1120_v37  ;;  %v1188_v49 = vmul.f32 %v7275_v39, %v1187_v3  ;;  %v1205_v19 = vmul.f32 %v6007_v8, %v1204_v14 }
 0x19c   : > { %v1196_v21 = vmul.f32 0.5, %v1195_v15 }
 0x19d   : > { %v1245_v9 = vmul.f32 %v7302_v63, %v1234_v5  ;;  %v1192_v17 = vsel %vm1191_vm11, %v7275_v39, %v1188_v49  ;;  %v1206_v23 = vmul.f32 0.5, %v1205_v19 }
 0x19e   : > { %v1236_v20 = vmul.f32 %v1192_v17, %v7189_v47  ;;  %v1197_v25 = vsub.f32 1.5, %v1196_v21  ;;  %v1257_v47 = vadd.f32 %v7313_v6, %v1246_v27 }
 0x19f   : > { %v1256_v12 = vadd.f32 %v7313_v6, %v1245_v9  ;;  %v1207_v28 = vsub.f32 1.5, %v1206_v23 }
 0x1a0   : > { %v1247_v24 = vmul.f32 %v7302_v63, %v1236_v20  ;;  %v1198_v26 = vmul.f32 %v6005_v4, %v1197_v25 }
 0x1a1   : > { %v1263_v16 = vpack.c.bf16 %v1256_v12, %v1255_v11  ;;  %v1208_v36 = vmul.f32 %v6007_v8, %v1207_v28 }
 0x1a2   : > { %v1258_v29 = vadd.f32 %v7313_v6, %v1247_v24  ;;  %v1202_v32 = vsel %vm1201_vm1, %v6005_v4, %v1198_v26 }
 0x1a3   : > { %1443 = vmatmul.bf16.vlgmr.msra.gmra.mxu0 %v1263_v16  ;;  %1472 = vmatmul.bf16.vlgmr.msra.gmra.mxu1 %v1263_v16  ;;  %v1212_v33 = vsel %vm1211_vm2, %v6007_v8, %v1208_v36  ;;  %v1237_v34 = vmul.f32 %v1202_v32, %v7200_v53 }
 0x1a4   : > { %1501 = vmatmul.bf16.vlgmr.msra.gmra.mxu2 %v1263_v16  ;;  %v1264_v31 = vpack.c.bf16 %v1258_v29, %v1257_v47  ;;  %v1238_v35 = vmul.f32 %v1212_v33, %v7187_v46  ;;  %v7359_v16 = vperm.slane %v7345_v0, 0 }
 0x1a5   : > { %v1248_v38 = vmul.f32 %v7302_v63, %v1237_v34 }
 0x1a6   : > { %v1249_v39 = vmul.f32 %v7302_v63, %v1238_v35 }
 0x1a7   : > { %v1259_v40 = vadd.f32 %v7313_v6, %v1248_v38 }
 0x1a8   : > { %v1260_v41 = vadd.f32 %v7313_v6, %v1249_v39 }
 0x1aa   : > { %v1265_v43 = vpack.c.bf16 %v1260_v41, %v1259_v40 }
 0x1b3   : > { %1448 = vmatmul.bf16.gmra.mxu0 %v1264_v31  ;;  %1477 = vmatmul.bf16.gmra.mxu1 %v1264_v31 }
 0x1b4   : > { %1506 = vmatmul.bf16.gmra.mxu2 %v1264_v31 }
 0x1c3   : > { %1453 = vmatmul.bf16.gmra.mxu0 %v1265_v43  ;;  %1482 = vmatmul.bf16.gmra.mxu1 %v1265_v43 }
 0x1c4   : > { %1511 = vmatmul.bf16.gmra.mxu2 %v1265_v43 }
 0x207   : > { %v1134_v44 = vpop.xlane.xlu2 %1133 }
 0x208   : > { %v1143_v45 = vmul.f32 %v1134_v44, %v7172_v30 }
 0x20a   : > { %v1151_v48 = vadd.f32 1e-05, %v1143_v45 }
 0x20c   : > { %6008 = vrsqrt.f32 %v1151_v48  ;;  %vm1219_vm3 = vweird.f32 %v1151_v48 }
 0x20e   : > { %v1136_v53 = vpop.xlane.xlu0 %1135 }
 0x20f   : > { %v1144_v46 = vmul.f32 %v1136_v53, %v7172_v30 }
 0x211   : > { %v1152_v50 = vadd.f32 1e-05, %v1144_v46 }
 0x212   : > { %v6009_v51 = vpop.eup %6008 }
 0x213   : > { %6010 = vrsqrt.f32 %v1152_v50  ;;  %v1214_v52 = vmul.f32 %v6009_v51, %v1151_v48  ;;  %vm1220_vm4 = vweird.f32 %v6009_v51  ;;  %vm1229_vm6 = vweird.f32 %v1152_v50 }
 0x214   : > { %vm1221_vm5 = vmor %vm1219_vm3, %vm1220_vm4 }
 0x215   : > { %v1215_v54 = vmul.f32 %v6009_v51, %v1214_v52 }
 0x217   : > { %v1216_v57 = vmul.f32 0.5, %v1215_v54 }
 0x219   : > { %v6011_v55 = vpop.eup %6010  ;;  %v1217_v58 = vsub.f32 1.5, %v1216_v57 }
 0x21a   : > { %v1224_v59 = vmul.f32 %v6011_v55, %v1152_v50  ;;  %vm1230_vm7 = vweird.f32 %v6011_v55 }
 0x21b   : > { %v1218_v60 = vmul.f32 %v6009_v51, %v1217_v58  ;;  %vm1231_vm8 = vmor %vm1229_vm6, %vm1230_vm7 }
 0x21c   : > { %v1225_v61 = vmul.f32 %v6011_v55, %v1224_v59 }
 0x21d   : > { %v1222_v1 = vsel %vm1221_vm5, %v6009_v51, %v1218_v60 }
 0x21e   : > { %v1226_v2 = vmul.f32 0.5, %v1225_v61  ;;  %v1239_v3 = vmul.f32 %v1222_v1, %v7278_v42 }
 0x220   : > { %v1444_v37 = vpop.f32.mrf.mxu0  ;;  %v1473_v4 = vpop.f32.mrf.mxu1  ;;  %v1227_v5 = vsub.f32 1.5, %v1226_v2  ;;  %v1250_v8 = vmul.f32 %v7302_v63, %v1239_v3  ;;  %v7392_v3 = vperm.slane %v7345_v0, 2 }
 0x221   : > { %v1474_v49 = vadd.f32 %v1473_v4, %v7349_v56  ;;  %v1445_v21 = vadd.f32 %v1444_v37, %v7359_v16 }
 0x222   : > { %v1228_v7 = vmul.f32 %v6011_v55, %v1227_v5  ;;  %v1261_v14 = vadd.f32 %v7313_v6, %v1250_v8 }
 0x223   : > { %v1530_v17 = vpack.c.bf16 %v1474_v49, %v1474_v49 }
 0x224   : > { %v1232_v9 = vsel %vm1231_vm8, %v6011_v55, %v1228_v7 }
 0x225   : > { %v1240_v10 = vmul.f32 %v1232_v9, %v7295_v62  ;;  %v1553_v22 = vunpack.c.l.b16 %v1530_v17 }
 0x227   : > { %v7354_v11 = vpop.f32.mrf.mxu2  ;;  %v1251_v42 = vmul.f32 %v7302_v63, %v1240_v10 }
 0x228   : > { %v1446_v12 = vpop.f32.mrf.mxu0  ;;  %v1475_v13 = vpop.f32.mrf.mxu1 }
 0x229   : > { %v1476_v15 = vadd.f32 %v1475_v13, %v7349_v56  ;;  %v1262_v18 = vadd.f32 %v7313_v6, %v1251_v42  ;;  %v1447_v19 = vadd.f32 %v1446_v12, %v7359_v16  ;;  %v1522_v6 = vpack.c.bf16 %v1445_v21, %v1445_v21 }
 0x22b   : > { %v1531_v20 = vpack.c.bf16 %v1476_v15, %v1476_v15  ;;  %v1266_v62 = vpack.c.bf16 %v1262_v18, %v1261_v14  ;;  %v1523_v63 = vpack.c.bf16 %v1447_v19, %v1447_v19  ;;  %v1548_v47 = vunpack.c.l.b16 %v1522_v6 }
 0x22d   : > { %v1554_v23 = vunpack.c.l.b16 %v1531_v20  ;;  %1487 = vmatmul.bf16.gmra.mxu1 %v1266_v62  ;;  %1458 = vmatmul.bf16.gmra.mxu0 %v1266_v62  ;;  %v1549_v26 = vunpack.c.l.b16 %v1523_v63 }
 0x22e   : > { %1516 = vmatmul.bf16.gmra.mxu2 %v1266_v62 }
 0x22f   : > { %v7365_v24 = vpack.c.b16 %v1554_v23, %v1553_v22  ;;  %v7367_v25 = vpop.f32.mrf.mxu2  ;;  %v7372_v31 = vpack.c.b16 %v1549_v26, %v1548_v47 }
 0x230   : > { %v1449_v27 = vpop.f32.mrf.mxu0  ;;  %v1478_v28 = vpop.f32.mrf.mxu1 }
 0x231   : > { %v1561_v29 = vsel %vm1556_vm9, %v7365_v24, 0  ;;  %v1479_v36 = vadd.f32 %v1478_v28, %v7349_v56  ;;  %v1450_v41 = vadd.f32 %v1449_v27, %v7359_v16  ;;  %v1505_v27 = vadd.f32 %v7367_v25, %v7392_v3 }
 0x232   : > { %1570 = vmatpush.bf16.xpose.msra.mxu3 %v1561_v29  ;;  %v1503_v28 = vadd.f32 %v7354_v11, %v7392_v3 }
 0x233   : > { %v1532_v35 = vpack.c.bf16 %v1479_v36, %v1479_v36  ;;  %v1524_v51 = vpack.c.bf16 %v1450_v41, %v1450_v41  ;;  %v1539_v29 = vpack.c.bf16 %v1505_v27, %v1505_v27 }
 0x235   : > { %v1584_v43 = vunpack.c.l.b16 %v1532_v35  ;;  %v1579_v57 = vunpack.c.l.b16 %v1524_v51  ;;  %v1538_v35 = vpack.c.bf16 %v1503_v28, %v1503_v28 }
 0x237   : > { %v7374_v32 = vpop.f32.mrf.mxu2  ;;  %v1771_v11 = vunpack.c.l.b16 %v1538_v35 }
 0x238   : > { %v1451_v33 = vpop.f32.mrf.mxu0  ;;  %v1480_v34 = vpop.f32.mrf.mxu1 }
 0x239   : > { %v1481_v38 = vadd.f32 %v1480_v34, %v7349_v56  ;;  %5310 = vmatmul.msk.bf16.vlgmr.msra.gmra.mxu3 %vm1556_vm9, %v7372_v31  ;;  %v1452_v39 = vadd.f32 %v1451_v33, %v7359_v16 }
 0x23b   : > { %v1533_v40 = vpack.c.bf16 %v1481_v38, %v1481_v38  ;;  %v1525_v45 = vpack.c.bf16 %v1452_v39, %v1452_v39 }
 0x23d   : > { %v1585_v44 = vunpack.c.l.b16 %v1533_v40  ;;  %v1580_v54 = vunpack.c.l.b16 %v1525_v45  ;;  %v1772_v40 = vunpack.c.l.b16 %v1539_v29  ;;  %v1508_v45 = vadd.f32 %v7374_v32, %v7392_v3 }
 0x23f   : > { %v7381_v48 = vpack.c.b16 %v1585_v44, %v1584_v43  ;;  %v1509_v53 = vpop.f32.mrf.mxu2  ;;  %v7386_v58 = vpack.c.b16 %v1580_v54, %v1579_v57  ;;  %v1540_v57 = vpack.c.bf16 %v1508_v45, %v1508_v45 }
 0x240   : > { %v1454_v46 = vpop.f32.mrf.mxu0  ;;  %v1483_v50 = vpop.f32.mrf.mxu1  ;;  %v1510_v41 = vadd.f32 %v1509_v53, %v7392_v3 }
 0x241   : > { %v1591_v52 = vsel %vm1556_vm9, %v7381_v48, 0  ;;  %v1484_v55 = vadd.f32 %v1483_v50, %v7349_v56  ;;  %v1455_v7 = vadd.f32 %v1454_v46, %v7359_v16  ;;  %v7424_v50 = vpack.c.b16 %v1772_v40, %v1771_v11 }
 0x242   : > { %1600 = vmatpush.bf16.xpose.msrb.mxu3 %v1591_v52 }
 0x243   : > { %v1534_v1 = vpack.c.bf16 %v1484_v55, %v1484_v55  ;;  %v1526_v14 = vpack.c.bf16 %v1455_v7, %v1455_v7 }
 0x245   : > { %v1614_v8 = vunpack.c.l.b16 %v1534_v1  ;;  %v1609_v20 = vunpack.c.l.b16 %v1526_v14  ;;  %v7433_v1 = vld [vmem:[#allocation8 + $0x8] sm:$0xff] }
 0x247   : > { %v1512_v59 = vpop.f32.mrf.mxu2 }
 0x248   : > { %v1456_v60 = vpop.f32.mrf.mxu0  ;;  %v1485_v61 = vpop.f32.mrf.mxu1  ;;  %v1513_v5 = vadd.f32 %v1512_v59, %v7392_v3 }
 0x249   : > { %v1486_v2 = vadd.f32 %v1485_v61, %v7349_v56  ;;  %5311 = vmatmul.msk.bf16.vlgmr.msrb.gmra.mxu3 %vm1556_vm9, %v7386_v58  ;;  %v1457_v37 = vadd.f32 %v1456_v60, %v7359_v16  ;;  %v1799_v61 = vunpack.c.l.b16 %v1540_v57 }
 0x24a   : > { %v1542_v13 = vpack.c.bf16 %v1513_v5, %v1513_v5 }
 0x24b   : > { %v1535_v4 = vpack.c.bf16 %v1486_v2, %v1486_v2  ;;  %v1527_v49 = vpack.c.bf16 %v1457_v37, %v1457_v37 }
 0x24c   : > { %v1827_v18 = vunpack.c.l.b16 %v1542_v13 }
 0x24d   : > { %v1615_v9 = vunpack.c.l.b16 %v1535_v4  ;;  %v1610_v15 = vunpack.c.l.b16 %v1527_v49 }
 0x24f   : > { %v7397_v10 = vpack.c.b16 %v1615_v9, %v1614_v8  ;;  %v1514_v12 = vpop.f32.mrf.mxu2  ;;  %v7404_v21 = vpack.c.b16 %v1610_v15, %v1609_v20 }
 0x250   : > { %v1515_v42 = vadd.f32 %v1514_v12, %v7392_v3 }
 0x251   : > { %v1621_v0 = vsel %vm1556_vm9, %v7397_v10, 0 }
 0x252   : > { %v1543_v17 = vpack.c.bf16 %v1515_v42, %v1515_v42  ;;  %1630 = vmatpush.bf16.xpose.msra.mxu3 %v1621_v0 }
 0x254   : > { %v1828_v19 = vunpack.c.l.b16 %v1543_v17 }
 0x256   : > { %v7402_v62 = vpack.c.b16 %v1828_v19, %v1827_v18 }
 0x258   : > { %1841 = vmatpush.bf16.msrb.mxu0 %v7402_v62 }
 0x259   : > { %5312 = vmatmul.msk.bf16.vlgmr.msra.gmra.mxu3 %vm1556_vm9, %v7404_v21 }
 0x2aa   : > { %v1488_v22 = vpop.f32.mrf.mxu1  ;;  %v1459_v23 = vpop.f32.mrf.mxu0 }
 0x2ab   : > { %v1489_v63 = vadd.f32 %v1488_v22, %v7349_v56  ;;  %v1460_v33 = vadd.f32 %v1459_v23, %v7359_v16 }
 0x2ad   : > { %v1536_v6 = vpack.c.bf16 %v1489_v63, %v1489_v63  ;;  %v1528_v43 = vpack.c.bf16 %v1460_v33, %v1460_v33 }
 0x2af   : > { %v1644_v38 = vunpack.c.l.b16 %v1536_v6  ;;  %v1639_v51 = vunpack.c.l.b16 %v1528_v43 }
 0x2b1   : > { %v1517_v7 = vpop.f32.mrf.mxu2 }
 0x2b2   : > { %v1490_v26 = vpop.f32.mrf.mxu1  ;;  %v1461_v47 = vpop.f32.mrf.mxu0  ;;  %v1518_v8 = vadd.f32 %v1517_v7, %v7392_v3 }
 0x2b3   : > { %v1491_v36 = vadd.f32 %v1490_v26, %v7349_v56  ;;  %v1462_v34 = vadd.f32 %v1461_v47, %v7359_v16  ;;  %v7422_v56 = vld [vmem:[#allocation8] sm:$0xff]  ;;  %v1541_v16 = vpack.c.bf16 %v1510_v41, %v1510_v41 }
 0x2b4   : > { %v1544_v13 = vpack.c.bf16 %v1518_v8, %v1518_v8 }
 0x2b5   : > { %v1537_v39 = vpack.c.bf16 %v1491_v36, %v1491_v36  ;;  %v1529_v44 = vpack.c.bf16 %v1462_v34, %v1462_v34  ;;  %v1800_v32 = vunpack.c.l.b16 %v1541_v16 }
 0x2b6   : > { %v1855_v0 = vunpack.c.l.b16 %v1544_v13 }
 0x2b7   : > { %v1645_v25 = vunpack.c.l.b16 %v1537_v39  ;;  %v1640_v52 = vunpack.c.l.b16 %v1529_v44  ;;  %v7435_v2 = vpack.c.b16 %v1800_v32, %v1799_v61 }
 0x2b9   : > { %v7420_v46 = vpack.c.b16 %v1645_v25, %v1644_v38  ;;  %v7431_v60 = vpack.c.b16 %v1640_v52, %v1639_v51  ;;  %v1519_v42 = vpop.f32.mrf.mxu2 }
 0x2ba   : > { %v1520_v14 = vadd.f32 %v1519_v42, %v7392_v3 }
 0x2bb   : > { %v1651_v53 = vsel %vm1556_vm9, %v7420_v46, 0 }
 0x2bc   : > { %v1572_v54 = vpop.f32.mrf.mxu3  ;;  %1660 = vmatpush.bf16.xpose.msrb.mxu3 %v1651_v53  ;;  %v1545_v17 = vpack.c.bf16 %v1520_v14, %v1520_v14 }
 0x2bd   : > { %v1573_v55 = vadd.f32 %v1572_v54, %v7422_v56 }
 0x2be   : > { %v1856_v19 = vunpack.c.l.b16 %v1545_v17 }
 0x2bf   : > { %v1668_v59 = vsel %vm1667_vm10, %v1573_v55, -inf }
 0x2c0   : > { %1669 = vmax.xlane.f32.xlu1 %v1668_v59  ;;  %v7448_v22 = vpack.c.b16 %v1856_v19, %v1855_v0 }
 0x2c2   : > { %1869 = vmatpush.bf16.msrb.mxu2 %v7448_v22 }
 0x2c3   : > { %5313 = vmatmul.msk.bf16.vlgmr.msrb.gmra.mxu3 %vm1556_vm9, %v7431_v60 }
 0x2c4   : > { %1785 = vmatpush.bf16.msra.mxu3 %v7424_v50  ;;  %v1574_v37 = vpop.f32.mrf.mxu3 }
 0x2c5   : > { %v1575_v4 = vadd.f32 %v1574_v37, %v7433_v1 }
 0x2c7   : > { %v1671_v5 = vsel %vm1667_vm10, %v1575_v4, -inf }
 0x2c8   : > { %1813 = vmatpush.bf16.msrb.mxu3 %v7435_v2  ;;  %1672 = vmax.xlane.f32.xlu2 %v1671_v5 }
 0x2cc   : > { %v1602_v9 = vpop.f32.mrf.mxu3 }
 0x2cd   : > { %v1603_v49 = vadd.f32 %v1602_v9, %v7422_v56 }
 0x2cf   : > { %v1674_v12 = vsel %vm1667_vm10, %v1603_v49, -inf }
 0x2d0   : > { %1675 = vmax.xlane.f32.xlu0 %v1674_v12 }
 0x2d4   : > { %v1604_v15 = vpop.f32.mrf.mxu3 }
 0x2d5   : > { %v1605_v18 = vadd.f32 %v1604_v15, %v7433_v1 }
 0x2d7   : > { %v1677_v20 = vsel %vm1667_vm10, %v1605_v18, -inf }
 0x2d8   : > { %1678 = vmax.xlane.f32.xlu1 %v1677_v20 }
 0x2dc   : > { %v1632_v23 = vpop.f32.mrf.mxu3 }
 0x2dd   : > { %v1633_v63 = vadd.f32 %v1632_v23, %v7422_v56 }
 0x2df   : > { %v1680_v27 = vsel %vm1667_vm10, %v1633_v63, -inf }
 0x2e0   : > { %1681 = vmax.xlane.f32.xlu2 %v1680_v27 }
 0x2e4   : > { %v1634_v3 = vpop.f32.mrf.mxu3 }
 0x2e5   : > { %v1635_v28 = vadd.f32 %v1634_v3, %v7433_v1 }
 0x2e7   : > { %v1683_v6 = vsel %vm1667_vm10, %v1635_v28, -inf }
 0x2e8   : > { %1684 = vmax.xlane.f32.xlu0 %v1683_v6 }
 0x333   : > { %v1670_v29 = vpop.xlane.xlu1 %1669 }
 0x334   : > { %v1692_v26 = vsub.f32 %v1573_v55, %v1670_v29 }
 0x336   : > { %v1700_v47 = vmul.f32 1.442695, %v1692_v26 }
 0x338   : > { %6012 = vpow2.f32 %v1700_v47 }
 0x33b   : > { %v1673_v36 = vpop.xlane.xlu2 %1672 }
 0x33c   : > { %v1693_v33 = vsub.f32 %v1575_v4, %v1673_v36 }
 0x33e   : > { %v6013_v34 = vpop.eup %6012  ;;  %v1702_v35 = vmul.f32 1.442695, %v1693_v33 }
 0x33f   : > { %v1716_v38 = vsel %vm1667_vm10, %v6013_v34, 0.0 }
 0x340   : > { %6014 = vpow2.f32 %v1702_v35  ;;  %1717 = vadd.xlane.f32.xlu1 %v1716_v38 }
 0x343   : > { %v1676_v39 = vpop.xlane.xlu0 %1675 }
 0x344   : > { %v1694_v40 = vsub.f32 %v1603_v49, %v1676_v39 }
 0x346   : > { %v6015_v41 = vpop.eup %6014  ;;  %v1704_v25 = vmul.f32 1.442695, %v1694_v40 }
 0x347   : > { %v1719_v43 = vsel %vm1667_vm10, %v6015_v41, 0.0 }
 0x348   : > { %6016 = vpow2.f32 %v1704_v25  ;;  %1720 = vadd.xlane.f32.xlu2 %v1719_v43 }
 0x34b   : > { %v1679_v44 = vpop.xlane.xlu1 %1678 }
 0x34c   : > { %v1695_v11 = vsub.f32 %v1605_v18, %v1679_v44 }
 0x34e   : > { %v6017_v45 = vpop.eup %6016  ;;  %v1706_v16 = vmul.f32 1.442695, %v1695_v11 }
 0x34f   : > { %v1722_v51 = vsel %vm1667_vm10, %v6017_v45, 0.0 }
 0x350   : > { %6018 = vpow2.f32 %v1706_v16  ;;  %1723 = vadd.xlane.f32.xlu0 %v1722_v51 }
 0x353   : > { %v1682_v53 = vpop.xlane.xlu2 %1681 }
 0x354   : > { %v1696_v57 = vsub.f32 %v1633_v63, %v1682_v53 }
 0x356   : > { %v6019_v52 = vpop.eup %6018  ;;  %v1708_v32 = vmul.f32 1.442695, %v1696_v57 }
 0x357   : > { %v1725_v54 = vsel %vm1667_vm10, %v6019_v52, 0.0 }
 0x358   : > { %1726 = vadd.xlane.f32.xlu1 %v1725_v54  ;;  %6020 = vpow2.f32 %v1708_v32 }
 0x35b   : > { %v1685_v55 = vpop.xlane.xlu0 %1684 }
 0x35c   : > { %v1697_v59 = vsub.f32 %v1635_v28, %v1685_v55 }
 0x35e   : > { %v1710_v61 = vmul.f32 1.442695, %v1697_v59  ;;  %v6021_v37 = vpop.eup %6020 }
 0x35f   : > { %v1728_v4 = vsel %vm1667_vm10, %v6021_v37, 0.0 }
 0x360   : > { %1908 = vrot.lane.b32.xlu2 %v7386_v58, %s6809_s25  ;;  %6022 = vpow2.f32 %v1710_v61  ;;  %v7486_v61 = vpop.f32.mrf.mxu3 }
 0x364   : > { %1934 = vrot.lane.b32.xlu0 %v7397_v10, %s6809_s25 }
 0x366   : > { %v6023_v5 = vpop.eup %6022 }
 0x367   : > { %v1731_v7 = vsel %vm1667_vm10, %v6023_v5, 0.0 }
 0x371   : > { %1910 = vrot.lane.b32.xlu1 %v7381_v48, %s6809_s25 }
 0x379   : > { %1932 = vrot.lane.b32.xlu1 %v7404_v21, %s6809_s25 }
 0x389   : > { %1729 = vadd.xlane.f32.xlu2 %v1728_v4 }
 0x38e   : > { %1732 = vadd.xlane.f32.xlu0 %v1731_v7 }
 0x3a1   : > { %1958 = vrot.lane.b32.xlu2 %v7420_v46, %s6809_s25 }
 0x3a2   : > { %1956 = vrot.lane.b32.xlu0 %v7431_v60, %s6809_s25 }
 0x3a9   : > { %2156 = vrot.lane.b32.xlu2 %v7448_v22, %s6809_s25 }
 0x3aa   : > { %2131 = vrot.lane.b32.xlu0 %v7402_v62, %s6809_s25 }
 0x3b3   : > { %v1718_v8 = vpop.xlane.xlu1 %1717 }
 0x3b4   : > { %6024 = vrcp.f32 %v1718_v8 }
 0x3ba   : > { %v6025_v49 = vpop.eup %6024 }
 0x3bb   : > { %v1721_v9 = vpop.xlane.xlu2 %1720  ;;  %v1748_v12 = vmul.f32 %v6025_v49, %v6013_v34 }
 0x3bc   : > { %6026 = vrcp.f32 %v1721_v9 }
 0x3bd   : > { %v1756_v42 = vpack.c.bf16 %v1748_v12, %v1748_v12 }
 0x3bf   : > { %v1766_v15 = vunpack.c.l.b16 %v1756_v42 }
 0x3c2   : > { %v6027_v13 = vpop.eup %6026 }
 0x3c3   : > { %v1749_v14 = vmul.f32 %v6027_v13, %v6015_v41  ;;  %v1724_v0 = vpop.xlane.xlu0 %1723  ;;  %v1909_v38 = vpop.permute.xlu2 %1908 }
 0x3c4   : > { %6028 = vrcp.f32 %v1724_v0 }
 0x3c5   : > { %v1757_v17 = vpack.c.bf16 %v1749_v14, %v1749_v14 }
 0x3c7   : > { %v1767_v18 = vunpack.c.l.b16 %v1757_v17 }
 0x3c9   : > { %v1768_v19 = vpack.c.b16 %v1767_v18, %v1766_v15 }
 0x3ca   : > { %v6029_v23 = vpop.eup %6028 }
 0x3cb   : > { %v1727_v20 = vpop.xlane.xlu1 %1726  ;;  %5314 = vmatmul.msk.bf16.vlgmr.msra.gmra.mxu3 %vm1667_vm10, %v1768_v19  ;;  %v1750_v63 = vmul.f32 %v6029_v23, %v6017_v45 }
 0x3cc   : > { %6030 = vrcp.f32 %v1727_v20 }
 0x3cd   : > { %v1758_v3 = vpack.c.bf16 %v1750_v63, %v1750_v63 }
 0x3cf   : > { %v1794_v26 = vunpack.c.l.b16 %v1758_v3 }
 0x3d2   : > { %v6031_v27 = vpop.eup %6030 }
 0x3d3   : > { %v1751_v28 = vmul.f32 %v6031_v27, %v6019_v52 }
 0x3d5   : > { %v1759_v6 = vpack.c.bf16 %v1751_v28, %v1751_v28 }
 0x3d6   : > { %v1935_v29 = vpop.permute.xlu0 %1934 }
 0x3d7   : > { %v1795_v47 = vunpack.c.l.b16 %v1759_v6  ;;  %v1940_v36 = vsel %vm1556_vm9, %v1935_v29, 0 }
 0x3d8   : > { %1949 = vmatpush.bf16.xpose.msra.mxu0 %v1940_v36 }
 0x3d9   : > { %v1796_v33 = vpack.c.b16 %v1795_v47, %v1794_v26 }
 0x3db   : > { %5315 = vmatmul.msk.bf16.vlgmr.msrb.gmra.mxu3 %vm1667_vm10, %v1796_v33 }
 0x3e3   : > { %v1911_v34 = vpop.permute.xlu1 %1910 }
 0x3e4   : > { %v1916_v35 = vsel %vm1556_vm9, %v1911_v34, 0 }
 0x3e5   : > { %1925 = vmatpush.bf16.xpose.msra.mxu3 %v1916_v35 }
 0x3eb   : > { %v1933_v59 = vpop.permute.xlu1 %1932 }
 0x3ec   : > { %5319 = vmatmul.msk.bf16.vlgmr.msra.gmra.mxu3 %vm1556_vm9, %v1909_v38 }
 0x3fc   : > { %v1730_v39 = vpop.xlane.xlu2 %1729 }
 0x3fd   : > { %6032 = vrcp.f32 %v1730_v39 }
 0x401   : > { %v1733_v40 = vpop.xlane.xlu0 %1732 }
 0x402   : > { %6034 = vrcp.f32 %v1733_v40 }
 0x403   : > { %v6033_v41 = vpop.eup %6032 }
 0x404   : > { %v1959_v25 = vpop.permute.xlu2 %1958  ;;  %v1752_v43 = vmul.f32 %v6033_v41, %v6021_v37  ;;  %v7488_v37 = vpop.f32.mrf.mxu3 }
 0x405   : > { %v1964_v44 = vsel %vm1556_vm9, %v1959_v25, 0 }
 0x406   : > { %1973 = vmatpush.bf16.xpose.msrb.mxu3 %v1964_v44  ;;  %v1760_v45 = vpack.c.bf16 %v1752_v43, %v1752_v43 }
 0x408   : > { %v6035_v11 = vpop.eup %6034  ;;  %v1822_v54 = vunpack.c.l.b16 %v1760_v45 }
 0x409   : > { %v1753_v16 = vmul.f32 %v6035_v11, %v6023_v5 }
 0x40b   : > { %v1761_v51 = vpack.c.bf16 %v1753_v16, %v1753_v16 }
 0x40c   : > { %v2157_v52 = vpop.permute.xlu2 %2156 }
 0x40d   : > { %v1823_v53 = vunpack.c.l.b16 %v1761_v51  ;;  %2169 = vmatpush.bf16.msrb.mxu1 %v2157_v52 }
 0x40f   : > { %v1824_v57 = vpack.c.b16 %v1823_v53, %v1822_v54 }
 0x411   : > { %5316 = vmatmul.msk.bf16.vlgmr.msrb.gmra.mxu0 %vm1667_vm10, %v1824_v57 }
 0x414   : > { %v1957_v55 = vpop.permute.xlu0 %1956 }
 0x415   : > { %5321 = vmatmul.msk.bf16.vlgmr.msrb.gmra.mxu3 %vm1556_vm9, %v1957_v55  ;;  %v1663_v55 = vadd.f32 %v7486_v61, %v7422_v56 }
 0x41c   : > { %v2132_v32 = vpop.permute.xlu0 %2131 }
 0x41d   : > { %2144 = vmatpush.bf16.msrb.mxu0 %v2132_v32  ;;  %v1686_v32 = vsel %vm1667_vm10, %v1663_v55, -inf }
 0x421   : > { %5320 = vmatmul.msk.bf16.vlgmr.msra.gmra.mxu0 %vm1556_vm9, %v1933_v59  ;;  %v1665_v59 = vadd.f32 %v7488_v37, %v7433_v1 }
 0x44e   : > { %v7490_v4 = vpop.f32.mrf.mxu3 }
 0x456   : > { %v7492_v5 = vpop.f32.mrf.mxu3 }
 0x45e   : > { %v7494_v7 = vpop.f32.mrf.mxu3 }
 0x466   : > { %v7496_v8 = vpop.f32.mrf.mxu3 }
 0x46f   : > { %v7498_v9 = vpop.f32.mrf.mxu3 }
 0x477   : > { %v7502_v12 = vpop.f32.mrf.mxu3 }
 0x48e   : > { %v7500_v49 = vpop.f32.mrf.mxu0 }
 0x496   : > { %v7504_v13 = vpop.f32.mrf.mxu0 }
 0x498   : > { %v1975_v42 = vpop.f32.mrf.mxu3 }
 0x499   : > { %v1976_v14 = vadd.f32 %v1975_v42, %v7422_v56  ;;  %v1689_v42 = vsel %vm1667_vm10, %v1665_v59, -inf }
 0x49b   : > { %v1998_v0 = vsel %vm1667_vm10, %v1976_v14, -inf }
 0x49c   : > { %1999 = vmax.xlane.f32.xlu0 %v1998_v0 }
 0x49e   : > { %v1951_v17 = vpop.f32.mrf.mxu0 }
 0x49f   : > { %v1952_v15 = vadd.f32 %v1951_v17, %v7422_v56 }
 0x4a0   : > { %v1977_v19 = vpop.f32.mrf.mxu3 }
 0x4a1   : > { %v1992_v18 = vsel %vm1667_vm10, %v1952_v15, -inf  ;;  %v1978_v20 = vadd.f32 %v1977_v19, %v7433_v1 }
 0x4a2   : > { %1993 = vmax.xlane.f32.xlu2 %v1992_v18 }
 0x4a3   : > { %v2001_v3 = vsel %vm1667_vm10, %v1978_v20, -inf }
 0x4a6   : > { %v1953_v23 = vpop.f32.mrf.mxu0 }
 0x4a7   : > { %v1954_v63 = vadd.f32 %v1953_v23, %v7433_v1 }
 0x4a9   : > { %v1995_v27 = vsel %vm1667_vm10, %v1954_v63, -inf }
 0x4aa   : > { %1996 = vmax.xlane.f32.xlu1 %v1995_v27  ;;  %2002 = vmax.xlane.f32.xlu2 %v2001_v3 }
 0x4b0   : > { %2290 = vrot.lane.b32.xlu0 %v7372_v31, %s6810_s26 }
 0x4b8   : > { %2340 = vrot.lane.b32.xlu0 %v7397_v10, %s6810_s26 }
 0x4c2   : > { %2316 = vrot.lane.b32.xlu2 %v7381_v48, %s6810_s26 }
 0x4c3   : > { %2292 = vrot.lane.b32.xlu1 %v7365_v24, %s6810_s26 }
 0x50f   : > { %v2000_v28 = vpop.xlane.xlu0 %1999 }
 0x510   : > { %v2010_v6 = vsub.f32 %v1976_v14, %v2000_v28  ;;  %v1928_v14 = vadd.f32 %v7498_v9, %v7422_v56 }
 0x512   : > { %v2024_v29 = vmul.f32 1.442695, %v2010_v6  ;;  %v1986_v0 = vsel %vm1667_vm10, %v1928_v14, -inf }
 0x514   : > { %6036 = vpow2.f32 %v2024_v29 }
 0x515   : > { %v1994_v26 = vpop.xlane.xlu2 %1993 }
 0x516   : > { %v2008_v47 = vsub.f32 %v1952_v15, %v1994_v26 }
 0x518   : > { %v2020_v36 = vmul.f32 1.442695, %v2008_v47 }
 0x51a   : > { %v6037_v33 = vpop.eup %6036  ;;  %6038 = vpow2.f32 %v2020_v36 }
 0x51b   : > { %v2046_v34 = vsel %vm1667_vm10, %v6037_v33, 0.0 }
 0x51c   : > { %2047 = vadd.xlane.f32.xlu2 %v2046_v34 }
 0x51d   : > { %v1997_v35 = vpop.xlane.xlu1 %1996  ;;  %v2003_v38 = vpop.xlane.xlu2 %2002 }
 0x51e   : > { %v2009_v39 = vsub.f32 %v1954_v63, %v1997_v35  ;;  %v2011_v40 = vsub.f32 %v1978_v20, %v2003_v38 }
 0x520   : > { %v6039_v41 = vpop.eup %6038  ;;  %v2022_v25 = vmul.f32 1.442695, %v2009_v39  ;;  %v2026_v43 = vmul.f32 1.442695, %v2011_v40 }
 0x521   : > { %v2040_v44 = vsel %vm1667_vm10, %v6039_v41, 0.0 }
 0x522   : > { %6040 = vpow2.f32 %v2022_v25  ;;  %2041 = vadd.xlane.f32.xlu1 %v2040_v44  ;;  %v2291_v17 = vpop.permute.xlu0 %2290 }
 0x523   : > { %6042 = vpow2.f32 %v2026_v43 }
 0x525   : > { %v2317_v11 = vpop.permute.xlu2 %2316 }
 0x526   : > { %v2322_v45 = vsel %vm1556_vm9, %v2317_v11, 0 }
 0x527   : > { %2331 = vmatpush.bf16.xpose.msra.mxu1 %v2322_v45 }
 0x528   : > { %v6041_v16 = vpop.eup %6040 }
 0x529   : > { %v6043_v51 = vpop.eup %6042  ;;  %v2043_v52 = vsel %vm1667_vm10, %v6041_v16, 0.0 }
 0x52a   : > { %v2049_v54 = vsel %vm1667_vm10, %v6043_v51, 0.0  ;;  %2044 = vadd.xlane.f32.xlu0 %v2043_v52  ;;  %v2341_v15 = vpop.permute.xlu0 %2340 }
 0x52b   : > { %2050 = vadd.xlane.f32.xlu1 %v2049_v54  ;;  %v2346_v43 = vsel %vm1556_vm9, %v2341_v15, 0 }
 0x534   : > { %2338 = vrot.lane.b32.xlu2 %v7404_v21, %s6810_s26 }
 0x535   : > { %v2293_v53 = vpop.permute.xlu1 %2292 }
 0x536   : > { %v2298_v57 = vsel %vm1556_vm9, %v2293_v53, 0 }
 0x537   : > { %2307 = vmatpush.bf16.xpose.msra.mxu0 %v2298_v57 }
 0x53e   : > { %2364 = vrot.lane.b32.xlu0 %v7420_v46, %s6810_s26 }
 0x544   : > { %2314 = vrot.lane.b32.xlu1 %v7386_v58, %s6810_s26 }
 0x54c   : > { %2362 = vrot.lane.b32.xlu1 %v7431_v60, %s6810_s26 }
 0x55d   : > { %1687 = vmax.xlane.f32.xlu2 %v1686_v32 }
 0x568   : > { %1690 = vmax.xlane.f32.xlu0 %v1689_v42 }
 0x570   : > { %1987 = vmax.xlane.f32.xlu0 %v1986_v0  ;;  %v1930_v0 = vadd.f32 %v7502_v12, %v7433_v1 }
 0x58f   : > { %v2048_v19 = vpop.xlane.xlu2 %2047 }
 0x595   : > { %v2042_v18 = vpop.xlane.xlu1 %2041 }
 0x596   : > { %6044 = vrcp.f32 %v2042_v18  ;;  %v1989_v18 = vsel %vm1667_vm10, %v1930_v0, -inf }
 0x597   : > { %6046 = vrcp.f32 %v2048_v19  ;;  %v2339_v11 = vpop.permute.xlu2 %2338 }
 0x59c   : > { %v6045_v20 = vpop.eup %6044 }
 0x59d   : > { %v2045_v61 = vpop.xlane.xlu0 %2044  ;;  %v6047_v37 = vpop.eup %6046  ;;  %v2064_v63 = vmul.f32 %v6045_v20, %v6039_v41 }
 0x59e   : > { %v2051_v23 = vpop.xlane.xlu1 %2050  ;;  %6048 = vrcp.f32 %v2045_v61  ;;  %v2066_v27 = vmul.f32 %v6047_v37, %v6037_v33 }
 0x59f   : > { %6050 = vrcp.f32 %v2051_v23  ;;  %v2072_v9 = vpack.c.bf16 %v2064_v63, %v2064_v63 }
 0x5a0   : > { %v2074_v29 = vpack.c.bf16 %v2066_v27, %v2066_v27 }
 0x5a1   : > { %v2128_v34 = vunpack.c.l.b16 %v2072_v9 }
 0x5a2   : > { %v2153_v38 = vunpack.c.l.b16 %v2074_v29 }
 0x5a4   : > { %v6049_v3 = vpop.eup %6048 }
 0x5a5   : > { %v6051_v28 = vpop.eup %6050  ;;  %v2065_v6 = vmul.f32 %v6049_v3, %v6041_v16 }
 0x5a6   : > { %v2067_v26 = vmul.f32 %v6051_v28, %v6043_v51 }
 0x5a7   : > { %v2073_v47 = vpack.c.bf16 %v2065_v6, %v2065_v6 }
 0x5a8   : > { %v2075_v36 = vpack.c.bf16 %v2067_v26, %v2067_v26 }
 0x5a9   : > { %v2129_v35 = vunpack.c.l.b16 %v2073_v47 }
 0x5aa   : > { %v2154_v39 = vunpack.c.l.b16 %v2075_v36 }
 0x5ab   : > { %v2130_v40 = vpack.c.b16 %v2129_v35, %v2128_v34 }
 0x5ac   : > { %v2155_v25 = vpack.c.b16 %v2154_v39, %v2153_v38 }
 0x5ad   : > { %5324 = vmatmul.msk.bf16.vlgmr.msrb.gmra.mxu0 %vm1667_vm10, %v2130_v40 }
 0x5ae   : > { %5325 = vmatmul.msk.bf16.vlgmr.msrb.gmra.mxu1 %vm1667_vm10, %v2155_v25  ;;  %2355 = vmatpush.bf16.xpose.msrb.mxu0 %v2346_v43 }
 0x5b0   : > { %v2365_v33 = vpop.permute.xlu0 %2364 }
 0x5b1   : > { %v2370_v41 = vsel %vm1556_vm9, %v2365_v33, 0 }
 0x5b2   : > { %2379 = vmatpush.bf16.xpose.msrb.mxu1 %v2370_v41 }
 0x5b6   : > { %v2315_v44 = vpop.permute.xlu1 %2314 }
 0x5bd   : > { %5350 = vmatmul.msk.bf16.vlgmr.msra.gmra.mxu0 %vm1556_vm9, %v2291_v17 }
 0x5be   : > { %5351 = vmatmul.msk.bf16.vlgmr.msra.gmra.mxu1 %vm1556_vm9, %v2315_v44  ;;  %v2363_v45 = vpop.permute.xlu1 %2362 }
 0x5cd   : > { %5352 = vmatmul.msk.bf16.vlgmr.msrb.gmra.mxu0 %vm1556_vm9, %v2339_v11 }
 0x5ce   : > { %5353 = vmatmul.msk.bf16.vlgmr.msrb.gmra.mxu1 %vm1556_vm9, %v2363_v45 }
 0x5d0   : > { %v1688_v16 = vpop.xlane.xlu2 %1687 }
 0x5d1   : > { %v1698_v51 = vsub.f32 %v1663_v55, %v1688_v16 }
 0x5d3   : > { %v1712_v52 = vmul.f32 1.442695, %v1698_v51 }
 0x5d5   : > { %6052 = vpow2.f32 %v1712_v52 }
 0x5db   : > { %v6053_v54 = vpop.eup %6052  ;;  %v1691_v53 = vpop.xlane.xlu0 %1690 }
 0x5dc   : > { %v1699_v57 = vsub.f32 %v1665_v59, %v1691_v53  ;;  %v1734_v32 = vsel %vm1667_vm10, %v6053_v54, 0.0 }
 0x5dd   : > { %1735 = vadd.xlane.f32.xlu1 %v1734_v32 }
 0x5de   : > { %v1714_v42 = vmul.f32 1.442695, %v1699_v57 }
 0x5e0   : > { %6054 = vpow2.f32 %v1714_v42 }
 0x5e3   : > { %v1988_v17 = vpop.xlane.xlu0 %1987 }
 0x5e4   : > { %v2006_v15 = vsub.f32 %v1928_v14, %v1988_v17 }
 0x5e5   : > { %1990 = vmax.xlane.f32.xlu1 %v1989_v18 }
 0x5e6   : > { %v6055_v19 = vpop.eup %6054  ;;  %v2016_v55 = vmul.f32 1.442695, %v2006_v15 }
 0x5e7   : > { %v1737_v61 = vsel %vm1667_vm10, %v6055_v19, 0.0 }
 0x5e8   : > { %6056 = vpow2.f32 %v2016_v55  ;;  %1738 = vadd.xlane.f32.xlu2 %v1737_v61 }
 0x5ee   : > { %v7558_v59 = vpop.eup %6056 }
 0x5ef   : > { %v2034_v20 = vsel %vm1667_vm10, %v7558_v59, 0.0 }
 0x5f0   : > { %2035 = vadd.xlane.f32.xlu2 %v2034_v20 }
 0x5fe   : > { %1886 = vrot.lane.b32.xlu1 %v7365_v24, %s6809_s25 }
 0x608   : > { %2106 = vrot.lane.b32.xlu2 %v7435_v2, %s6809_s25 }
 0x62a   : > { %v7566_v12 = vpop.f32.mrf.mxu0 }
 0x62b   : > { %v7568_v14 = vpop.f32.mrf.mxu1 }
 0x632   : > { %v7570_v23 = vpop.f32.mrf.mxu0 }
 0x633   : > { %v7572_v37 = vpop.f32.mrf.mxu1 }
 0x63a   : > { %v2309_v63 = vpop.f32.mrf.mxu0 }
 0x63b   : > { %v7575_v27 = vadd.f32 %v2309_v63, %v7422_v56  ;;  %v2333_v3 = vpop.f32.mrf.mxu1 }
 0x63c   : > { %v7578_v28 = vadd.f32 %v2333_v3, %v7422_v56 }
 0x63d   : > { %v2386_v9 = vsel %vm1667_vm10, %v7575_v27, -inf }
 0x63e   : > { %2387 = vmax.xlane.f32.xlu1 %v2386_v9  ;;  %v2392_v6 = vsel %vm1667_vm10, %v7578_v28, -inf }
 0x63f   : > { %2393 = vmax.xlane.f32.xlu2 %v2392_v6 }
 0x642   : > { %v2311_v29 = vpop.f32.mrf.mxu0 }
 0x643   : > { %v2335_v26 = vpop.f32.mrf.mxu1  ;;  %v7620_v20 = vadd.f32 %v2311_v29, %v7433_v1 }
 0x644   : > { %v7585_v47 = vadd.f32 %v2335_v26, %v7433_v1 }
 0x645   : > { %v2389_v63 = vsel %vm1667_vm10, %v7620_v20, -inf }
 0x646   : > { %v2395_v36 = vsel %vm1667_vm10, %v7585_v47, -inf }
 0x647   : > { %2396 = vmax.xlane.f32.xlu1 %v2395_v36 }
 0x64a   : > { %v2357_v34 = vpop.f32.mrf.mxu0 }
 0x64b   : > { %v2381_v35 = vpop.f32.mrf.mxu1  ;;  %v7625_v3 = vadd.f32 %v2357_v34, %v7422_v56 }
 0x64c   : > { %v7590_v38 = vadd.f32 %v2381_v35, %v7422_v56 }
 0x64e   : > { %v2404_v39 = vsel %vm1667_vm10, %v7590_v38, -inf }
 0x64f   : > { %2405 = vmax.xlane.f32.xlu1 %v2404_v39 }
 0x650   : > { %v1736_v40 = vpop.xlane.xlu1 %1735 }
 0x651   : > { %6058 = vrcp.f32 %v1736_v40 }
 0x652   : > { %v2359_v25 = vpop.f32.mrf.mxu0 }
 0x653   : > { %v7595_v43 = vadd.f32 %v2359_v25, %v7433_v1  ;;  %v2383_v9 = vpop.f32.mrf.mxu1 }
 0x654   : > { %v7630_v6 = vadd.f32 %v2383_v9, %v7433_v1 }
 0x655   : > { %v2401_v33 = vsel %vm1667_vm10, %v7595_v43, -inf }
 0x656   : > { %2402 = vmax.xlane.f32.xlu2 %v2401_v33  ;;  %v2407_v29 = vsel %vm1667_vm10, %v7630_v6, -inf }
 0x657   : > { %v6059_v16 = vpop.eup %6058 }
 0x658   : > { %v1991_v41 = vpop.xlane.xlu1 %1990  ;;  %v1754_v51 = vmul.f32 %v6059_v16, %v6053_v54 }
 0x659   : > { %v2007_v44 = vsub.f32 %v1930_v0, %v1991_v41 }
 0x65a   : > { %v1762_v57 = vpack.c.bf16 %v1754_v51, %v1754_v51 }
 0x65b   : > { %v2018_v11 = vmul.f32 1.442695, %v2007_v44  ;;  %v1739_v45 = vpop.xlane.xlu2 %1738 }
 0x65c   : > { %6060 = vrcp.f32 %v1739_v45  ;;  %v1850_v18 = vunpack.c.l.b16 %v1762_v57  ;;  %v5743_v45 = vld [vmem:[%s7136_s17 + $0x8] sm:$0xff] }
 0x65d   : > { %6062 = vpow2.f32 %v2018_v11 }
 0x662   : > { %v6061_v52 = vpop.eup %6060 }
 0x663   : > { %v7599_v53 = vpop.eup %6062  ;;  %v1755_v32 = vmul.f32 %v6061_v52, %v6055_v19  ;;  %v2036_v42 = vpop.xlane.xlu2 %2035  ;;  %v5742_v52 = vld [vmem:[%s7136_s17] sm:$0xff] }
 0x664   : > { %v2037_v17 = vsel %vm1667_vm10, %v7599_v53, 0.0 }
 0x665   : > { %v1763_v15 = vpack.c.bf16 %v1755_v32, %v1755_v32  ;;  %2038 = vadd.xlane.f32.xlu0 %v2037_v17 }
 0x667   : > { %v1851_v55 = vunpack.c.l.b16 %v1763_v15 }
 0x668   : > { %2487 = vrot.lane.b32.xlu1 %v7424_v50, %s6810_s26 }
 0x669   : > { %v1852_v0 = vpack.c.b16 %v1851_v55, %v1850_v18 }
 0x66b   : > { %5317 = vmatmul.msk.bf16.vlgmr.msrb.gmra.mxu2 %vm1667_vm10, %v1852_v0  ;;  %v2107_v54 = vpop.permute.xlu2 %2106 }
 0x66c   : > { %2119 = vmatpush.bf16.msra.mxu3 %v2107_v54 }
 0x66e   : > { %2512 = vrot.lane.b32.xlu2 %v7435_v2, %s6810_s26 }
 0x670   : > { %v1887_v19 = vpop.permute.xlu1 %1886  ;;  %2267 = vmatpush.bf16.msrb.mxu3 %v5743_v45 }
 0x671   : > { %v1892_v61 = vsel %vm1556_vm9, %v1887_v19, 0 }
 0x672   : > { %1901 = vmatpush.bf16.xpose.msra.mxu2 %v1892_v61 }
 0x674   : > { %2268 = vmatpush.bf16.msrb.mxu3 %v5742_v52 }
 0x676   : > { %2651 = vrot.lane.b32.xlu2 %v7372_v31, %s6811_s0 }
 0x679   : > { %1884 = vrot.lane.b32.xlu0 %v7372_v31, %s6809_s25  ;;  %v2398_v31 = vsel %vm1667_vm10, %v7625_v3, -inf }
 0x67e   : > { %2537 = vrot.lane.b32.xlu2 %v7402_v62, %s6810_s26 }
 0x686   : > { %2562 = vrot.lane.b32.xlu2 %v7448_v22, %s6810_s26 }
 0x68e   : > { %2677 = vrot.lane.b32.xlu2 %v7381_v48, %s6811_s0 }
 0x6a3   : > { %2390 = vmax.xlane.f32.xlu0 %v2389_v63 }
 0x6ab   : > { %2399 = vmax.xlane.f32.xlu0 %v2398_v31 }
 0x6b1   : > { %v2388_v26 = vpop.xlane.xlu1 %2387 }
 0x6b2   : > { %v2410_v48 = vsub.f32 %v7575_v27, %v2388_v26  ;;  %v2394_v27 = vpop.xlane.xlu2 %2393 }
 0x6b3   : > { %2408 = vmax.xlane.f32.xlu0 %v2407_v29  ;;  %v2412_v0 = vsub.f32 %v7578_v28, %v2394_v27 }
 0x6b4   : > { %v2418_v36 = vmul.f32 1.442695, %v2410_v48 }
 0x6b5   : > { %v2422_v63 = vmul.f32 1.442695, %v2412_v0 }
 0x6b6   : > { %6064 = vpow2.f32 %v2418_v36  ;;  %v1877_v36 = vpack.c.bf16 %v7496_v8, %v7494_v7 }
 0x6ba   : > { %v2397_v35 = vpop.xlane.xlu1 %2396 }
 0x6bb   : > { %v2413_v34 = vsub.f32 %v7585_v47, %v2397_v35 }
 0x6bc   : > { %v7636_v39 = vpop.eup %6064 }
 0x6bd   : > { %v2424_v40 = vmul.f32 1.442695, %v2413_v34  ;;  %v2434_v25 = vsel %vm1667_vm10, %v7636_v39, 0.0 }
 0x6be   : > { %2435 = vadd.xlane.f32.xlu2 %v2434_v25 }
 0x6bf   : > { %6066 = vpow2.f32 %v2424_v40 }
 0x6c2   : > { %v2406_v51 = vpop.xlane.xlu1 %2405 }
 0x6c5   : > { %v7640_v33 = vpop.eup %6066 }
 0x6c6   : > { %v2443_v41 = vsel %vm1667_vm10, %v7640_v33, 0.0 }
 0x6c7   : > { %2444 = vadd.xlane.f32.xlu2 %v2443_v41  ;;  %2653 = vrot.lane.b32.xlu0 %v7365_v24, %s6811_s0 }
 0x6c9   : > { %v2403_v47 = vpop.xlane.xlu2 %2402 }
 0x6ca   : > { %v2415_v44 = vsub.f32 %v7595_v43, %v2403_v47 }
 0x6cc   : > { %v2428_v11 = vmul.f32 1.442695, %v2415_v44 }
 0x6ce   : > { %6068 = vpow2.f32 %v2428_v11 }
 0x6cf   : > { %6070 = vrcp.f32 %v2036_v42 }
 0x6d1   : > { %v2513_v16 = vpop.permute.xlu2 %2512 }
 0x6d2   : > { %2525 = vmatpush.bf16.msra.mxu1 %v2513_v16 }
 0x6d4   : > { %v7649_v57 = vpop.eup %6068 }
 0x6d5   : > { %v2449_v32 = vsel %vm1667_vm10, %v7649_v57, 0.0  ;;  %v6071_v17 = vpop.eup %6070 }
 0x6d6   : > { %2450 = vadd.xlane.f32.xlu2 %v2449_v32  ;;  %v2062_v18 = vmul.f32 %v6071_v17, %v7558_v59 }
 0x6d8   : > { %v2039_v24 = vpop.xlane.xlu0 %2038  ;;  %v2070_v42 = vpack.c.bf16 %v2062_v18, %v2062_v18 }
 0x6d9   : > { %6072 = vrcp.f32 %v2039_v24  ;;  %v7653_v43 = vpop.permute.xlu2 %2651 }
 0x6da   : > { %v2488_v15 = vpop.permute.xlu1 %2487  ;;  %v2103_v31 = vunpack.c.l.b16 %v2070_v42  ;;  %6074 = vpow2.f32 %v2422_v63 }
 0x6db   : > { %2500 = vmatpush.bf16.msra.mxu0 %v2488_v15 }
 0x6df   : > { %v6073_v55 = vpop.eup %6072 }
 0x6e0   : > { %v2063_v54 = vmul.f32 %v6073_v55, %v7599_v53  ;;  %v7660_v59 = vpop.eup %6074  ;;  %v1876_v53 = vpack.c.bf16 %v7492_v5, %v7490_v4 }
 0x6e1   : > { %v2538_v19 = vpop.permute.xlu2 %2537  ;;  %v2440_v28 = vsel %vm1667_vm10, %v7660_v59, 0.0 }
 0x6e2   : > { %v2071_v61 = vpack.c.bf16 %v2063_v54, %v2063_v54  ;;  %2550 = vmatpush.bf16.msrb.mxu0 %v2538_v19 }
 0x6e4   : > { %v2104_v9 = vunpack.c.l.b16 %v2071_v61 }
 0x6e6   : > { %v2105_v26 = vpack.c.b16 %v2104_v9, %v2103_v31 }
 0x6e8   : > { %5323 = vmatmul.msk.bf16.vlgmr.msra.gmra.mxu3 %vm1667_vm10, %v2105_v26 }
 0x6e9   : > { %v2563_v48 = vpop.permute.xlu2 %2562 }
 0x6ea   : > { %2575 = vmatpush.bf16.msrb.mxu1 %v2563_v48 }
 0x6eb   : > { %v1885_v29 = vpop.permute.xlu0 %1884 }
 0x6ec   : > { %5318 = vmatmul.msk.bf16.vlgmr.msra.gmra.mxu2 %vm1556_vm9, %v1885_v29 }
 0x6ee   : > { %2675 = vrot.lane.b32.xlu2 %v7386_v58, %s6811_s0  ;;  %v1878_v58 = vpack.c.bf16 %v7504_v13, %v7500_v49  ;;  %v1871_v4 = vpop.f32.mrf.mxu2 }
 0x6f1   : > { %2441 = vadd.xlane.f32.xlu0 %v2440_v28  ;;  %v7696_v45 = vpop.permute.xlu2 %2677 }
 0x6f6   : > { %2725 = vrot.lane.b32.xlu2 %v7420_v46, %s6811_s0  ;;  %v2416_v46 = vsub.f32 %v7590_v38, %v2406_v51  ;;  %v1873_v13 = vpop.f32.mrf.mxu2 }
 0x6f8   : > { %5346 = vmatmul.msk.bf16.vlgmr.msrb.gmra.mxu3 %vm1556_vm9, %v1876_v53  ;;  %v2430_v40 = vmul.f32 1.442695, %v2416_v46 }
 0x6fe   : > { %2723 = vrot.lane.b32.xlu2 %v7431_v60, %s6811_s0 }
 0x708   : > { %5347 = vmatmul.msk.bf16.gmra.mxu3 %vm1556_vm9, %v1877_v36 }
 0x716   : > { %v2391_v35 = vpop.xlane.xlu0 %2390 }
 0x717   : > { %v2411_v34 = vsub.f32 %v7620_v20, %v2391_v35  ;;  %v1879_v20 = vpack.c.bf16 %v1873_v13, %v1871_v4 }
 0x718   : > { %5348 = vmatmul.msk.bf16.gmra.mxu3 %vm1556_vm9, %v1878_v58 }
 0x719   : > { %v2420_v5 = vmul.f32 1.442695, %v2411_v34 }
 0x71b   : > { %6076 = vpow2.f32 %v2420_v5 }
 0x71c   : > { %6078 = vpow2.f32 %v2430_v40 }
 0x71e   : > { %v2400_v60 = vpop.xlane.xlu0 %2399 }
 0x71f   : > { %v2414_v25 = vsub.f32 %v7625_v3, %v2400_v60 }
 0x721   : > { %v7682_v7 = vpop.eup %6076  ;;  %v2426_v8 = vmul.f32 1.442695, %v2414_v25 }
 0x722   : > { %v2437_v49 = vsel %vm1667_vm10, %v7682_v7, 0.0  ;;  %v7686_v38 = vpop.eup %6078 }
 0x723   : > { %6080 = vpow2.f32 %v2426_v8  ;;  %2438 = vadd.xlane.f32.xlu1 %v2437_v49  ;;  %v2452_v44 = vsel %vm1667_vm10, %v7686_v38, 0.0 }
 0x726   : > { %v2409_v27 = vpop.xlane.xlu0 %2408 }
 0x727   : > { %v2417_v41 = vsub.f32 %v7630_v6, %v2409_v27 }
 0x728   : > { %5349 = vmatmul.msk.bf16.gmra.mxu3 %vm1556_vm9, %v1879_v20 }
 0x729   : > { %v7690_v47 = vpop.eup %6080  ;;  %v2432_v3 = vmul.f32 1.442695, %v2417_v41 }
 0x72a   : > { %v2446_v11 = vsel %vm1667_vm10, %v7690_v47, 0.0 }
 0x72b   : > { %6082 = vpow2.f32 %v2432_v3  ;;  %2453 = vadd.xlane.f32.xlu1 %v2452_v44  ;;  %2447 = vadd.xlane.f32.xlu0 %v2446_v11 }
 0x731   : > { %v7698_v16 = vpop.eup %6082  ;;  %v2436_v51 = vpop.xlane.xlu2 %2435 }
 0x732   : > { %v2455_v6 = vsel %vm1667_vm10, %v7698_v16, 0.0 }
 0x733   : > { %2456 = vadd.xlane.f32.xlu0 %v2455_v6 }
 0x739   : > { %v2654_v52 = vpop.permute.xlu0 %2653 }
 0x73a   : > { %v2659_v32 = vsel %vm1556_vm9, %v2654_v52, 0  ;;  %v2445_v24 = vpop.xlane.xlu2 %2444 }
 0x73b   : > { %2668 = vmatpush.bf16.xpose.msra.mxu3 %v2659_v32  ;;  %6084 = vrcp.f32 %v2445_v24 }
 0x741   : > { %v6085_v54 = vpop.eup %6084 }
 0x742   : > { %5370 = vmatmul.msk.bf16.vlgmr.msra.gmra.mxu3 %vm1556_vm9, %v7653_v43  ;;  %v2469_v43 = vmul.f32 %v6085_v54, %v7640_v33 }
 0x744   : > { %2701 = vrot.lane.b32.xlu1 %v7397_v10, %s6811_s0  ;;  %v2477_v19 = vpack.c.bf16 %v2469_v43, %v2469_v43 }
 0x746   : > { %v2510_v31 = vunpack.c.l.b16 %v2477_v19 }
 0x747   : > { %2699 = vrot.lane.b32.xlu0 %v7404_v21, %s6811_s0 }
 0x749   : > { %v2451_v17 = vpop.xlane.xlu2 %2450 }
 0x751   : > { %v7709_v15 = vpop.permute.xlu2 %2675 }
 0x759   : > { %v2726_v18 = vpop.permute.xlu2 %2725 }
 0x75a   : > { %v2731_v55 = vsel %vm1556_vm9, %v2726_v18, 0 }
 0x75b   : > { %2740 = vmatpush.bf16.xpose.msrb.mxu3 %v2731_v55 }
 0x761   : > { %v2724_v0 = vpop.permute.xlu2 %2723 }
 0x762   : > { %5373 = vmatmul.msk.bf16.vlgmr.msrb.gmra.mxu3 %vm1556_vm9, %v2724_v0 }
 0x764   : > { %v2442_v42 = vpop.xlane.xlu0 %2441 }
 0x765   : > { %6086 = vrcp.f32 %v2442_v42 }
 0x766   : > { %6088 = vrcp.f32 %v2436_v51 }
 0x76b   : > { %v6087_v10 = vpop.eup %6086  ;;  %v7726_v53 = vpop.f32.mrf.mxu3 }
 0x76c   : > { %v2468_v21 = vmul.f32 %v6087_v10, %v7660_v59  ;;  %v6089_v36 = vpop.eup %6088 }
 0x76d   : > { %v2466_v35 = vmul.f32 %v6089_v36, %v7636_v39  ;;  %v2683_v39 = vsel %vm1556_vm9, %v7696_v45, 0  ;;  %v6284_v36 = vld [vmem:[#allocation8] sm:$0xff] }
 0x76e   : > { %v2476_v61 = vpack.c.bf16 %v2468_v21, %v2468_v21 }
 0x76f   : > { %v1903_v63 = vpop.f32.mrf.mxu2 }
 0x770   : > { %v2509_v9 = vunpack.c.l.b16 %v2476_v61  ;;  %v7716_v26 = vadd.f32 %v1903_v63, %v7422_v56 }
 0x772   : > { %v2511_v48 = vpack.c.b16 %v2510_v31, %v2509_v9  ;;  %v1980_v29 = vsel %vm1667_vm10, %v7716_v26, -inf }
 0x773   : > { %1981 = vmax.xlane.f32.xlu2 %v1980_v29  ;;  %v7730_v58 = vpop.f32.mrf.mxu3 }
 0x774   : > { %5355 = vmatmul.msk.bf16.vlgmr.msra.gmra.mxu1 %vm1667_vm10, %v2511_v48 }
 0x777   : > { %v1905_v28 = vpop.f32.mrf.mxu2 }
 0x778   : > { %v7722_v33 = vadd.f32 %v1905_v28, %v7433_v1  ;;  %v2474_v1 = vpack.c.bf16 %v2466_v35, %v2466_v35 }
 0x77a   : > { %v1983_v59 = vsel %vm1667_vm10, %v7722_v33, -inf  ;;  %v2484_v60 = vunpack.c.l.b16 %v2474_v1 }
 0x77b   : > { %1984 = vmax.xlane.f32.xlu0 %v1983_v59  ;;  %v7734_v8 = vpop.f32.mrf.mxu3 }
 0x783   : > { %v7742_v51 = vpop.f32.mrf.mxu3 }
 0x78f   : > { %2081 = vrot.lane.b32.xlu0 %v7424_v50, %s6809_s25 }
 0x796   : > { %v2439_v56 = vpop.xlane.xlu1 %2438 }
 0x797   : > { %6090 = vrcp.f32 %v2439_v56 }
 0x798   : > { %6092 = vrcp.f32 %v2451_v17 }
 0x79d   : > { %v6091_v34 = vpop.eup %6090 }
 0x79e   : > { %v2467_v46 = vmul.f32 %v6091_v34, %v7682_v7  ;;  %v2454_v4 = vpop.xlane.xlu1 %2453  ;;  %v2448_v5 = vpop.xlane.xlu0 %2447 }
 0x79f   : > { %6094 = vrcp.f32 %v2448_v5  ;;  %v6093_v13 = vpop.eup %6092 }
 0x7a0   : > { %v2475_v40 = vpack.c.bf16 %v2467_v46, %v2467_v46  ;;  %6096 = vrcp.f32 %v2454_v4  ;;  %v2471_v3 = vmul.f32 %v6093_v13, %v7649_v57  ;;  %v7747_v57 = vpop.f32.mrf.mxu3  ;;  %v6285_v4 = vld [vmem:[#allocation8 + $0x8] sm:$0xff] }
 0x7a2   : > { %v2485_v25 = vunpack.c.l.b16 %v2475_v40  ;;  %v2479_v52 = vpack.c.bf16 %v2471_v3, %v2471_v3 }
 0x7a4   : > { %v2486_v49 = vpack.c.b16 %v2485_v25, %v2484_v60  ;;  %v2535_v18 = vunpack.c.l.b16 %v2479_v52 }
 0x7a5   : > { %v6095_v20 = vpop.eup %6094 }
 0x7a6   : > { %5354 = vmatmul.msk.bf16.vlgmr.msra.gmra.mxu0 %vm1667_vm10, %v2486_v49  ;;  %v2457_v27 = vpop.xlane.xlu0 %2456  ;;  %v6097_v7 = vpop.eup %6096  ;;  %v2470_v41 = vmul.f32 %v6095_v20, %v7690_v47 }
 0x7a7   : > { %2692 = vmatpush.bf16.xpose.msra.mxu0 %v2683_v39  ;;  %6098 = vrcp.f32 %v2457_v27  ;;  %v2472_v44 = vmul.f32 %v6097_v7, %v7686_v38 }
 0x7a8   : > { %v2478_v11 = vpack.c.bf16 %v2470_v41, %v2470_v41  ;;  %v7750_v43 = vpop.f32.mrf.mxu3 }
 0x7a9   : > { %v2480_v32 = vpack.c.bf16 %v2472_v44, %v2472_v44 }
 0x7aa   : > { %v2534_v24 = vunpack.c.l.b16 %v2478_v11 }
 0x7ab   : > { %v2559_v55 = vunpack.c.l.b16 %v2480_v32 }
 0x7ac   : > { %v2536_v42 = vpack.c.b16 %v2535_v18, %v2534_v24 }
 0x7ad   : > { %v6099_v6 = vpop.eup %6098 }
 0x7ae   : > { %v2473_v45 = vmul.f32 %v6099_v6, %v7698_v16 }
 0x7b0   : > { %v2481_v17 = vpack.c.bf16 %v2473_v45, %v2473_v45  ;;  %v7755_v10 = vpop.f32.mrf.mxu3 }
 0x7b2   : > { %v2560_v0 = vunpack.c.l.b16 %v2481_v17 }
 0x7b4   : > { %v2561_v54 = vpack.c.b16 %v2560_v0, %v2559_v55 }
 0x7b6   : > { %v2702_v47 = vpop.permute.xlu1 %2701  ;;  %5356 = vmatmul.msk.bf16.vlgmr.msrb.gmra.mxu0 %vm1667_vm10, %v2536_v42  ;;  %5357 = vmatmul.msk.bf16.vlgmr.msrb.gmra.mxu1 %vm1667_vm10, %v2561_v54 }
 0x7b7   : > { %v2707_v38 = vsel %vm1556_vm9, %v2702_v47, 0 }
 0x7b8   : > { %2716 = vmatpush.bf16.xpose.msra.mxu1 %v2707_v38  ;;  %v7757_v19 = vpop.f32.mrf.mxu3 }
 0x7b9   : > { %v2700_v16 = vpop.permute.xlu0 %2699 }
 0x7c0   : > { %v7759_v21 = vpop.f32.mrf.mxu3 }
 0x7c6   : > { %5371 = vmatmul.msk.bf16.vlgmr.msra.gmra.mxu0 %vm1556_vm9, %v7709_v15  ;;  %5372 = vmatmul.msk.bf16.vlgmr.msra.gmra.mxu1 %vm1556_vm9, %v2700_v16 }
 0x7c8   : > { %v7762_v31 = vpop.f32.mrf.mxu3 }
 0x7d0   : > { %v2670_v15 = vpop.f32.mrf.mxu3 }
 0x7d1   : > { %v2671_v35 = vadd.f32 %v6284_v36, %v2670_v15 }
 0x7d3   : > { %v2747_v1 = vsel %vm1667_vm10, %v2671_v35, -inf }
 0x7d8   : > { %v2672_v46 = vpop.f32.mrf.mxu3 }
 0x7d9   : > { %v2673_v5 = vadd.f32 %v6285_v4, %v2672_v46 }
 0x7db   : > { %v2750_v40 = vsel %vm1667_vm10, %v2673_v5, -inf }
 0x7e5   : > { %v2742_v6 = vpop.f32.mrf.mxu3 }
 0x7e6   : > { %v1982_v61 = vpop.xlane.xlu2 %1981  ;;  %v2743_v38 = vadd.f32 %v6284_v36, %v2742_v6 }
 0x7e7   : > { %v2004_v63 = vsub.f32 %v7716_v26, %v1982_v61 }
 0x7e8   : > { %v2765_v61 = vsel %vm1667_vm10, %v2743_v38, -inf }
 0x7e9   : > { %v2012_v9 = vmul.f32 1.442695, %v2004_v63 }
 0x7eb   : > { %6100 = vpow2.f32 %v2012_v9 }
 0x7ed   : > { %v2744_v54 = vpop.f32.mrf.mxu3 }
 0x7ee   : > { %v1985_v48 = vpop.xlane.xlu0 %1984  ;;  %v2745_v47 = vadd.f32 %v6285_v4, %v2744_v54 }
 0x7ef   : > { %v2005_v29 = vsub.f32 %v7722_v33, %v1985_v48 }
 0x7f0   : > { %v2768_v16 = vsel %vm1667_vm10, %v2745_v47, -inf }
 0x7f1   : > { %v6101_v28 = vpop.eup %6100  ;;  %v2014_v59 = vmul.f32 1.442695, %v2005_v29  ;;  %v7769_v60 = vpop.f32.mrf.mxu1 }
 0x7f2   : > { %v2028_v56 = vsel %vm1667_vm10, %v6101_v28, 0.0 }
 0x7f3   : > { %6102 = vpow2.f32 %v2014_v59  ;;  %2029 = vadd.xlane.f32.xlu1 %v2028_v56 }
 0x7f9   : > { %v6103_v34 = vpop.eup %6102  ;;  %v7773_v49 = vpop.f32.mrf.mxu1 }
 0x7fa   : > { %v2031_v26 = vsel %vm1667_vm10, %v6103_v34, 0.0 }
 0x7fb   : > { %2748 = vmax.xlane.f32.xlu1 %v2747_v1  ;;  %2032 = vadd.xlane.f32.xlu2 %v2031_v26 }
 0x801   : > { %v2082_v33 = vpop.permute.xlu0 %2081 }
 0x802   : > { %2094 = vmatpush.bf16.msrb.mxu2 %v2082_v33 }
 0x803   : > { %2751 = vmax.xlane.f32.xlu2 %v2750_v40 }
 0x823   : > { %v7771_v25 = vpop.f32.mrf.mxu0 }
 0x82b   : > { %v7775_v13 = vpop.f32.mrf.mxu0 }
 0x833   : > { %v7777_v20 = vpop.f32.mrf.mxu0  ;;  %v7779_v39 = vpop.f32.mrf.mxu1 }
 0x83b   : > { %v7781_v27 = vpop.f32.mrf.mxu0  ;;  %v7783_v7 = vpop.f32.mrf.mxu1 }
 0x83c   : > { %v2584_v41 = vpack.c.bf16 %v7781_v27, %v7777_v20 }
 0x843   : > { %v2694_v3 = vpop.f32.mrf.mxu0  ;;  %v2718_v44 = vpop.f32.mrf.mxu1 }
 0x844   : > { %v2695_v11 = vadd.f32 %v6284_v36, %v2694_v3  ;;  %v2719_v32 = vadd.f32 %v6284_v36, %v2718_v44 }
 0x846   : > { %v2753_v52 = vsel %vm1667_vm10, %v2695_v11, -inf  ;;  %v2759_v0 = vsel %vm1667_vm10, %v2719_v32, -inf }
 0x847   : > { %2754 = vmax.xlane.f32.xlu1 %v2753_v52 }
 0x84b   : > { %v2696_v45 = vpop.f32.mrf.mxu0  ;;  %v2720_v24 = vpop.f32.mrf.mxu1 }
 0x84c   : > { %v2697_v17 = vadd.f32 %v6285_v4, %v2696_v45  ;;  %v7788_v18 = vadd.f32 %v6285_v4, %v2720_v24 }
 0x84e   : > { %v2762_v55 = vsel %vm1667_vm10, %v7788_v18, -inf  ;;  %v2756_v42 = vsel %vm1667_vm10, %v2697_v17, -inf }
 0x84f   : > { %2763 = vmax.xlane.f32.xlu0 %v2762_v55  ;;  %2760 = vmax.xlane.f32.xlu1 %v2759_v0 }
 0x850   : > { %2757 = vmax.xlane.f32.xlu2 %v2756_v42 }
 0x857   : > { %2769 = vmax.xlane.f32.xlu1 %v2768_v16 }
 0x858   : > { %2766 = vmax.xlane.f32.xlu2 %v2765_v61 }
 0x866   : > { %v2030_v63 = vpop.xlane.xlu1 %2029 }
 0x867   : > { %6104 = vrcp.f32 %v2030_v63 }
 0x86d   : > { %v6105_v29 = vpop.eup %6104 }
 0x86e   : > { %v2749_v9 = vpop.xlane.xlu1 %2748  ;;  %v2033_v48 = vpop.xlane.xlu2 %2032  ;;  %v2060_v56 = vmul.f32 %v6105_v29, %v6101_v28 }
 0x86f   : > { %v2771_v15 = vsub.f32 %v2671_v35, %v2749_v9  ;;  %6106 = vrcp.f32 %v2033_v48 }
 0x870   : > { %v2068_v26 = vpack.c.bf16 %v2060_v56, %v2060_v56 }
 0x871   : > { %v2779_v59 = vmul.f32 1.442695, %v2771_v15 }
 0x872   : > { %v2078_v44 = vunpack.c.l.b16 %v2068_v26 }
 0x873   : > { %6108 = vpow2.f32 %v2779_v59 }
 0x875   : > { %v6107_v1 = vpop.eup %6106 }
 0x876   : > { %v2061_v46 = vmul.f32 %v6107_v1, %v6103_v34  ;;  %v2752_v36 = vpop.xlane.xlu2 %2751 }
 0x877   : > { %v2772_v4 = vsub.f32 %v2673_v5, %v2752_v36 }
 0x878   : > { %v2069_v33 = vpack.c.bf16 %v2061_v46, %v2061_v46 }
 0x879   : > { %v7796_v40 = vpop.eup %6108  ;;  %v2781_v3 = vmul.f32 1.442695, %v2772_v4 }
 0x87a   : > { %v2079_v6 = vunpack.c.l.b16 %v2069_v33  ;;  %v2795_v52 = vsel %vm1667_vm10, %v7796_v40, 0.0 }
 0x87b   : > { %6110 = vpow2.f32 %v2781_v3  ;;  %2796 = vadd.xlane.f32.xlu2 %v2795_v52  ;;  %v5745_v3 = vld [vmem:[%s7136_s17 + $0x18] sm:$0xff] }
 0x87c   : > { %v2080_v35 = vpack.c.b16 %v2079_v6, %v2078_v44  ;;  %2214 = vmatpush.bf16.msra.mxu2 %v5745_v3  ;;  %v5744_v44 = vld [vmem:[%s7136_s17 + $0x10] sm:$0xff] }
 0x87e   : > { %5322 = vmatmul.msk.bf16.vlgmr.msrb.gmra.mxu2 %vm1667_vm10, %v2080_v35 }
 0x880   : > { %2215 = vmatpush.bf16.msra.mxu2 %v5744_v44 }
 0x881   : > { %v7801_v28 = vpop.eup %6110 }
 0x882   : > { %v2798_v34 = vsel %vm1667_vm10, %v7801_v28, 0.0 }
 0x883   : > { %2799 = vadd.xlane.f32.xlu1 %v2798_v34 }
 0x893   : > { %2848 = vrot.lane.b32.xlu2 %v7424_v50, %s6811_s0 }
 0x89b   : > { %2873 = vrot.lane.b32.xlu2 %v7435_v2, %s6811_s0 }
 0x8ba   : > { %v2755_v5 = vpop.xlane.xlu1 %2754 }
 0x8bb   : > { %v2773_v45 = vsub.f32 %v2695_v11, %v2755_v5 }
 0x8bd   : > { %v2783_v24 = vmul.f32 1.442695, %v2773_v45 }
 0x8bf   : > { %6112 = vpow2.f32 %v2783_v24 }
 0x8c2   : > { %v2761_v55 = vpop.xlane.xlu1 %2760  ;;  %v2764_v48 = vpop.xlane.xlu0 %2763 }
 0x8c3   : > { %v2775_v0 = vsub.f32 %v2719_v32, %v2761_v55  ;;  %v2758_v42 = vpop.xlane.xlu2 %2757  ;;  %v2776_v59 = vsub.f32 %v7788_v18, %v2764_v48  ;;  %v2178_v48 = vpack.c.bf16 %v7570_v23, %v7566_v12 }
 0x8c4   : > { %v2774_v61 = vsub.f32 %v2697_v17, %v2758_v42 }
 0x8c5   : > { %v7809_v54 = vpop.eup %6112  ;;  %v2787_v16 = vmul.f32 1.442695, %v2775_v0  ;;  %v2789_v1 = vmul.f32 1.442695, %v2776_v59 }
 0x8c6   : > { %v2801_v63 = vsel %vm1667_vm10, %v7809_v54, 0.0  ;;  %v2785_v50 = vmul.f32 1.442695, %v2774_v61 }
 0x8c7   : > { %6114 = vpow2.f32 %v2787_v16  ;;  %2802 = vadd.xlane.f32.xlu1 %v2801_v63 }
 0x8c8   : > { %6116 = vpow2.f32 %v2785_v50 }
 0x8ca   : > { %v2770_v9 = vpop.xlane.xlu1 %2769 }
 0x8cb   : > { %v2778_v2 = vsub.f32 %v2745_v47, %v2770_v9  ;;  %v2767_v29 = vpop.xlane.xlu2 %2766  ;;  %v5746_v9 = vld [vmem:[%s7136_s17 + $0x20] sm:$0xff] }
 0x8cc   : > { %v2777_v11 = vsub.f32 %v2743_v38, %v2767_v29 }
 0x8cd   : > { %v7813_v15 = vpop.eup %6114  ;;  %v2793_v32 = vmul.f32 1.442695, %v2778_v2  ;;  %v2179_v2 = vpack.c.bf16 %v7572_v37, %v7568_v14 }
 0x8ce   : > { %v2791_v56 = vmul.f32 1.442695, %v2777_v11  ;;  %v2807_v17 = vsel %vm1667_vm10, %v7813_v15, 0.0  ;;  %v7818_v26 = vpop.eup %6116 }
 0x8cf   : > { %6118 = vpow2.f32 %v2793_v32  ;;  %2808 = vadd.xlane.f32.xlu1 %v2807_v17  ;;  %v2804_v46 = vsel %vm1667_vm10, %v7818_v26, 0.0 }
 0x8d0   : > { %6120 = vpow2.f32 %v2791_v56 }
 0x8d1   : > { %6122 = vpow2.f32 %v2789_v1 }
 0x8d5   : > { %v7820_v47 = vpop.eup %6118 }
 0x8d6   : > { %v7822_v38 = vpop.eup %6120  ;;  %v2816_v18 = vsel %vm1667_vm10, %v7820_v47, 0.0 }
 0x8d7   : > { %2817 = vadd.xlane.f32.xlu2 %v2816_v18  ;;  %2805 = vadd.xlane.f32.xlu1 %v2804_v46  ;;  %v2813_v36 = vsel %vm1667_vm10, %v7822_v38, 0.0  ;;  %v7830_v4 = vpop.eup %6122 }
 0x8d8   : > { %2814 = vadd.xlane.f32.xlu0 %v2813_v36  ;;  %v2810_v33 = vsel %vm1667_vm10, %v7830_v4, 0.0 }
 0x8e0   : > { %2811 = vadd.xlane.f32.xlu0 %v2810_v33 }
 0x8ee   : > { %v2797_v6 = vpop.xlane.xlu2 %2796 }
 0x8ef   : > { %6124 = vrcp.f32 %v2797_v6 }
 0x8f0   : > { %2898 = vrot.lane.b32.xlu1 %v7402_v62, %s6811_s0 }
 0x8f4   : > { %2923 = vrot.lane.b32.xlu0 %v7448_v22, %s6811_s0 }
 0x8f5   : > { %v6125_v34 = vpop.eup %6124 }
 0x8f6   : > { %v2800_v52 = vpop.xlane.xlu1 %2799  ;;  %v2849_v35 = vpop.permute.xlu2 %2848  ;;  %v2827_v5 = vmul.f32 %v6125_v34, %v7796_v40  ;;  %v2177_v40 = vpack.c.bf16 %v7730_v58, %v7726_v53  ;;  %v2582_v53 = vpack.c.bf16 %v7775_v13, %v7771_v25 }
 0x8f7   : > { %6126 = vrcp.f32 %v2800_v52  ;;  %2861 = vmatpush.bf16.msrb.mxu0 %v2849_v35 }
 0x8f8   : > { %v2835_v24 = vpack.c.bf16 %v2827_v5, %v2827_v5 }
 0x8fa   : > { %v2845_v16 = vunpack.c.l.b16 %v2835_v24 }
 0x8fd   : > { %v6127_v45 = vpop.eup %6126 }
 0x8fe   : > { %v2828_v55 = vmul.f32 %v6127_v45, %v7801_v28  ;;  %v2874_v0 = vpop.permute.xlu2 %2873  ;;  %v5747_v28 = vld [vmem:[%s7136_s17 + $0x28] sm:$0xff] }
 0x8ff   : > { %2886 = vmatpush.bf16.msrb.mxu1 %v2874_v0  ;;  %2620 = vmatpush.bf16.msrb.mxu2 %v5747_v28 }
 0x900   : > { %v2836_v62 = vpack.c.bf16 %v2828_v55, %v2828_v55 }
 0x901   : > { %v2096_v42 = vpop.f32.mrf.mxu2 }
 0x902   : > { %v2846_v61 = vunpack.c.l.b16 %v2836_v62 }
 0x903   : > { %2621 = vmatpush.bf16.msrb.mxu2 %v5746_v9 }
 0x904   : > { %v2847_v22 = vpack.c.b16 %v2846_v61, %v2845_v16 }
 0x906   : > { %5374 = vmatmul.msk.bf16.vlgmr.msrb.gmra.mxu0 %vm1667_vm10, %v2847_v22 }
 0x909   : > { %v2098_v63 = vpop.f32.mrf.mxu2 }
 0x90a   : > { %v2176_v50 = vpack.c.bf16 %v2098_v63, %v2096_v42  ;;  %v2585_v42 = vpack.c.bf16 %v7783_v7, %v7779_v39 }
 0x90c   : > { %5334 = vmatmul.msk.bf16.vlgmr.msra.gmra.mxu2 %vm1556_vm9, %v2176_v50 }
 0x91c   : > { %5335 = vmatmul.msk.bf16.gmra.mxu2 %vm1556_vm9, %v2177_v40 }
 0x92c   : > { %5336 = vmatmul.msk.bf16.gmra.mxu2 %vm1556_vm9, %v2178_v48 }
 0x93a   : > { %v2803_v29 = vpop.xlane.xlu1 %2802 }
 0x93b   : > { %6128 = vrcp.f32 %v2803_v29 }
 0x93c   : > { %5337 = vmatmul.msk.bf16.gmra.mxu2 %vm1556_vm9, %v2179_v2 }
 0x941   : > { %v6129_v32 = vpop.eup %6128 }
 0x942   : > { %v2809_v11 = vpop.xlane.xlu1 %2808  ;;  %v2829_v12 = vmul.f32 %v6129_v32, %v7809_v54  ;;  %v2583_v54 = vpack.c.bf16 %v7773_v49, %v7769_v60  ;;  %v5749_v49 = vld [vmem:[%s7136_s17 + $0x38] sm:$0xff] }
 0x943   : > { %2981 = vmatpush.bf16.msra.mxu1 %v5749_v49 }
 0x944   : > { %v2837_v14 = vpack.c.bf16 %v2829_v12, %v2829_v12 }
 0x946   : > { %v2870_v25 = vunpack.c.l.b16 %v2837_v14 }
 0x94a   : > { %v2806_v58 = vpop.xlane.xlu1 %2805  ;;  %v2818_v23 = vpop.xlane.xlu2 %2817 }
 0x94b   : > { %6130 = vrcp.f32 %v2806_v58  ;;  %v2815_v59 = vpop.xlane.xlu0 %2814 }
 0x94c   : > { %5366 = vmatmul.msk.bf16.vlgmr.msrb.gmra.mxu2 %vm1556_vm9, %v2582_v53  ;;  %6132 = vrcp.f32 %v2809_v11 }
 0x94d   : > { %6134 = vrcp.f32 %v2818_v23 }
 0x94e   : > { %6136 = vrcp.f32 %v2815_v59 }
 0x951   : > { %v6131_v56 = vpop.eup %6130 }
 0x952   : > { %v2830_v37 = vmul.f32 %v6131_v56, %v7818_v26  ;;  %v6133_v18 = vpop.eup %6132 }
 0x953   : > { %v2812_v17 = vpop.xlane.xlu0 %2811  ;;  %v6135_v46 = vpop.eup %6134  ;;  %v2831_v44 = vmul.f32 %v6133_v18, %v7813_v15 }
 0x954   : > { %v2838_v1 = vpack.c.bf16 %v2830_v37, %v2830_v37  ;;  %6138 = vrcp.f32 %v2812_v17  ;;  %v6137_v33 = vpop.eup %6136  ;;  %v2834_v6 = vmul.f32 %v6135_v46, %v7820_v47  ;;  %v6286_v17 = vld [vmem:[#allocation2 + $0x30] sm:$0xff] }
 0x955   : > { %v2833_v52 = vmul.f32 %v6137_v33, %v7822_v38  ;;  %v2839_v34 = vpack.c.bf16 %v2831_v44, %v2831_v44  ;;  %v5748_v38 = vld [vmem:[%s7136_s17 + $0x30] sm:$0xff]  ;;  %s9307_s17 = scalar_lea.vmem [#allocation14], %s7122_s30 }
 0x956   : > { %v2871_v13 = vunpack.c.l.b16 %v2838_v1  ;;  %v2842_v5 = vpack.c.bf16 %v2834_v6, %v2834_v6  ;;  %2982 = vmatpush.bf16.msra.mxu1 %v5748_v38  ;;  %v7890_v37 = vld [vmem:[%s9307_s17] ss:$0 sm:$0xff] }
 0x957   : > { %v2841_v45 = vpack.c.bf16 %v2833_v52, %v2833_v52  ;;  %v2895_v55 = vunpack.c.l.b16 %v2839_v34  ;;  %v6288_v34 = vld [vmem:[#allocation2 + $0x18] sm:$0xff] }
 0x958   : > { %v2872_v36 = vpack.c.b16 %v2871_v13, %v2870_v25  ;;  %v2921_v15 = vunpack.c.l.b16 %v2842_v5 }
 0x959   : > { %v2920_v0 = vunpack.c.l.b16 %v2841_v45 }
 0x95a   : > { %v6139_v3 = vpop.eup %6138  ;;  %5375 = vmatmul.msk.bf16.vlgmr.msrb.gmra.mxu1 %vm1667_vm10, %v2872_v36 }
 0x95b   : > { %v2832_v26 = vmul.f32 %v6139_v3, %v7830_v4  ;;  %v2922_v47 = vpack.c.b16 %v2921_v15, %v2920_v0  ;;  %v6289_v0 = vld [vmem:[#allocation2 + $0x10] sm:$0xff] }
 0x95c   : > { %5367 = vmatmul.msk.bf16.gmra.mxu2 %vm1556_vm9, %v2583_v54 }
 0x95d   : > { %v2840_v35 = vpack.c.bf16 %v2832_v26, %v2832_v26 }
 0x95f   : > { %v2896_v24 = vunpack.c.l.b16 %v2840_v35 }
 0x961   : > { %v2897_v62 = vpack.c.b16 %v2896_v24, %v2895_v55 }
 0x962   : > { %v2899_v60 = vpop.permute.xlu1 %2898 }
 0x963   : > { %2911 = vmatpush.bf16.msra.mxu3 %v2899_v60 }
 0x966   : > { %v2924_v4 = vpop.permute.xlu0 %2923  ;;  %5376 = vmatmul.msk.bf16.vlgmr.msra.gmra.mxu3 %vm1667_vm10, %v2897_v62 }
 0x967   : > { %2936 = vmatpush.bf16.msra.mxu0 %v2924_v4 }
 0x96a   : > { %5377 = vmatmul.msk.bf16.vlgmr.msra.gmra.mxu0 %vm1667_vm10, %v2922_v47 }
 0x96c   : > { %5368 = vmatmul.msk.bf16.gmra.mxu2 %vm1556_vm9, %v2584_v41 }
 0x97c   : > { %5369 = vmatmul.msk.bf16.gmra.mxu2 %vm1556_vm9, %v2585_v42 }
 0x983   : > { %v2863_v16 = vpop.f32.mrf.mxu0 }
 0x98b   : > { %v2865_v61 = vpop.f32.mrf.mxu0 }
 0x98c   : > { %v2943_v22 = vpack.c.bf16 %v2865_v61, %v2863_v16  ;;  %v6290_v16 = vld [vmem:[#allocation2 + $0x8] sm:$0xff] }
 0x98e   : > { %5386 = vmatmul.msk.bf16.vlgmr.msra.gmra.mxu1 %vm1556_vm9, %v2943_v22 }
 0x98f   : > { %v2217_v63 = vpop.f32.mrf.mxu2 }
 0x990   : > { %v2271_v12 = vadd.f32 %v7734_v8, %v2217_v63  ;;  %v6287_v8 = vld [vmem:[#allocation2] sm:$0xff] }
 0x997   : > { %v2219_v50 = vpop.f32.mrf.mxu2 }
 0x998   : > { %v2273_v13 = vadd.f32 %v7742_v51, %v2219_v50 }
 0x99f   : > { %v2222_v40 = vpop.f32.mrf.mxu2 }
 0x9a0   : > { %v2276_v26 = vadd.f32 %v7747_v57, %v2222_v40 }
 0x9a7   : > { %v2224_v28 = vpop.f32.mrf.mxu2 }
 0x9a8   : > { %v2278_v45 = vadd.f32 %v7750_v43, %v2224_v28 }
 0x9af   : > { %v2227_v48 = vpop.f32.mrf.mxu2 }
 0x9b0   : > { %v2281_v4 = vadd.f32 %v7755_v10, %v2227_v48  ;;  %v6291_v10 = vld [vmem:[#allocation2 + $0x20] sm:$0xff] }
 0x9b7   : > { %v2229_v41 = vpop.f32.mrf.mxu2 }
 0x9b8   : > { %v2283_v22 = vadd.f32 %v7757_v19, %v2229_v41 }
 0x9bf   : > { %v7881_v7 = vpop.f32.mrf.mxu2 }
 0x9c7   : > { %v7884_v53 = vpop.f32.mrf.mxu2 }
 0x9cf   : > { %v2623_v59 = vpop.f32.mrf.mxu2 }
 0x9d0   : > { %v2643_v23 = vadd.f32 %v2623_v59, %v2271_v12 }
 0x9d7   : > { %v2888_v9 = vpop.f32.mrf.mxu1  ;;  %v2625_v25 = vpop.f32.mrf.mxu2 }
 0x9d8   : > { %v2644_v46 = vadd.f32 %v2625_v25, %v2273_v13 }
 0x9df   : > { %v2890_v20 = vpop.f32.mrf.mxu1  ;;  %v2628_v44 = vpop.f32.mrf.mxu2 }
 0x9e0   : > { %v2944_v27 = vpack.c.bf16 %v2890_v20, %v2888_v9  ;;  %v2645_v51 = vadd.f32 %v2628_v44, %v2276_v26  ;;  %v2286_v20 = vadd.f32 %v7759_v21, %v7881_v7 }
 0x9e2   : > { %5387 = vmatmul.msk.bf16.gmra.mxu1 %vm1556_vm9, %v2944_v27 }
 0x9e7   : > { %v2938_v11 = vpop.f32.mrf.mxu0  ;;  %v2630_v6 = vpop.f32.mrf.mxu2 }
 0x9e8   : > { %v2646_v55 = vadd.f32 %v2630_v6, %v2278_v45  ;;  %v5512_v45 = vld [vmem:[%s7141_s22 + $0xe8] sm:$0xf] }
 0x9e9   : > { %v2913_v39 = vpop.f32.mrf.mxu3 }
 0x9ef   : > { %v2940_v58 = vpop.f32.mrf.mxu0  ;;  %v2633_v60 = vpop.f32.mrf.mxu2 }
 0x9f0   : > { %v2946_v32 = vpack.c.bf16 %v2940_v58, %v2938_v11  ;;  %v2647_v47 = vadd.f32 %v2633_v60, %v2281_v4  ;;  %v5488_v4 = vld [vmem:[%s7141_s22 + $0xc0] sm:$0xf] }
 0x9f1   : > { %v2915_v2 = vpop.f32.mrf.mxu3 }
 0x9f2   : > { %v2945_v29 = vpack.c.bf16 %v2915_v2, %v2913_v39  ;;  %v6292_v2 = vld [vmem:[#allocation2 + $0x28] sm:$0xff] }
 0x9f4   : > { %5388 = vmatmul.msk.bf16.gmra.mxu1 %vm1556_vm9, %v2945_v29 }
 0x9f7   : > { %v2635_v43 = vpop.f32.mrf.mxu2 }
 0x9f8   : > { %v2648_v50 = vadd.f32 %v2635_v43, %v2283_v22  ;;  %v5774_v43 = vld [vmem:[%s7141_s22 + $0xc4] sm:$0xf]  ;;  %v5777_v22 = vld [vmem:[%s7141_s22 + $0xd4] sm:$0xf0] }
 0x9ff   : > { %v2638_v9 = vpop.f32.mrf.mxu2 }
 0xa00   : > { %v2649_v39 = vadd.f32 %v2638_v9, %v2286_v20  ;;  %v5775_v9 = vld [vmem:[%s7141_s22 + $0xcc] sm:$0xf] }
 0xa04   : > { %5389 = vmatmul.msk.bf16.gmra.mxu1 %vm1556_vm9, %v2946_v32  ;;  %v2288_v32 = vadd.f32 %v7762_v31, %v7884_v53 }
 0xa07   : > { %v2640_v11 = vpop.f32.mrf.mxu2 }
 0xa08   : > { %v2650_v21 = vadd.f32 %v2640_v11, %v2288_v32  ;;  %v5480_v11 = vld [vmem:[%s7141_s22 + $0xa8] sm:$0xf] }
 0xa0b   : > { %v2984_v56 = vpop.f32.mrf.mxu1 }
 0xa0c   : > { %v3004_v14 = vadd.f32 %v2984_v56, %v2643_v23 }
 0xa0e   : > { %v3012_v1 = vadd.f32 %v6286_v17, %v3004_v14 }
 0xa10   : > { %v7894_v18 = vadd.f32 %v7890_v37, %v3012_v1  ;;  %v6293_v1 = vld [vmem:[#allocation2 + $0x38] sm:$0xff] }
 0xa12   : > { %3034 = vadd.xlane.f32.xlu1 %v7894_v18 }
 0xa13   : > { %v2986_v36 = vpop.f32.mrf.mxu1 }
 0xa14   : > { %v3005_v33 = vadd.f32 %v2986_v36, %v2644_v46 }
 0xa16   : > { %v3013_v3 = vadd.f32 %v6287_v8, %v3005_v33 }
 0xa18   : > { %v7898_v54 = vadd.f32 %v7890_v37, %v3013_v3 }
 0xa1a   : > { %3036 = vadd.xlane.f32.xlu0 %v7898_v54 }
 0xa5f   : > { %v2989_v52 = vpop.f32.mrf.mxu1 }
 0xa60   : > { %v3006_v35 = vadd.f32 %v2989_v52, %v2645_v51  ;;  %v5504_v51 = vld [vmem:[%s7141_s22 + $0xe0] sm:$0xf]  ;;  %v5780_v52 = vld [vmem:[%s7141_s22 + $0xec] sm:$0xf0] }
 0xa62   : > { %v3014_v5 = vadd.f32 %v6288_v34, %v3006_v35  ;;  %v5778_v35 = vld [vmem:[%s7141_s22 + $0xe4] sm:$0xf]  ;;  %v5505_v34 = vor.u32 %v5780_v52, %v5504_v51  ;;  %v5767_v51 = vld [vmem:[%s7141_s22 + $0x8c] sm:$0xf]  ;;  %v5466_v52 = vld [vmem:[%s7141_s22 + $0x98] sm:$0xf0] }
 0xa64   : > { %v7904_v24 = vadd.f32 %v7890_v37, %v3014_v5  ;;  %v5506_v5 = vld [vmem:[%s7141_s22 + $0xf0] sm:$0xf0]  ;;  %3422 = vmatpush.bf16.msra.mxu2 %v5505_v34 }
 0xa65   : > { %v5509_v60 = vor.u32 %v5778_v35, %v5506_v5  ;;  %v5469_v35 = vor.u32 %v5767_v51, %v5466_v52  ;;  %v5440_v5 = vld [vmem:[%s7141_s22 + $0x60] sm:$0xf]  ;;  %v5750_v52 = vld [vmem:[%s7141_s22 + $0x4] sm:$0xf] }
 0xa66   : > { %3038 = vadd.xlane.f32.xlu2 %v7904_v24 }
 0xa67   : > { %v2991_v49 = vpop.f32.mrf.mxu1  ;;  %3451 = vmatpush.bf16.msrb.mxu3 %v5509_v60 }
 0xa68   : > { %v3007_v15 = vadd.f32 %v2991_v49, %v2646_v55  ;;  %v5781_v55 = vld [vmem:[%s7141_s22 + $0xf4] sm:$0xf0] }
 0xa69   : > { %v5513_v49 = vor.u32 %v5781_v55, %v5512_v45  ;;  %v5764_v45 = vld [vmem:[%s7141_s22 + $0x6c] sm:$0xf0]  ;;  %v5762_v55 = vld [vmem:[%s7141_s22 + $0x64] sm:$0xf] }
 0xa6a   : > { %v3015_v62 = vadd.f32 %v6289_v0, %v3007_v15  ;;  %v5779_v15 = vld [vmem:[%s7141_s22 + $0xec] sm:$0xf]  ;;  %v5514_v0 = vld [vmem:[%s7141_s22 + $0xf8] sm:$0xf0]  ;;  %v5441_v60 = vor.u32 %v5764_v45, %v5440_v5  ;;  %v5400_v5 = vld [vmem:[%s7141_s22 + $0x8] sm:$0xf] }
 0xa6b   : > { %3480 = vmatpush.bf16.msrb.mxu0 %v5513_v49  ;;  %v5442_v49 = vld [vmem:[%s7141_s22 + $0x70] sm:$0xf0] }
 0xa6c   : > { %v7908_v57 = vadd.f32 %v7890_v37, %v3015_v62  ;;  %v5517_v62 = vor.u32 %v5779_v15, %v5514_v0  ;;  %v5448_v15 = vld [vmem:[%s7141_s22 + $0x68] sm:$0xf]  ;;  %v5765_v0 = vld [vmem:[%s7141_s22 + $0x74] sm:$0xf0] }
 0xa6e   : > { %3040 = vadd.xlane.f32.xlu2 %v7908_v57  ;;  %3509 = vmatpush.bf16.msrb.mxu1 %v5517_v62 }
 0xa71   : > { %v2994_v38 = vpop.f32.mrf.mxu1 }
 0xa72   : > { %v3008_v42 = vadd.f32 %v2994_v38, %v2647_v47  ;;  %v5776_v47 = vld [vmem:[%s7141_s22 + $0xcc] sm:$0xf0] }
 0xa74   : > { %v3016_v61 = vadd.f32 %v6290_v16, %v3008_v42  ;;  %v5489_v42 = vor.u32 %v5776_v47, %v5488_v4  ;;  %v5490_v16 = vld [vmem:[%s7141_s22 + $0xd0] sm:$0xf0]  ;;  %v5445_v4 = vor.u32 %v5762_v55, %v5442_v49  ;;  %v5449_v47 = vor.u32 %v5765_v0, %v5448_v15  ;;  %v5753_v55 = vld [vmem:[%s7141_s22 + $0x14] sm:$0xf0]  ;;  %v5402_v49 = vld [vmem:[%s7141_s22 + $0x18] sm:$0xf0] }
 0xa75   : > { %v5401_v15 = vor.u32 %v5753_v55, %v5400_v5 }
 0xa76   : > { %v7914_v63 = vadd.f32 %v7890_v37, %v3016_v61  ;;  %v5496_v61 = vld [vmem:[%s7141_s22 + $0xc8] sm:$0xf]  ;;  %3423 = vmatpush.bf16.msra.mxu2 %v5489_v42 }
 0xa78   : > { %3042 = vadd.xlane.f32.xlu2 %v7914_v63 }
 0xa79   : > { %v2996_v40 = vpop.f32.mrf.mxu1 }
 0xa7a   : > { %v3009_v28 = vadd.f32 %v2996_v40, %v2648_v50  ;;  %v5493_v40 = vor.u32 %v5774_v43, %v5490_v16  ;;  %v5763_v43 = vld [vmem:[%s7141_s22 + $0x6c] sm:$0xf]  ;;  %v5424_v16 = vld [vmem:[%s7141_s22 + $0x40] sm:$0xf] }
 0xa7c   : > { %v3017_v48 = vadd.f32 %v6291_v10, %v3009_v28  ;;  %v5497_v28 = vor.u32 %v5777_v22, %v5496_v61  ;;  %v5498_v10 = vld [vmem:[%s7141_s22 + $0xd8] sm:$0xf0]  ;;  %3452 = vmatpush.bf16.msrb.mxu3 %v5493_v40  ;;  %v5760_v61 = vld [vmem:[%s7141_s22 + $0x4c] sm:$0xf0]  ;;  %v5758_v22 = vld [vmem:[%s7141_s22 + $0x44] sm:$0xf] }
 0xa7d   : > { %v5425_v40 = vor.u32 %v5760_v61, %v5424_v16 }
 0xa7e   : > { %v7920_v27 = vadd.f32 %v7890_v37, %v3017_v48  ;;  %v5501_v48 = vor.u32 %v5775_v9, %v5498_v10  ;;  %3481 = vmatpush.bf16.msrb.mxu0 %v5497_v28  ;;  %v5426_v28 = vld [vmem:[%s7141_s22 + $0x50] sm:$0xf0]  ;;  %v5432_v9 = vld [vmem:[%s7141_s22 + $0x48] sm:$0xf]  ;;  %v5761_v10 = vld [vmem:[%s7141_s22 + $0x54] sm:$0xf0] }
 0xa80   : > { %3044 = vadd.xlane.f32.xlu1 %v7920_v27  ;;  %3510 = vmatpush.bf16.msrb.mxu1 %v5501_v48 }
 0xa81   : > { %v2999_v19 = vpop.f32.mrf.mxu1 }
 0xa82   : > { %v3010_v41 = vadd.f32 %v2999_v19, %v2649_v39  ;;  %v5472_v39 = vld [vmem:[%s7141_s22 + $0xa0] sm:$0xf]  ;;  %v5772_v19 = vld [vmem:[%s7141_s22 + $0xac] sm:$0xf0] }
 0xa84   : > { %v3018_v29 = vadd.f32 %v6292_v2, %v3010_v41  ;;  %v5770_v41 = vld [vmem:[%s7141_s22 + $0xa4] sm:$0xf]  ;;  %v5473_v2 = vor.u32 %v5772_v19, %v5472_v39  ;;  %v5429_v39 = vor.u32 %v5758_v22, %v5426_v28  ;;  %v5433_v19 = vor.u32 %v5761_v10, %v5432_v9 }
 0xa85   : > { %v3035_v58 = vpop.xlane.xlu1 %3034 }
 0xa86   : > { %v3050_v59 = vmul.f32 %v3035_v58, %v7172_v30  ;;  %v7927_v12 = vadd.f32 %v7890_v37, %v3018_v29  ;;  %v5474_v29 = vld [vmem:[%s7141_s22 + $0xb0] sm:$0xf0]  ;;  %v5773_v58 = vld [vmem:[%s7141_s22 + $0xb4] sm:$0xf0]  ;;  %3424 = vmatpush.bf16.msra.mxu2 %v5473_v2  ;;  %v5434_v2 = vld [vmem:[%s7141_s22 + $0x58] sm:$0xf0] }
 0xa88   : > { %v7930_v7 = vsub.f32 %v7894_v18, %v3050_v59  ;;  %3046 = vadd.xlane.f32.xlu1 %v7927_v12  ;;  %v5477_v59 = vor.u32 %v5770_v41, %v5474_v29  ;;  %v5759_v41 = vld [vmem:[%s7141_s22 + $0x4c] sm:$0xf] }
 0xa89   : > { %v3001_v23 = vpop.f32.mrf.mxu1  ;;  %v5437_v29 = vor.u32 %v5759_v41, %v5434_v2 }
 0xa8a   : > { %v3011_v56 = vadd.f32 %v3001_v23, %v2650_v21  ;;  %v3066_v14 = vmul.f32 %v7930_v7, %v7930_v7  ;;  %v5481_v21 = vor.u32 %v5773_v58, %v5480_v11  ;;  %v5771_v23 = vld [vmem:[%s7141_s22 + $0xac] sm:$0xf]  ;;  %3453 = vmatpush.bf16.msrb.mxu3 %v5477_v59  ;;  %v5408_v58 = vld [vmem:[%s7141_s22 + $0x20] sm:$0xf]  ;;  %v5754_v59 = vld [vmem:[%s7141_s22 + $0x24] sm:$0xf] }
 0xa8c   : > { %3074 = vadd.xlane.f32.xlu2 %v3066_v14  ;;  %v3019_v31 = vadd.f32 %v6293_v1, %v3011_v56  ;;  %v5482_v56 = vld [vmem:[%s7141_s22 + $0xb8] sm:$0xf0]  ;;  %v5768_v1 = vld [vmem:[%s7141_s22 + $0x8c] sm:$0xf0]  ;;  %3482 = vmatpush.bf16.msrb.mxu0 %v5481_v21 }
 0xa8d   : > { %v3037_v17 = vpop.xlane.xlu0 %3036  ;;  %v5485_v14 = vor.u32 %v5771_v23, %v5482_v56  ;;  %v5410_v56 = vld [vmem:[%s7141_s22 + $0x30] sm:$0xf0] }
 0xa8e   : > { %v3051_v53 = vmul.f32 %v3037_v17, %v7172_v30  ;;  %v7940_v13 = vadd.f32 %v7890_v37, %v3019_v31  ;;  %v5456_v17 = vld [vmem:[%s7141_s22 + $0x80] sm:$0xf]  ;;  %v5766_v31 = vld [vmem:[%s7141_s22 + $0x84] sm:$0xf] }
 0xa8f   : > { %3511 = vmatpush.bf16.msrb.mxu1 %v5485_v14  ;;  %v5416_v14 = vld [vmem:[%s7141_s22 + $0x28] sm:$0xf] }
 0xa90   : > { %v7937_v25 = vsub.f32 %v7898_v54, %v3051_v53 }
 0xa92   : > { %v3067_v46 = vmul.f32 %v7937_v25, %v7937_v25 }
 0xa93   : > { %3512 = vmatpush.bf16.msrb.mxu1 %v5469_v35  ;;  %v5394_v35 = vld [vmem:[%s7141_s22 + $0x10] sm:$0xf0] }
 0xa94   : > { %3048 = vadd.xlane.f32.xlu2 %v7940_v13  ;;  %3076 = vadd.xlane.f32.xlu0 %v3067_v46  ;;  %v5457_v46 = vor.u32 %v5768_v1, %v5456_v17  ;;  %v5757_v17 = vld [vmem:[%s7141_s22 + $0x34] sm:$0xf0]  ;;  %v5397_v45 = vor.u32 %v5750_v52, %v5394_v35 }
 0xa96   : > { %3425 = vmatpush.bf16.msra.mxu2 %v5457_v46  ;;  %v5417_v46 = vor.u32 %v5757_v17, %v5416_v14 }
 0xa9a   : > { %3426 = vmatpush.bf16.msra.mxu2 %v5441_v60  ;;  %v5751_v60 = vld [vmem:[%s7141_s22 + $0xc] sm:$0xf] }
 0xa9b   : > { %v5405_v0 = vor.u32 %v5751_v60, %v5402_v49 }
 0xa9e   : > { %3427 = vmatpush.bf16.msra.mxu2 %v5425_v40 }
 0xad9   : > { %v3039_v36 = vpop.xlane.xlu2 %3038 }
 0xada   : > { %v3052_v33 = vmul.f32 %v3039_v36, %v7172_v30  ;;  %v5458_v36 = vld [vmem:[%s7141_s22 + $0x90] sm:$0xf0] }
 0xadc   : > { %v7947_v8 = vsub.f32 %v7904_v24, %v3052_v33  ;;  %v5464_v33 = vld [vmem:[%s7141_s22 + $0x88] sm:$0xf] }
 0xade   : > { %v3068_v3 = vmul.f32 %v7947_v8, %v7947_v8 }
 0xae0   : > { %3078 = vadd.xlane.f32.xlu0 %v3068_v3  ;;  %v5769_v3 = vld [vmem:[%s7141_s22 + $0x94] sm:$0xf0] }
 0xae1   : > { %v3041_v37 = vpop.xlane.xlu2 %3040 }
 0xae2   : > { %v3053_v44 = vmul.f32 %v3041_v37, %v7172_v30 }
 0xae4   : > { %v7953_v26 = vsub.f32 %v7908_v57, %v3053_v44  ;;  %v5461_v44 = vor.u32 %v5766_v31, %v5458_v36  ;;  %v5755_v36 = vld [vmem:[%s7141_s22 + $0x2c] sm:$0xf] }
 0xae6   : > { %v3069_v6 = vmul.f32 %v7953_v26, %v7953_v26  ;;  %3454 = vmatpush.bf16.msrb.mxu3 %v5461_v44  ;;  %v5392_v44 = vld [vmem:[%s7141_s22] sm:$0xf] }
 0xae8   : > { %3080 = vadd.xlane.f32.xlu1 %v3069_v6  ;;  %v5465_v6 = vor.u32 %v5769_v3, %v5464_v33  ;;  %v5418_v33 = vld [vmem:[%s7141_s22 + $0x38] sm:$0xf0] }
 0xae9   : > { %v5421_v3 = vor.u32 %v5755_v36, %v5418_v33 }
 0xaea   : > { %3483 = vmatpush.bf16.msrb.mxu0 %v5465_v6  ;;  %3455 = vmatpush.bf16.msrb.mxu3 %v5445_v4  ;;  %v5752_v6 = vld [vmem:[%s7141_s22 + $0xc] sm:$0xf0] }
 0xaeb   : > { %v3043_v38 = vpop.xlane.xlu2 %3042  ;;  %v5393_v51 = vor.u32 %v5752_v6, %v5392_v44 }
 0xaec   : > { %v3054_v50 = vmul.f32 %v3043_v38, %v7172_v30  ;;  %v5450_v38 = vld [vmem:[%s7141_s22 + $0x78] sm:$0xf0] }
 0xaed   : > { %v5453_v42 = vor.u32 %v5763_v43, %v5450_v38 }
 0xaee   : > { %v7975_v20 = vsub.f32 %v7914_v63, %v3054_v50  ;;  %3484 = vmatpush.bf16.msrb.mxu0 %v5449_v47  ;;  %3456 = vmatpush.bf16.msrb.mxu3 %v5429_v39 }
 0xaef   : > { %3513 = vmatpush.bf16.msrb.mxu1 %v5453_v42 }
 0xaf0   : > { %v3070_v32 = vmul.f32 %v7975_v20, %v7975_v20 }
 0xaf2   : > { %3082 = vadd.xlane.f32.xlu2 %v3070_v32  ;;  %v5756_v32 = vld [vmem:[%s7141_s22 + $0x2c] sm:$0xf0]  ;;  %3485 = vmatpush.bf16.msrb.mxu0 %v5433_v19  ;;  %s9308_s22 = scalar_lea.vmem [#allocation15], %s7122_s30 }
 0xaf3   : > { %v3045_v53 = vpop.xlane.xlu1 %3044  ;;  %3514 = vmatpush.bf16.msrb.mxu1 %v5437_v29  ;;  %v5409_v23 = vor.u32 %v5756_v32, %v5408_v58  ;;  %v8049_v29 = vld [vmem:[%s9308_s22] ss:$0 sm:$0xff] }
 0xaf4   : > { %v3055_v37 = vmul.f32 %v3045_v53, %v7172_v30  ;;  %v5413_v53 = vor.u32 %v5754_v59, %v5410_v56 }
 0xaf5   : > { %3428 = vmatpush.bf16.msra.mxu2 %v5409_v23 }
 0xaf6   : > { %v7997_v34 = vsub.f32 %v7920_v27, %v3055_v37  ;;  %3457 = vmatpush.bf16.msrb.mxu3 %v5413_v53  ;;  %3486 = vmatpush.bf16.msrb.mxu0 %v5417_v46 }
 0xaf7   : > { %3515 = vmatpush.bf16.msrb.mxu1 %v5421_v3 }
 0xaf8   : > { %v3071_v62 = vmul.f32 %v7997_v34, %v7997_v34 }
 0xaf9   : > { %3429 = vmatpush.bf16.msra.mxu2 %v5393_v51 }
 0xafa   : > { %3084 = vadd.xlane.f32.xlu0 %v3071_v62  ;;  %3458 = vmatpush.bf16.msrb.mxu3 %v5397_v45 }
 0xafb   : > { %v3047_v50 = vpop.xlane.xlu1 %3046  ;;  %3487 = vmatpush.bf16.msrb.mxu0 %v5401_v15  ;;  %3516 = vmatpush.bf16.msrb.mxu1 %v5405_v0 }
 0xafc   : > { %v3056_v48 = vmul.f32 %v3047_v50, %v7172_v30 }
 0xafe   : > { %v8019_v11 = vsub.f32 %v7927_v12, %v3056_v48 }
 0xaff   : > { %v3075_v21 = vpop.xlane.xlu2 %3074 }
 0xb00   : > { %v3090_v1 = vmul.f32 %v3075_v21, %v7172_v30  ;;  %v3072_v31 = vmul.f32 %v8019_v11, %v8019_v11  ;;  %v8054_v21 = vld [vmem:[%s9309_s4] ss:$0 sm:$0xff] }
 0xb02   : > { %v3098_v37 = vadd.f32 1e-05, %v3090_v1  ;;  %3086 = vadd.xlane.f32.xlu1 %v3072_v31 }
 0xb04   : > { %6140 = vrsqrt.f32 %v3098_v37  ;;  %vm3112_vm12 = vweird.f32 %v3098_v37 }
 0xb07   : > { %v3049_v62 = vpop.xlane.xlu2 %3048  ;;  %v3077_v4 = vpop.xlane.xlu0 %3076 }
 0xb08   : > { %v3057_v47 = vmul.f32 %v3049_v62, %v7172_v30  ;;  %v3091_v43 = vmul.f32 %v3077_v4, %v7172_v30 }
 0xb0a   : > { %v6141_v38 = vpop.eup %6140  ;;  %v8043_v42 = vsub.f32 %v7940_v13, %v3057_v47  ;;  %v3099_v16 = vadd.f32 1e-05, %v3091_v43 }
 0xb0b   : > { %v3107_v61 = vmul.f32 %v6141_v38, %v3098_v37  ;;  %vm3113_vm11 = vweird.f32 %v6141_v38 }
 0xb0c   : > { %6142 = vrsqrt.f32 %v3099_v16  ;;  %v3073_v22 = vmul.f32 %v8043_v42, %v8043_v42  ;;  %vm3114_vm13 = vmor %vm3112_vm12, %vm3113_vm11  ;;  %vm3122_vm15 = vweird.f32 %v3099_v16 }
 0xb0d   : > { %v3108_v50 = vmul.f32 %v6141_v38, %v3107_v61 }
 0xb0e   : > { %3088 = vadd.xlane.f32.xlu2 %v3073_v22 }
 0xb0f   : > { %v3109_v40 = vmul.f32 0.5, %v3108_v50 }
 0xb11   : > { %v3110_v28 = vsub.f32 1.5, %v3109_v40 }
 0xb12   : > { %v6143_v9 = vpop.eup %6142 }
 0xb13   : > { %v3111_v10 = vmul.f32 %v6141_v38, %v3110_v28  ;;  %v3117_v48 = vmul.f32 %v6143_v9, %v3099_v16  ;;  %vm3123_vm14 = vweird.f32 %v6143_v9 }
 0xb14   : > { %vm3124_vm0 = vmor %vm3122_vm15, %vm3123_vm14 }
 0xb15   : > { %v3118_v39 = vmul.f32 %v6143_v9, %v3117_v48  ;;  %v3115_v19 = vsel %vm3114_vm13, %v6141_v38, %v3111_v10 }
 0xb16   : > { %v3186_v58 = vmul.f32 %v3115_v19, %v7930_v7 }
 0xb17   : > { %v3119_v41 = vmul.f32 0.5, %v3118_v39 }
 0xb18   : > { %v3197_v23 = vmul.f32 %v8049_v29, %v3186_v58 }
 0xb19   : > { %v3120_v2 = vsub.f32 1.5, %v3119_v41 }
 0xb1a   : > { %v3208_v17 = vadd.f32 %v8054_v21, %v3197_v23 }
 0xb1b   : > { %v3121_v32 = vmul.f32 %v6143_v9, %v3120_v2 }
 0xb1d   : > { %v3125_v59 = vsel %vm3124_vm0, %v6143_v9, %v3121_v32 }
 0xb1e   : > { %v3187_v56 = vmul.f32 %v3125_v59, %v7937_v25 }
 0xb20   : > { %v3198_v14 = vmul.f32 %v8049_v29, %v3187_v56 }
 0xb22   : > { %v3209_v1 = vadd.f32 %v8054_v21, %v3198_v14 }
 0xb24   : > { %v3216_v31 = vpack.c.bf16 %v3209_v1, %v3208_v17 }
 0xb26   : > { %3430 = vmatmul.bf16.vlgmr.msra.gmra.mxu2 %v3216_v31  ;;  %3459 = vmatmul.bf16.vlgmr.msrb.gmra.mxu3 %v3216_v31 }
 0xb27   : > { %3488 = vmatmul.bf16.vlgmr.msrb.gmra.mxu0 %v3216_v31  ;;  %3517 = vmatmul.bf16.vlgmr.msrb.gmra.mxu1 %v3216_v31 }
 0xb53   : > { %v3079_v7 = vpop.xlane.xlu0 %3078 }
 0xb54   : > { %v3092_v53 = vmul.f32 %v3079_v7, %v7172_v30 }
 0xb56   : > { %v3100_v46 = vadd.f32 1e-05, %v3092_v53 }
 0xb58   : > { %6144 = vrsqrt.f32 %v3100_v46  ;;  %vm3132_vm2 = vweird.f32 %v3100_v46 }
 0xb5b   : > { %v3081_v36 = vpop.xlane.xlu1 %3080 }
 0xb5c   : > { %v3093_v33 = vmul.f32 %v3081_v36, %v7172_v30 }
 0xb5e   : > { %v6145_v25 = vpop.eup %6144  ;;  %v3101_v3 = vadd.f32 1e-05, %v3093_v33 }
 0xb5f   : > { %v3127_v37 = vmul.f32 %v6145_v25, %v3100_v46  ;;  %vm3133_vm1 = vweird.f32 %v6145_v25 }
 0xb60   : > { %6146 = vrsqrt.f32 %v3101_v3  ;;  %vm3134_vm3 = vmor %vm3132_vm2, %vm3133_vm1  ;;  %vm3142_vm5 = vweird.f32 %v3101_v3 }
 0xb61   : > { %v3128_v44 = vmul.f32 %v6145_v25, %v3127_v37 }
 0xb63   : > { %v3129_v6 = vmul.f32 0.5, %v3128_v44 }
 0xb65   : > { %v3130_v51 = vsub.f32 1.5, %v3129_v6  ;;  %v3083_v52 = vpop.xlane.xlu2 %3082 }
 0xb66   : > { %v6147_v35 = vpop.eup %6146  ;;  %v3094_v5 = vmul.f32 %v3083_v52, %v7172_v30 }
 0xb67   : > { %v3131_v45 = vmul.f32 %v6145_v25, %v3130_v51  ;;  %v3137_v55 = vmul.f32 %v6147_v35, %v3101_v3  ;;  %vm3143_vm4 = vweird.f32 %v6147_v35 }
 0xb68   : > { %v3102_v60 = vadd.f32 1e-05, %v3094_v5  ;;  %vm3144_vm6 = vmor %vm3142_vm5, %vm3143_vm4 }
 0xb69   : > { %v3138_v49 = vmul.f32 %v6147_v35, %v3137_v55  ;;  %v3135_v15 = vsel %vm3134_vm3, %v6145_v25, %v3131_v45 }
 0xb6a   : > { %6148 = vrsqrt.f32 %v3102_v60  ;;  %v3188_v47 = vmul.f32 %v3135_v15, %v7947_v8  ;;  %vm3152_vm8 = vweird.f32 %v3102_v60 }
 0xb6b   : > { %v3139_v0 = vmul.f32 0.5, %v3138_v49 }
 0xb6c   : > { %v3199_v28 = vmul.f32 %v8049_v29, %v3188_v47 }
 0xb6d   : > { %v3140_v62 = vsub.f32 1.5, %v3139_v0  ;;  %v3085_v4 = vpop.xlane.xlu0 %3084 }
 0xb6e   : > { %v3095_v43 = vmul.f32 %v3085_v4, %v7172_v30  ;;  %v3210_v19 = vadd.f32 %v8054_v21, %v3199_v28  ;;  %v3252_v28 = vld [vmem:[%s7169_s11] sm:$0xf] }
 0xb6f   : > { %v3141_v38 = vmul.f32 %v6147_v35, %v3140_v62 }
 0xb70   : > { %v6149_v16 = vpop.eup %6148  ;;  %v3103_v61 = vadd.f32 1e-05, %v3095_v43 }
 0xb71   : > { %v3145_v22 = vsel %vm3144_vm6, %v6147_v35, %v3141_v38  ;;  %v3147_v50 = vmul.f32 %v6149_v16, %v3102_v60  ;;  %vm3153_vm7 = vweird.f32 %v6149_v16 }
 0xb72   : > { %v3189_v40 = vmul.f32 %v3145_v22, %v7953_v26  ;;  %6150 = vrsqrt.f32 %v3103_v61  ;;  %vm3154_vm9 = vmor %vm3152_vm8, %vm3153_vm7  ;;  %vm3162_vm11 = vweird.f32 %v3103_v61 }
 0xb73   : > { %v3148_v9 = vmul.f32 %v6149_v16, %v3147_v50 }
 0xb74   : > { %v3200_v10 = vmul.f32 %v8049_v29, %v3189_v40 }
 0xb75   : > { %v3149_v48 = vmul.f32 0.5, %v3148_v9  ;;  %v3087_v39 = vpop.xlane.xlu1 %3086  ;;  %v5805_v9 = vld [vmem:[%s7143_s5 + $0xb8] sm:$0xff] }
 0xb76   : > { %v3096_v8 = vmul.f32 %v3087_v39, %v7172_v30  ;;  %v3211_v41 = vadd.f32 %v8054_v21, %v3200_v10  ;;  %v8090_v10 = vperm.slane %v3252_v28, 3  ;;  %4544 = vmatpush.bf16.msra.mxu0 %v5805_v9  ;;  %v5793_v9 = vld [vmem:[%s7143_s5 + $0x58] sm:$0xff] }
 0xb77   : > { %v3150_v2 = vsub.f32 1.5, %v3149_v48  ;;  %v5812_v48 = vld [vmem:[%s7143_s5 + $0xf0] sm:$0xff] }
 0xb78   : > { %v6151_v58 = vpop.eup %6150  ;;  %v3104_v32 = vadd.f32 1e-05, %v3096_v8  ;;  %v3217_v59 = vpack.c.bf16 %v3211_v41, %v3210_v19  ;;  %v5789_v41 = vld [vmem:[%s7143_s5 + $0x38] sm:$0xff] }
 0xb79   : > { %v3151_v23 = vmul.f32 %v6149_v16, %v3150_v2  ;;  %v3157_v26 = vmul.f32 %v6151_v58, %v3103_v61  ;;  %vm3163_vm10 = vweird.f32 %v6151_v58  ;;  %v5797_v2 = vld [vmem:[%s7143_s5 + $0x78] sm:$0xff]  ;;  %4486 = vmatpush.bf16.msrb.mxu2 %v5789_v41 }
 0xb7a   : > { %6152 = vrsqrt.f32 %v3104_v32  ;;  %3435 = vmatmul.bf16.gmra.mxu2 %v3217_v59  ;;  %3464 = vmatmul.bf16.gmra.mxu3 %v3217_v59  ;;  %vm3164_vm12 = vmor %vm3162_vm11, %vm3163_vm10  ;;  %vm3172_vm14 = vweird.f32 %v3104_v32 }
 0xb7b   : > { %v3158_v56 = vmul.f32 %v6151_v58, %v3157_v26  ;;  %3493 = vmatmul.bf16.gmra.mxu0 %v3217_v59  ;;  %3522 = vmatmul.bf16.gmra.mxu1 %v3217_v59  ;;  %v3155_v14 = vsel %vm3154_vm9, %v6149_v16, %v3151_v23  ;;  %v5803_v26 = vld [vmem:[%s7143_s5 + $0xa8] sm:$0xff] }
 0xb7c   : > { %v3190_v7 = vmul.f32 %v3155_v14, %v7975_v20  ;;  %4515 = vmatpush.bf16.msra.mxu3 %v5797_v2  ;;  %v5807_v2 = vld [vmem:[%s7143_s5 + $0xc8] sm:$0xff] }
 0xb7d   : > { %v3159_v17 = vmul.f32 0.5, %v3158_v56  ;;  %v5811_v56 = vld [vmem:[%s7143_s5 + $0xe8] sm:$0xff] }
 0xb7e   : > { %v3201_v6 = vmul.f32 %v8049_v29, %v3190_v7  ;;  %v5788_v7 = vld [vmem:[%s7143_s5 + $0x30] sm:$0xff] }
 0xb7f   : > { %v3160_v1 = vsub.f32 1.5, %v3159_v17  ;;  %4487 = vmatpush.bf16.msrb.mxu2 %v5788_v7  ;;  %v5798_v7 = vld [vmem:[%s7143_s5 + $0x80] sm:$0xff] }
 0xb80   : > { %v6153_v31 = vpop.eup %6152  ;;  %v3212_v20 = vadd.f32 %v8054_v21, %v3201_v6 }
 0xb81   : > { %v3161_v53 = vmul.f32 %v6151_v58, %v3160_v1  ;;  %v3167_v46 = vmul.f32 %v6153_v31, %v3104_v32  ;;  %v3089_v36 = vpop.xlane.xlu2 %3088  ;;  %vm3173_vm13 = vweird.f32 %v6153_v31  ;;  %v8104_v32 = vperm.slane %v3252_v28, 1 }
 0xb82   : > { %v3097_v33 = vmul.f32 %v3089_v36, %v7172_v30  ;;  %vm3174_vm15 = vmor %vm3172_vm14, %vm3173_vm13 }
 0xb83   : > { %v3165_v25 = vsel %vm3164_vm12, %v6151_v58, %v3161_v53  ;;  %v3168_v3 = vmul.f32 %v6153_v31, %v3167_v46  ;;  %v8102_v58 = vperm.slane %v3252_v28, 0  ;;  %v5796_v53 = vld [vmem:[%s7143_s5 + $0x70] sm:$0xff] }
 0xb84   : > { %v3191_v37 = vmul.f32 %v3165_v25, %v7997_v34  ;;  %v3105_v44 = vadd.f32 1e-05, %v3097_v33  ;;  %4516 = vmatpush.bf16.msra.mxu3 %v5796_v53  ;;  %v5802_v33 = vld [vmem:[%s7143_s5 + $0xa0] sm:$0xff] }
 0xb85   : > { %v3169_v51 = vmul.f32 0.5, %v3168_v3  ;;  %v5810_v25 = vld [vmem:[%s7143_s5 + $0xe0] sm:$0xff] }
 0xb86   : > { %6154 = vrsqrt.f32 %v3105_v44  ;;  %v3202_v52 = vmul.f32 %v8049_v29, %v3191_v37  ;;  %vm3182_vm1 = vweird.f32 %v3105_v44  ;;  %v5806_v53 = vld [vmem:[%s7143_s5 + $0xc0] sm:$0xff] }
 0xb87   : > { %v3170_v5 = vsub.f32 1.5, %v3169_v51 }
 0xb88   : > { %v3213_v35 = vadd.f32 %v8054_v21, %v3202_v52 }
 0xb89   : > { %v3171_v60 = vmul.f32 %v6153_v31, %v3170_v5 }
 0xb8a   : > { %v3218_v45 = vpack.c.bf16 %v3213_v35, %v3212_v20  ;;  %v5787_v20 = vld [vmem:[%s7143_s5 + $0x28] sm:$0xff] }
 0xb8b   : > { %v3175_v15 = vsel %vm3174_vm15, %v6153_v31, %v3171_v60  ;;  %v5795_v35 = vld [vmem:[%s7143_s5 + $0x68] sm:$0xff]  ;;  %4488 = vmatpush.bf16.msrb.mxu2 %v5787_v20 }
 0xb8c   : > { %v6155_v55 = vpop.eup %6154  ;;  %3440 = vmatmul.bf16.gmra.mxu2 %v3218_v45  ;;  %3469 = vmatmul.bf16.gmra.mxu3 %v3218_v45  ;;  %v3192_v4 = vmul.f32 %v3175_v15, %v8019_v11  ;;  %v5813_v11 = vld [vmem:[%s7143_s5 + $0xf8] sm:$0xff]  ;;  %v5791_v20 = vld [vmem:[%s7143_s5 + $0x48] sm:$0xff] }
 0xb8d   : > { %v3177_v49 = vmul.f32 %v6155_v55, %v3105_v44  ;;  %3498 = vmatmul.bf16.gmra.mxu0 %v3218_v45  ;;  %3527 = vmatmul.bf16.gmra.mxu1 %v3218_v45  ;;  %vm3183_vm0 = vweird.f32 %v6155_v55 }
 0xb8e   : > { %vm3184_vm2 = vmor %vm3182_vm1, %vm3183_vm0  ;;  %v3203_v16 = vmul.f32 %v8049_v29, %v3192_v4  ;;  %4573 = vmatpush.bf16.msra.mxu1 %v5813_v11  ;;  %4517 = vmatpush.bf16.msra.mxu3 %v5795_v35  ;;  %v5786_v4 = vld [vmem:[%s7143_s5 + $0x20] sm:$0xff] }
 0xb8f   : > { %v3178_v34 = vmul.f32 %v6155_v55, %v3177_v49  ;;  %v5801_v49 = vld [vmem:[%s7143_s5 + $0x98] sm:$0xff]  ;;  %4489 = vmatpush.bf16.msrb.mxu2 %v5786_v4 }
 0xb90   : > { %v3214_v22 = vadd.f32 %v8054_v21, %v3203_v16 }
 0xb91   : > { %v3179_v0 = vmul.f32 0.5, %v3178_v34  ;;  %v5809_v34 = vld [vmem:[%s7143_s5 + $0xd8] sm:$0xff] }
 0xb92   : > { %4574 = vmatpush.bf16.msra.mxu1 %v5812_v48 }
 0xb93   : > { %v3180_v62 = vsub.f32 1.5, %v3179_v0 }
 0xb95   : > { %v3181_v47 = vmul.f32 %v6155_v55, %v3180_v62 }
 0xb96   : > { %4575 = vmatpush.bf16.msra.mxu1 %v5811_v56 }
 0xb97   : > { %v3185_v43 = vsel %vm3184_vm2, %v6155_v55, %v3181_v47  ;;  %v5794_v47 = vld [vmem:[%s7143_s5 + $0x60] sm:$0xff] }
 0xb98   : > { %v3193_v38 = vmul.f32 %v3185_v43, %v8043_v42  ;;  %v8088_v42 = vperm.slane %v3252_v28, 2  ;;  %4518 = vmatpush.bf16.msra.mxu3 %v5794_v47  ;;  %v5785_v28 = vld [vmem:[%s7143_s5 + $0x18] sm:$0xff] }
 0xb99   : > { %4490 = vmatpush.bf16.msrb.mxu2 %v5785_v28 }
 0xb9a   : > { %v3204_v61 = vmul.f32 %v8049_v29, %v3193_v38  ;;  %v5804_v29 = vld [vmem:[%s7143_s5 + $0xb0] sm:$0xff]  ;;  %4576 = vmatpush.bf16.msra.mxu1 %v5810_v25 }
 0xb9b   : > { %4545 = vmatpush.bf16.msra.mxu0 %v5804_v29 }
 0xb9c   : > { %v3215_v50 = vadd.f32 %v8054_v21, %v3204_v61  ;;  %4519 = vmatpush.bf16.msra.mxu3 %v5793_v9 }
 0xb9e   : > { %v3219_v40 = vpack.c.bf16 %v3215_v50, %v3214_v22  ;;  %4577 = vmatpush.bf16.msra.mxu1 %v5809_v34  ;;  %v5800_v50 = vld [vmem:[%s7143_s5 + $0x90] sm:$0xff]  ;;  %v5782_v34 = vld [vmem:[%s7143_s5] sm:$0xff] }
 0xb9f   : > { %4546 = vmatpush.bf16.msra.mxu0 %v5803_v26  ;;  %v5792_v26 = vld [vmem:[%s7143_s5 + $0x50] sm:$0xff] }
 0xba0   : > { %3445 = vmatmul.bf16.gmra.mxu2 %v3219_v40  ;;  %3474 = vmatmul.bf16.gmra.mxu3 %v3219_v40 }
 0xba1   : > { %3503 = vmatmul.bf16.gmra.mxu0 %v3219_v40  ;;  %3532 = vmatmul.bf16.gmra.mxu1 %v3219_v40  ;;  %v5808_v40 = vld [vmem:[%s7143_s5 + $0xd0] sm:$0xff] }
 0xba2   : > { %4578 = vmatpush.bf16.msra.mxu1 %v5808_v40  ;;  %4520 = vmatpush.bf16.msra.mxu3 %v5792_v26 }
 0xba3   : > { %4547 = vmatpush.bf16.msra.mxu0 %v5802_v33 }
 0xba4   : > { %v3489_v21 = vpop.f32.mrf.mxu0  ;;  %v3518_v39 = vpop.f32.mrf.mxu1 }
 0xba5   : > { %v8095_v8 = vadd.f32 %v3489_v21, %v8088_v42  ;;  %v8098_v19 = vadd.f32 %v3518_v39, %v8090_v10  ;;  %v5799_v21 = vld [vmem:[%s7143_s5 + $0x88] sm:$0xff] }
 0xba6   : > { %4579 = vmatpush.bf16.msra.mxu1 %v5807_v2  ;;  %4521 = vmatpush.bf16.msra.mxu3 %v5791_v20 }
 0xba7   : > { %v5520_v59 = vmul.f32 -1.702, %v8095_v8  ;;  %v5521_v23 = vmul.f32 -1.702, %v8098_v19  ;;  %4548 = vmatpush.bf16.msra.mxu0 %v5801_v49 }
 0xba9   : > { %v3606_v14 = vmul.f32 1.442695, %v5520_v59  ;;  %v3608_v17 = vmul.f32 1.442695, %v5521_v23  ;;  %v3431_v1 = vpop.f32.mrf.mxu2  ;;  %v3460_v31 = vpop.f32.mrf.mxu3  ;;  %v5784_v23 = vld [vmem:[%s7143_s5 + $0x10] sm:$0xff] }
 0xbaa   : > { %v8113_v46 = vadd.f32 %v3431_v1, %v8102_v58  ;;  %v8116_v36 = vadd.f32 %v3460_v31, %v8104_v32  ;;  %4491 = vmatpush.bf16.msrb.mxu2 %v5784_v23  ;;  %4580 = vmatpush.bf16.msra.mxu1 %v5806_v53 }
 0xbab   : > { %6156 = vpow2.f32 %v3606_v14  ;;  %4549 = vmatpush.bf16.msra.mxu0 %v5800_v50 }
 0xbac   : > { %6158 = vpow2.f32 %v3608_v17  ;;  %v5518_v3 = vmul.f32 -1.702, %v8113_v46  ;;  %v5519_v37 = vmul.f32 -1.702, %v8116_v36  ;;  %v3491_v44 = vpop.f32.mrf.mxu0  ;;  %v3520_v6 = vpop.f32.mrf.mxu1 }
 0xbad   : > { %v8123_v51 = vadd.f32 %v3491_v44, %v8088_v42  ;;  %v8126_v52 = vadd.f32 %v3520_v6, %v8090_v10  ;;  %v5783_v6 = vld [vmem:[%s7143_s5 + $0x8] sm:$0xff] }
 0xbae   : > { %v3602_v5 = vmul.f32 1.442695, %v5518_v3  ;;  %v3604_v45 = vmul.f32 1.442695, %v5519_v37  ;;  %4492 = vmatpush.bf16.msrb.mxu2 %v5783_v6 }
 0xbaf   : > { %v5524_v55 = vmul.f32 -1.702, %v8123_v51  ;;  %v5525_v60 = vmul.f32 -1.702, %v8126_v52  ;;  %4550 = vmatpush.bf16.msra.mxu0 %v5799_v21 }
 0xbb0   : > { %6160 = vpow2.f32 %v3602_v5 }
 0xbb1   : > { %v6157_v15 = vpop.eup %6156  ;;  %v3614_v0 = vmul.f32 1.442695, %v5524_v55  ;;  %v3433_v62 = vpop.f32.mrf.mxu2  ;;  %6162 = vpow2.f32 %v3604_v45  ;;  %v3616_v16 = vmul.f32 1.442695, %v5525_v60 }
 0xbb2   : > { %v6159_v43 = vpop.eup %6158  ;;  %v8136_v38 = vadd.f32 1.0, %v6157_v15  ;;  %v8139_v61 = vadd.f32 %v3433_v62, %v8102_v58  ;;  %v3462_v41 = vpop.f32.mrf.mxu3  ;;  %v5790_v15 = vld [vmem:[%s7143_s5 + $0x40] sm:$0xff]  ;;  %4493 = vmatpush.bf16.msrb.mxu2 %v5782_v34 }
 0xbb3   : > { %v8141_v22 = vadd.f32 1.0, %v6159_v43  ;;  %6164 = vpow2.f32 %v3614_v0  ;;  %v8164_v31 = vadd.f32 %v3462_v41, %v8104_v32  ;;  %4551 = vmatpush.bf16.msra.mxu0 %v5798_v7  ;;  %4522 = vmatpush.bf16.msra.mxu3 %v5790_v15 }
 0xbb4   : > { %6166 = vrcp.f32 %v8136_v38  ;;  %v5522_v29 = vmul.f32 -1.702, %v8139_v61  ;;  %v3737_v49 = vand.u32 2147483647, %v8136_v38  ;;  %v3739_v0 = vand.u32 2147483648, %v8136_v38 }
 0xbb5   : > { %6168 = vrcp.f32 %v8141_v22  ;;  %v5523_v5 = vmul.f32 -1.702, %v8164_v31  ;;  %v3752_v62 = vand.u32 2147483647, %v8141_v22  ;;  %v3754_v4 = vand.u32 2147483648, %v8141_v22 }
 0xbb6   : > { %v6161_v11 = vpop.eup %6160  ;;  %6170 = vpow2.f32 %v3616_v16  ;;  %v3610_v14 = vmul.f32 1.442695, %v5522_v29  ;;  %vm3733_vm4 = vweird.f32 %v8136_v38  ;;  %vm8197_vm5 = vcmp.eq.f32.partialorder %v3737_v49, 8.507059e+37 }
 0xbb7   : > { %v8150_v48 = vadd.f32 1.0, %v6161_v11  ;;  %v6163_v39 = vpop.eup %6162  ;;  %v3612_v47 = vmul.f32 1.442695, %v5523_v5  ;;  %vm3748_vm6 = vweird.f32 %v8141_v22  ;;  %v3740_v11 = vor.u32 1.1754944e-38, %v3739_v0 }
 0xbb8   : > { %v8170_v37 = vadd.f32 1.0, %v6163_v39  ;;  %vm8202_vm7 = vcmp.eq.f32.partialorder %v3752_v62, 8.507059e+37  ;;  %v3755_v21 = vor.u32 1.1754944e-38, %v3754_v4 }
 0xbb9   : > { %v6165_v59 = vpop.eup %6164  ;;  %6172 = vrcp.f32 %v8150_v48  ;;  %v3709_v53 = vand.u32 2147483648, %v8150_v48  ;;  %v3707_v29 = vand.u32 2147483647, %v8150_v48 }
 0xbba   : > { %v8156_v56 = vpop.eup %6166  ;;  %v8172_v44 = vadd.f32 1.0, %v6165_v59  ;;  %6174 = vpow2.f32 %v3610_v14 }
 0xbbb   : > { %v8158_v17 = vpop.eup %6168  ;;  %v3729_v1 = vmul.f32 %v8156_v56, %v8136_v38  ;;  %vm3734_vm3 = vweird.f32 %v8156_v56 }
 0xbbc   : > { %v6171_v33 = vpop.eup %6170  ;;  %v3744_v25 = vmul.f32 %v8158_v17, %v8141_v22  ;;  %6176 = vrcp.f32 %v8172_v44  ;;  %vm8209_vm8 = vmor %vm3733_vm4, %vm3734_vm3  ;;  %vm3749_vm9 = vweird.f32 %v8158_v17  ;;  %v3797_v38 = vand.u32 2147483647, %v8172_v44 }
 0xbbd   : > { %v3730_v3 = vsub.f32 1.0, %v3729_v1  ;;  %v8176_v35 = vadd.f32 1.0, %v6171_v33  ;;  %6178 = vrcp.f32 %v8170_v37  ;;  %vm3793_vm10 = vweird.f32 %v8172_v44  ;;  %vm8234_vm12 = vmor %vm3748_vm6, %vm3749_vm9 }
 0xbbe   : > { %v3745_v55 = vsub.f32 1.0, %v3744_v25  ;;  %v3799_v33 = vand.u32 2147483648, %v8172_v44  ;;  %vm8239_vm14 = vcmp.eq.f32.partialorder %v3797_v38, 8.507059e+37  ;;  %vm3703_vm3 = vweird.f32 %v8150_v48 }
 0xbbf   : > { %v3731_v45 = vmul.f32 %v8156_v56, %v3730_v3  ;;  %v8181_v60 = vpop.eup %6172  ;;  %6180 = vrcp.f32 %v8176_v35  ;;  %v3814_v22 = vand.u32 2147483648, %v8176_v35  ;;  %v3812_v4 = vand.u32 2147483647, %v8176_v35 }
 0xbc0   : > { %v6175_v43 = vpop.eup %6174  ;;  %v3746_v50 = vmul.f32 %v8158_v17, %v3745_v55  ;;  %v3699_v40 = vmul.f32 %v8181_v60, %v8150_v48  ;;  %6182 = vpow2.f32 %v3612_v47  ;;  %vm3704_vm13 = vweird.f32 %v8181_v60 }
 0xbc1   : > { %v3732_v16 = vadd.f32 %v8156_v56, %v3731_v45  ;;  %v8215_v59 = vadd.f32 1.0, %v6175_v43  ;;  %v3800_v0 = vor.u32 1.1754944e-38, %v3799_v33  ;;  %vm3808_vm1 = vweird.f32 %v8176_v35 }
 0xbc2   : > { %v6177_v28 = vpop.eup %6176  ;;  %v3747_v14 = vadd.f32 %v8158_v17, %v3746_v50  ;;  %v3700_v1 = vsub.f32 1.0, %v3699_v40  ;;  %vm3813_vm4 = vcmp.eq.f32.partialorder %v3812_v4, 8.507059e+37  ;;  %v3710_v48 = vor.u32 1.1754944e-38, %v3709_v53 }
 0xbc3   : > { %v3789_v39 = vmul.f32 %v6177_v28, %v8172_v44  ;;  %v8207_v41 = vpop.eup %6178  ;;  %v3736_v26 = vsel %vm8209_vm8, %v8156_v56, %v3732_v16  ;;  %vm3794_vm11 = vweird.f32 %v6177_v28  ;;  %6184 = vrcp.f32 %v8215_v59 }
 0xbc4   : > { %v3714_v3 = vmul.f32 %v8207_v41, %v8170_v37  ;;  %v3741_v56 = vsel %vm8197_vm5, %v3740_v11, %v3736_v26  ;;  %v3751_v55 = vsel %vm8234_vm12, %v8158_v17, %v3747_v14  ;;  %v3701_v49 = vmul.f32 %v8181_v60, %v3700_v1  ;;  %vm3795_vm15 = vmor %vm3793_vm10, %vm3794_vm11 }
 0xbc5   : > { %v6181_v23 = vpop.eup %6180  ;;  %v3790_v7 = vsub.f32 1.0, %v3789_v39  ;;  %v4180_v17 = vmul.f32 %v3741_v56, %v8095_v8  ;;  %v3756_v50 = vsel %vm8202_vm7, %v3755_v21, %v3751_v55  ;;  %vm8269_vm5 = vmor %vm3703_vm3, %vm3704_vm13  ;;  %vm3708_vm7 = vcmp.eq.f32.partialorder %v3707_v29, 8.507059e+37 }
 0xbc6   : > { %v3804_v25 = vmul.f32 %v6181_v23, %v8176_v35  ;;  %v6183_v15 = vpop.eup %6182  ;;  %vm3809_vm0 = vweird.f32 %v6181_v23  ;;  %v3715_v47 = vsub.f32 1.0, %v3714_v3  ;;  %v3702_v11 = vadd.f32 %v8181_v60, %v3701_v49 }
 0xbc7   : > { %v3791_v6 = vmul.f32 %v6177_v28, %v3790_v7  ;;  %v8252_v16 = vadd.f32 1.0, %v6183_v15  ;;  %vm3810_vm2 = vmor %vm3808_vm1, %vm3809_vm0  ;;  %v4181_v26 = vmul.f32 %v3756_v50, %v8098_v19  ;;  %v3769_v7 = vand.u32 2147483648, %v8215_v59 }
 0xbc8   : > { %v3805_v45 = vsub.f32 1.0, %v3804_v25  ;;  %v3716_v21 = vmul.f32 %v8207_v41, %v3715_v47  ;;  %v3706_v1 = vsel %vm8269_vm5, %v8181_v60, %v3702_v11  ;;  %v3767_v19 = vand.u32 2147483647, %v8215_v59 }
 0xbc9   : > { %v3792_v34 = vadd.f32 %v6177_v28, %v3791_v6  ;;  %v6185_v9 = vpop.eup %6184  ;;  %6186 = vrcp.f32 %v8252_v16  ;;  %vm3719_vm8 = vweird.f32 %v8207_v41  ;;  %vm3763_vm9 = vweird.f32 %v8215_v59 }
 0xbca   : > { %v3806_v62 = vmul.f32 %v6181_v23, %v3805_v45  ;;  %v3759_v8 = vmul.f32 %v6185_v9, %v8215_v59  ;;  %vm3764_vm6 = vweird.f32 %v6185_v9  ;;  %v3717_v6 = vadd.f32 %v8207_v41, %v3716_v21 }
 0xbcb   : > { %v3796_v43 = vsel %vm3795_vm15, %v6177_v28, %v3792_v34  ;;  %v3815_v28 = vor.u32 1.1754944e-38, %v3814_v22  ;;  %vm3718_vm10 = vweird.f32 %v8170_v37  ;;  %v3724_v53 = vand.u32 2147483648, %v8170_v37  ;;  %vm3765_vm11 = vmor %vm3763_vm9, %vm3764_vm6 }
 0xbcc   : > { %v3801_v44 = vsel %vm8239_vm14, %v3800_v0, %v3796_v43  ;;  %v3807_v40 = vadd.f32 %v6181_v23, %v3806_v62  ;;  %v3770_v20 = vor.u32 1.1754944e-38, %v3769_v7  ;;  %vm8285_vm12 = vmor %vm3718_vm10, %vm3719_vm8  ;;  %v3722_v45 = vand.u32 2147483647, %v8170_v37 }
 0xbcd   : > { %v4184_v39 = vmul.f32 %v3801_v44, %v8123_v51  ;;  %vm3768_vm13 = vcmp.eq.f32.partialorder %v3767_v19, 8.507059e+37  ;;  %v3721_v34 = vsel %vm8285_vm12, %v8207_v41, %v3717_v6  ;;  %v3784_v15 = vand.u32 2147483648, %v8252_v16 }
 0xbce   : > { %v3811_v35 = vsel %vm3810_vm2, %v6181_v23, %v3807_v40  ;;  %v3760_v23 = vsub.f32 1.0, %v3759_v8  ;;  %v3782_v4 = vand.u32 2147483647, %v8252_v16  ;;  %v3725_v47 = vor.u32 1.1754944e-38, %v3724_v53 }
 0xbcf   : > { %v4212_v2 = vpack.c.bf16 %v4184_v39, %v4180_v17  ;;  %v3816_v38 = vsel %vm3813_vm4, %v3815_v28, %v3811_v35  ;;  %v6187_v3 = vpop.eup %6186  ;;  %vm3723_vm15 = vcmp.eq.f32.partialorder %v3722_v45, 8.507059e+37  ;;  %vm3778_vm0 = vweird.f32 %v8252_v16 }
 0xbd0   : > { %v4185_v14 = vmul.f32 %v3816_v38, %v8126_v52  ;;  %v3761_v25 = vmul.f32 %v6185_v9, %v3760_v23  ;;  %v3711_v52 = vsel %vm3708_vm7, %v3710_v48, %v3706_v1  ;;  %v3774_v60 = vmul.f32 %v6187_v3, %v8252_v16 }
 0xbd1   : > { %4552 = vmatmul.bf16.vlgmr.msra.gmra.mxu0 %v4212_v2  ;;  %v4178_v59 = vmul.f32 %v3711_v52, %v8113_v46  ;;  %vm3779_vm14 = vweird.f32 %v6187_v3  ;;  %v3726_v46 = vsel %vm3723_vm15, %v3725_v47, %v3721_v34  ;;  %v3785_v17 = vor.u32 1.1754944e-38, %v3784_v15 }
 0xbd2   : > { %v4213_v33 = vpack.c.bf16 %v4185_v14, %v4181_v26  ;;  %v3762_v56 = vadd.f32 %v6185_v9, %v3761_v25  ;;  %v3775_v49 = vsub.f32 1.0, %v3774_v60  ;;  %vm3780_vm1 = vmor %vm3778_vm0, %vm3779_vm14  ;;  %vm3783_vm2 = vcmp.eq.f32.partialorder %v3782_v4, 8.507059e+37 }
 0xbd3   : > { %v4179_v44 = vmul.f32 %v3726_v46, %v8116_v36 }
 0xbd4   : > { %4581 = vmatmul.bf16.vlgmr.msra.gmra.mxu1 %v4213_v33  ;;  %v3766_v55 = vsel %vm3765_vm11, %v6185_v9, %v3762_v56  ;;  %v3776_v62 = vmul.f32 %v6187_v3, %v3775_v49 }
 0xbd5   : > { %v3771_v22 = vsel %vm3768_vm13, %v3770_v20, %v3766_v55 }
 0xbd6   : > { %v4182_v0 = vmul.f32 %v3771_v22, %v8139_v61  ;;  %v3777_v43 = vadd.f32 %v6187_v3, %v3776_v62 }
 0xbd8   : > { %v4210_v37 = vpack.c.bf16 %v4182_v0, %v4178_v59  ;;  %v3781_v50 = vsel %vm3780_vm1, %v6187_v3, %v3777_v43 }
 0xbd9   : > { %v3786_v41 = vsel %vm3783_vm2, %v3785_v17, %v3781_v50 }
 0xbda   : > { %4494 = vmatmul.bf16.vlgmr.msrb.gmra.mxu2 %v4210_v37  ;;  %v4183_v61 = vmul.f32 %v3786_v41, %v8164_v31 }
 0xbdc   : > { %v4211_v40 = vpack.c.bf16 %v4183_v61, %v4179_v44 }
 0xbde   : > { %4523 = vmatmul.bf16.vlgmr.msra.gmra.mxu3 %v4211_v40 }
 0xbf8   : > { %v3494_v9 = vpop.f32.mrf.mxu0  ;;  %v3523_v11 = vpop.f32.mrf.mxu1 }
 0xbf9   : > { %v8301_v39 = vadd.f32 %v3494_v9, %v8088_v42  ;;  %v8304_v16 = vadd.f32 %v3523_v11, %v8090_v10 }
 0xbfb   : > { %v5528_v28 = vmul.f32 -1.702, %v8301_v39  ;;  %v5529_v35 = vmul.f32 -1.702, %v8304_v16 }
 0xbfd   : > { %v3622_v8 = vmul.f32 1.442695, %v5528_v28  ;;  %v3624_v29 = vmul.f32 1.442695, %v5529_v35  ;;  %v3436_v21 = vpop.f32.mrf.mxu2  ;;  %v3465_v36 = vpop.f32.mrf.mxu3 }
 0xbfe   : > { %v8309_v31 = vadd.f32 %v3436_v21, %v8102_v58  ;;  %v8312_v2 = vadd.f32 %v3465_v36, %v8104_v32 }
 0xbff   : > { %6188 = vpow2.f32 %v3622_v8 }
 0xc00   : > { %6190 = vpow2.f32 %v3624_v29  ;;  %v5526_v38 = vmul.f32 -1.702, %v8309_v31  ;;  %v5527_v26 = vmul.f32 -1.702, %v8312_v2  ;;  %v3496_v51 = vpop.f32.mrf.mxu0  ;;  %v3525_v14 = vpop.f32.mrf.mxu1 }
 0xc01   : > { %v8317_v23 = vadd.f32 %v3496_v51, %v8088_v42  ;;  %v8320_v1 = vadd.f32 %v3525_v14, %v8090_v10 }
 0xc02   : > { %v3618_v48 = vmul.f32 1.442695, %v5526_v38  ;;  %v3620_v7 = vmul.f32 1.442695, %v5527_v26 }
 0xc03   : > { %v5532_v33 = vmul.f32 -1.702, %v8317_v23  ;;  %v5533_v25 = vmul.f32 -1.702, %v8320_v1 }
 0xc04   : > { %6192 = vpow2.f32 %v3618_v48 }
 0xc05   : > { %v6189_v19 = vpop.eup %6188  ;;  %6194 = vpow2.f32 %v3620_v7  ;;  %v3630_v3 = vmul.f32 1.442695, %v5532_v33  ;;  %v3438_v6 = vpop.f32.mrf.mxu2  ;;  %v3632_v60 = vmul.f32 1.442695, %v5533_v25 }
 0xc06   : > { %v6191_v52 = vpop.eup %6190  ;;  %v8324_v56 = vadd.f32 1.0, %v6189_v19  ;;  %v8327_v53 = vadd.f32 %v3438_v6, %v8102_v58  ;;  %v3467_v34 = vpop.f32.mrf.mxu3 }
 0xc07   : > { %v8329_v20 = vadd.f32 1.0, %v6191_v52  ;;  %6196 = vpow2.f32 %v3630_v3  ;;  %v8343_v62 = vadd.f32 %v3467_v34, %v8104_v32 }
 0xc08   : > { %6198 = vrcp.f32 %v8324_v56  ;;  %v5530_v45 = vmul.f32 -1.702, %v8327_v53  ;;  %v3859_v28 = vand.u32 2147483648, %v8324_v56  ;;  %vm3853_vm3 = vweird.f32 %v8324_v56 }
 0xc09   : > { %6200 = vpow2.f32 %v3632_v60  ;;  %v5531_v41 = vmul.f32 -1.702, %v8343_v62  ;;  %v3874_v35 = vand.u32 2147483648, %v8329_v20  ;;  %v3857_v14 = vand.u32 2147483647, %v8324_v56 }
 0xc0a   : > { %v6193_v5 = vpop.eup %6192  ;;  %6202 = vrcp.f32 %v8329_v20  ;;  %v3626_v15 = vmul.f32 1.442695, %v5530_v45  ;;  %v3499_v43 = vpop.f32.mrf.mxu0  ;;  %v3872_v48 = vand.u32 2147483647, %v8329_v20  ;;  %v8380_v25 = vor.u32 1.1754944e-38, %v3859_v28 }
 0xc0b   : > { %v6195_v55 = vpop.eup %6194  ;;  %v8334_v49 = vadd.f32 1.0, %v6193_v5  ;;  %v8360_v61 = vadd.f32 %v3499_v43, %v8088_v42  ;;  %v3528_v11 = vpop.f32.mrf.mxu1  ;;  %v3628_v29 = vmul.f32 1.442695, %v5531_v41  ;;  %vm3868_vm4 = vweird.f32 %v8329_v20 }
 0xc0c   : > { %v8336_v59 = vadd.f32 1.0, %v6195_v55  ;;  %v8373_v51 = vadd.f32 %v3528_v11, %v8090_v10  ;;  %v8383_v19 = vor.u32 1.1754944e-38, %v3874_v35  ;;  %vm8396_vm6 = vcmp.eq.f32.partialorder %v3857_v14, 8.507059e+37 }
 0xc0d   : > { %6204 = vrcp.f32 %v8334_v49  ;;  %v6197_v22 = vpop.eup %6196  ;;  %v5536_v26 = vmul.f32 -1.702, %v8360_v61  ;;  %v3827_v3 = vand.u32 2147483647, %v8334_v49  ;;  %v3829_v6 = vand.u32 2147483648, %v8334_v49 }
 0xc0e   : > { %v8339_v0 = vpop.eup %6198  ;;  %6206 = vrcp.f32 %v8336_v59  ;;  %v8347_v37 = vadd.f32 1.0, %v6197_v22  ;;  %vm3823_vm5 = vweird.f32 %v8334_v49  ;;  %v3842_v5 = vand.u32 2147483647, %v8336_v59 }
 0xc0f   : > { %v6201_v4 = vpop.eup %6200  ;;  %6208 = vpow2.f32 %v3626_v15  ;;  %v3849_v50 = vmul.f32 %v8339_v0, %v8324_v56  ;;  %v3441_v52 = vpop.f32.mrf.mxu2  ;;  %v3638_v15 = vmul.f32 1.442695, %v5536_v26  ;;  %v3844_v41 = vand.u32 2147483648, %v8336_v59 }
 0xc10   : > { %v8345_v47 = vpop.eup %6202  ;;  %v8349_v46 = vadd.f32 1.0, %v6201_v4  ;;  %6210 = vrcp.f32 %v8347_v37  ;;  %v5537_v4 = vmul.f32 -1.702, %v8373_v51  ;;  %vm3854_vm7 = vweird.f32 %v8339_v0  ;;  %v3470_v35 = vpop.f32.mrf.mxu3 }
 0xc11   : > { %v3864_v44 = vmul.f32 %v8345_v47, %v8329_v20  ;;  %v3850_v8 = vsub.f32 1.0, %v3849_v50  ;;  %vm3869_vm8 = vweird.f32 %v8345_v47  ;;  %vm8409_vm9 = vcmp.eq.f32.partialorder %v3872_v48, 8.507059e+37  ;;  %vm8435_vm13 = vmor %vm3853_vm3, %vm3854_vm7 }
 0xc12   : > { %6212 = vrcp.f32 %v8349_v46  ;;  %v3830_v28 = vor.u32 1.1754944e-38, %v3829_v6  ;;  %vm8415_vm11 = vcmp.eq.f32.partialorder %v3827_v3, 8.507059e+37  ;;  %vm3838_vm12 = vweird.f32 %v8336_v59  ;;  %vm8449_vm14 = vmor %vm3868_vm4, %vm3869_vm8 }
 0xc13   : > { %v8351_v17 = vpop.eup %6204  ;;  %v3865_v36 = vsub.f32 1.0, %v3864_v44  ;;  %v3851_v60 = vmul.f32 %v8339_v0, %v3850_v8  ;;  %6214 = vpow2.f32 %v3628_v29  ;;  %v3640_v14 = vmul.f32 1.442695, %v5537_v4 }
 0xc14   : > { %v8362_v40 = vpop.eup %6206  ;;  %v3819_v9 = vmul.f32 %v8351_v17, %v8334_v49  ;;  %vm3824_vm10 = vweird.f32 %v8351_v17  ;;  %vm8466_vm1 = vcmp.eq.f32.partialorder %v3842_v5, 8.507059e+37  ;;  %vm3913_vm2 = vweird.f32 %v8347_v37  ;;  %v3501_v5 = vpop.f32.mrf.mxu0 }
 0xc15   : > { %v6209_v21 = vpop.eup %6208  ;;  %v3834_v38 = vmul.f32 %v8362_v40, %v8336_v59  ;;  %v3866_v34 = vmul.f32 %v8345_v47, %v3865_v36  ;;  %v3852_v8 = vadd.f32 %v8339_v0, %v3851_v60  ;;  %vm8461_vm15 = vmor %vm3823_vm5, %vm3824_vm10  ;;  %vm3839_vm0 = vweird.f32 %v8362_v40 }
 0xc16   : > { %v3820_v7 = vsub.f32 1.0, %v3819_v9  ;;  %v8378_v33 = vpop.eup %6210  ;;  %v8390_v45 = vadd.f32 1.0, %v6209_v21  ;;  %v8405_v9 = vadd.f32 %v3441_v52, %v8102_v58  ;;  %v3919_v21 = vand.u32 2147483648, %v8347_v37  ;;  %vm8499_vm4 = vmor %vm3838_vm12, %vm3839_vm0 }
 0xc17   : > { %v3835_v22 = vsub.f32 1.0, %v3834_v38  ;;  %v3909_v44 = vmul.f32 %v8378_v33, %v8347_v37  ;;  %v3867_v38 = vadd.f32 %v8345_v47, %v3866_v34  ;;  %v8429_v52 = vadd.f32 %v3470_v35, %v8104_v32 }
 0xc18   : > { %v8392_v55 = vpop.eup %6212  ;;  %v3821_v50 = vmul.f32 %v8351_v17, %v3820_v7  ;;  %6216 = vrcp.f32 %v8390_v45  ;;  %v5534_v6 = vmul.f32 -1.702, %v8405_v9  ;;  %v3845_v34 = vor.u32 1.1754944e-38, %v3844_v41 }
 0xc19   : > { %v3924_v36 = vmul.f32 %v8392_v55, %v8349_v46  ;;  %v3836_v26 = vmul.f32 %v8362_v40, %v3835_v22  ;;  %6218 = vpow2.f32 %v3638_v15  ;;  %v6215_v48 = vpop.eup %6214  ;;  %v3910_v3 = vsub.f32 1.0, %v3909_v44 }
 0xc1a   : > { %v3822_v7 = vadd.f32 %v8351_v17, %v3821_v50  ;;  %v3917_v22 = vand.u32 2147483647, %v8347_v37  ;;  %v8440_v15 = vadd.f32 1.0, %v6215_v48  ;;  %6220 = vpow2.f32 %v3640_v14  ;;  %v3530_v14 = vpop.f32.mrf.mxu1 }
 0xc1b   : > { %v3856_v4 = vsel %vm8435_vm13, %v8339_v0, %v3852_v8  ;;  %v3925_v50 = vsub.f32 1.0, %v3924_v36  ;;  %v3634_v44 = vmul.f32 1.442695, %v5534_v6  ;;  %v5535_v41 = vmul.f32 -1.702, %v8429_v52 }
 0xc1c   : > { %v3871_v35 = vsel %vm8449_vm14, %v8345_v47, %v3867_v38  ;;  %v8471_v8 = vor.u32 1.1754944e-38, %v3919_v21  ;;  %6222 = vrcp.f32 %v8440_v15  ;;  %v3826_v49 = vsel %vm8461_vm15, %v8351_v17, %v3822_v7 }
 0xc1d   : > { %v3837_v36 = vadd.f32 %v8362_v40, %v3836_v26  ;;  %v3911_v38 = vmul.f32 %v8378_v33, %v3910_v3  ;;  %vm3928_vm3 = vweird.f32 %v8349_v46  ;;  %v3861_v21 = vsel %vm8396_vm6, %v8380_v25, %v3856_v4 }
 0xc1e   : > { %v8474_v47 = vpop.eup %6216  ;;  %v3932_v6 = vand.u32 2147483647, %v8349_v46  ;;  %6224 = vpow2.f32 %v3634_v44  ;;  %v3636_v60 = vmul.f32 1.442695, %v5535_v41  ;;  %v3876_v17 = vsel %vm8409_vm9, %v8383_v19, %v3871_v35 }
 0xc1f   : > { %v6219_v48 = vpop.eup %6218  ;;  %v3926_v26 = vmul.f32 %v8392_v55, %v3925_v50  ;;  %v3934_v7 = vand.u32 2147483648, %v8349_v46  ;;  %v3831_v0 = vsel %vm8415_vm11, %v3830_v28, %v3826_v49  ;;  %vm3914_vm5 = vweird.f32 %v8378_v33  ;;  %v3443_v49 = vpop.f32.mrf.mxu2 }
 0xc20   : > { %v8491_v3 = vadd.f32 1.0, %v6219_v48  ;;  %v6221_v56 = vpop.eup %6220  ;;  %vm8504_vm6 = vcmp.eq.f32.partialorder %v3917_v22, 8.507059e+37  ;;  %v8509_v43 = vadd.f32 %v3501_v5, %v8088_v42  ;;  %v8512_v11 = vadd.f32 %v3530_v14, %v8090_v10  ;;  %vm8551_vm9 = vmor %vm3913_vm2, %vm3914_vm5 }
 0xc21   : > { %v3841_v59 = vsel %vm8499_vm4, %v8362_v40, %v3837_v36  ;;  %v3912_v28 = vadd.f32 %v8378_v33, %v3911_v38  ;;  %v3879_v29 = vmul.f32 %v8474_v47, %v8390_v45  ;;  %v8523_v4 = vadd.f32 1.0, %v6221_v56 }
 0xc22   : > { %6226 = vrcp.f32 %v8491_v3  ;;  %v8521_v22 = vpop.eup %6222  ;;  %v5540_v50 = vmul.f32 -1.702, %v8509_v43  ;;  %v5541_v44 = vmul.f32 -1.702, %v8512_v11  ;;  %v8528_v41 = vmul.f32 %v3861_v21, %v8301_v39 }
 0xc23   : > { %6228 = vpow2.f32 %v3636_v60  ;;  %v3927_v40 = vadd.f32 %v8392_v55, %v3926_v26  ;;  %vm3929_vm7 = vweird.f32 %v8392_v55  ;;  %v3894_v35 = vmul.f32 %v8521_v22, %v8440_v15 }
 0xc24   : > { %v6225_v36 = vpop.eup %6224  ;;  %v8535_v38 = vmul.f32 %v3876_v17, %v8304_v16  ;;  %vm8537_vm8 = vcmp.eq.f32.partialorder %v3932_v6, 8.507059e+37  ;;  %v3935_v14 = vor.u32 1.1754944e-38, %v3934_v7  ;;  %6230 = vrcp.f32 %v8523_v4  ;;  %vm8562_vm10 = vmor %vm3928_vm3, %vm3929_vm7 }
 0xc25   : > { %v8543_v39 = vmul.f32 %v3831_v0, %v8309_v31  ;;  %v3846_v48 = vsel %vm8466_vm1, %v3845_v34, %v3841_v59  ;;  %v3880_v21 = vsub.f32 1.0, %v3879_v29  ;;  %v8555_v6 = vadd.f32 1.0, %v6225_v36 }
 0xc26   : > { %v3916_v60 = vsel %vm8551_vm9, %v8378_v33, %v3912_v28  ;;  %v3646_v34 = vmul.f32 1.442695, %v5540_v50  ;;  %v3648_v20 = vmul.f32 1.442695, %v5541_v44  ;;  %v8567_v37 = vadd.f32 %v3443_v49, %v8102_v58 }
 0xc27   : > { %v3931_v26 = vsel %vm8562_vm10, %v8392_v55, %v3927_v40  ;;  %v3889_v7 = vand.u32 2147483648, %v8390_v45  ;;  %v3895_v33 = vsub.f32 1.0, %v3894_v35  ;;  %6232 = vrcp.f32 %v8555_v6 }
 0xc28   : > { %v8569_v17 = vpop.eup %6226  ;;  %v8577_v56 = vmul.f32 %v3846_v48, %v8312_v2  ;;  %vm3883_vm11 = vweird.f32 %v8390_v45  ;;  %v3887_v0 = vand.u32 2147483647, %v8390_v45  ;;  %v3921_v55 = vsel %vm8504_vm6, %v8471_v8, %v3916_v60 }
 0xc29   : > { %v6229_v46 = vpop.eup %6228  ;;  %v3969_v25 = vmul.f32 %v8569_v17, %v8491_v3  ;;  %v3881_v59 = vmul.f32 %v8474_v47, %v3880_v21  ;;  %v3902_v28 = vand.u32 2147483647, %v8440_v15  ;;  %6234 = vpow2.f32 %v3646_v34 }
 0xc2a   : > { %v8588_v29 = vpop.eup %6230  ;;  %v3936_v2 = vsel %vm8537_vm8, %v3935_v14, %v3931_v26  ;;  %6236 = vpow2.f32 %v3648_v20  ;;  %v5538_v44 = vmul.f32 -1.702, %v8567_v37  ;;  %v3890_v40 = vor.u32 1.1754944e-38, %v3889_v7  ;;  %v3472_v14 = vpop.f32.mrf.mxu3 }
 0xc2b   : > { %v3970_v50 = vsub.f32 1.0, %v3969_v25  ;;  %v3896_v35 = vmul.f32 %v8521_v22, %v3895_v33  ;;  %v3984_v8 = vmul.f32 %v8588_v29, %v8523_v4  ;;  %v8596_v19 = vadd.f32 1.0, %v6229_v46 }
 0xc2c   : > { %v8599_v49 = vmul.f32 %v3921_v55, %v8317_v23  ;;  %vm3884_vm12 = vweird.f32 %v8474_v47  ;;  %vm8602_vm13 = vcmp.eq.f32.partialorder %v3887_v0, 8.507059e+37  ;;  %vm3898_vm14 = vweird.f32 %v8440_v15 }
 0xc2d   : > { %v3904_v5 = vand.u32 2147483648, %v8440_v15  ;;  %v8608_v48 = vpop.eup %6232  ;;  %v8611_v16 = vmul.f32 %v3936_v2, %v8320_v1  ;;  %v3882_v21 = vadd.f32 %v8474_v47, %v3881_v59  ;;  %vm8614_vm15 = vcmp.eq.f32.partialorder %v3902_v28, 8.507059e+37  ;;  %vm8632_vm1 = vmor %vm3883_vm11, %vm3884_vm12 }
 0xc2e   : > { %v3977_v60 = vand.u32 2147483647, %v8491_v3  ;;  %vm3899_vm0 = vweird.f32 %v8521_v22  ;;  %v3971_v31 = vmul.f32 %v8569_v17, %v3970_v50  ;;  %v3985_v34 = vsub.f32 1.0, %v3984_v8 }
 0xc2f   : > { %v3642_v20 = vmul.f32 1.442695, %v5538_v44  ;;  %v6235_v26 = vpop.eup %6234  ;;  %v3897_v7 = vadd.f32 %v8521_v22, %v3896_v35  ;;  %v3939_v1 = vmul.f32 %v8608_v48, %v8555_v6  ;;  %6238 = vrcp.f32 %v8596_v19  ;;  %vm8650_vm3 = vmor %vm3898_vm14, %vm3899_vm0 }
 0xc30   : > { %v8626_v33 = vadd.f32 %v3472_v14, %v8104_v32  ;;  %v6237_v46 = vpop.eup %6236  ;;  %v3905_v25 = vor.u32 1.1754944e-38, %v3904_v5  ;;  %v3979_v55 = vand.u32 2147483648, %v8491_v3  ;;  %v8637_v59 = vadd.f32 1.0, %v6235_v26 }
 0xc31   : > { %6240 = vpow2.f32 %v3642_v20  ;;  %v3886_v28 = vsel %vm8632_vm1, %v8474_v47, %v3882_v21  ;;  %vm3973_vm2 = vweird.f32 %v8491_v3  ;;  %v3992_v2 = vand.u32 2147483647, %v8523_v4 }
 0xc32   : > { %v8644_v50 = vadd.f32 1.0, %v6237_v46  ;;  %v3972_v44 = vadd.f32 %v8569_v17, %v3971_v31  ;;  %vm3974_vm4 = vweird.f32 %v8569_v17  ;;  %v3986_v47 = vmul.f32 %v8588_v29, %v3985_v34 }
 0xc33   : > { %6242 = vrcp.f32 %v8637_v59  ;;  %v3901_v35 = vsel %vm8650_vm3, %v8521_v22, %v3897_v7  ;;  %vm8661_vm5 = vcmp.eq.f32.partialorder %v3977_v60, 8.507059e+37  ;;  %v3940_v15 = vsub.f32 1.0, %v3939_v1  ;;  %vm8675_vm7 = vmor %vm3973_vm2, %vm3974_vm4  ;;  %v3504_v7 = vpop.f32.mrf.mxu0  ;;  %v3446_v22 = vpop.f32.mrf.mxu2 }
 0xc34   : > { %v5539_v5 = vmul.f32 -1.702, %v8626_v33  ;;  %v3980_v14 = vor.u32 1.1754944e-38, %v3979_v55  ;;  %vm3988_vm6 = vweird.f32 %v8523_v4  ;;  %v3994_v21 = vand.u32 2147483648, %v8523_v4 }
 0xc35   : > { %6244 = vrcp.f32 %v8644_v50  ;;  %v8669_v31 = vpop.eup %6238  ;;  %v3891_v34 = vsel %vm8602_vm13, %v3890_v40, %v3886_v28  ;;  %vm8679_vm8 = vcmp.eq.f32.partialorder %v3992_v2, 8.507059e+37  ;;  %v3947_v20 = vand.u32 2147483647, %v8555_v6 }
 0xc36   : > { %v3949_v26 = vand.u32 2147483648, %v8555_v6  ;;  %v3906_v36 = vsel %vm8614_vm15, %v3905_v25, %v3901_v35  ;;  %v3976_v3 = vsel %vm8675_vm7, %v8569_v17, %v3972_v44  ;;  %v3987_v40 = vadd.f32 %v8588_v29, %v3986_v47 }
 0xc37   : > { %v6241_v1 = vpop.eup %6240  ;;  %vm3989_vm9 = vweird.f32 %v8588_v29  ;;  %v3941_v46 = vmul.f32 %v8608_v48, %v3940_v15  ;;  %v3964_v0 = vand.u32 2147483648, %v8596_v19  ;;  %v3644_v28 = vmul.f32 1.442695, %v5539_v5 }
 0xc38   : > { %v8694_v55 = vadd.f32 1.0, %v6241_v1  ;;  %v8699_v23 = vmul.f32 %v3891_v34, %v8327_v53  ;;  %v3995_v25 = vor.u32 1.1754944e-38, %v3994_v21  ;;  %v3954_v17 = vmul.f32 %v8669_v31, %v8596_v19  ;;  %vm8710_vm10 = vmor %vm3988_vm6, %vm3989_vm9 }
 0xc39   : > { %v8696_v2 = vpop.eup %6242  ;;  %v8704_v45 = vadd.f32 %v3504_v7, %v8088_v42  ;;  %v3981_v44 = vsel %vm8661_vm5, %v3980_v14, %v3976_v3  ;;  %vm3943_vm11 = vweird.f32 %v8555_v6  ;;  %v3950_v53 = vor.u32 1.1754944e-38, %v3949_v26  ;;  %v3533_v14 = vpop.f32.mrf.mxu1 }
 0xc3a   : > { %6246 = vrcp.f32 %v8694_v55  ;;  %v8719_v15 = vmul.f32 %v3906_v36, %v8343_v62  ;;  %v3991_v8 = vsel %vm8710_vm10, %v8588_v29, %v3987_v40  ;;  %vm8724_vm12 = vcmp.eq.f32.partialorder %v3947_v20, 8.507059e+37  ;;  %v3475_v26 = vpop.f32.mrf.mxu3 }
 0xc3b   : > { %v8716_v35 = vpop.eup %6244  ;;  %v3962_v5 = vand.u32 2147483647, %v8596_v19  ;;  %6248 = vpow2.f32 %v3644_v28  ;;  %v3942_v21 = vadd.f32 %v8608_v48, %v3941_v46  ;;  %vm3944_vm13 = vweird.f32 %v8608_v48 }
 0xc3c   : > { %v8731_v34 = vor.u32 1.1754944e-38, %v3964_v0  ;;  %v4029_v62 = vmul.f32 %v8696_v2, %v8637_v59  ;;  %v8736_v29 = vmul.f32 %v3981_v44, %v8360_v61  ;;  %v3955_v20 = vsub.f32 1.0, %v3954_v17  ;;  %vm8750_vm15 = vmor %vm3943_vm11, %vm3944_vm13 }
 0xc3d   : > { %v4044_v7 = vmul.f32 %v8716_v35, %v8644_v50  ;;  %v5544_v1 = vmul.f32 -1.702, %v8704_v45  ;;  %v3996_v36 = vsel %vm8679_vm8, %v3995_v25, %v3991_v8  ;;  %vm3959_vm14 = vweird.f32 %v8669_v31 }
 0xc3e   : > { %v4039_v3 = vand.u32 2147483648, %v8637_v59  ;;  %v8746_v40 = vadd.f32 %v3533_v14, %v8090_v10  ;;  %v8755_v0 = vadd.f32 %v3446_v22, %v8102_v58  ;;  %v8758_v60 = vadd.f32 %v3475_v26, %v8104_v32 }
 0xc3f   : > { %v3654_v46 = vmul.f32 1.442695, %v5544_v1  ;;  %v4216_v28 = vpack.c.bf16 %v8599_v49, %v8528_v41  ;;  %v3946_v6 = vsel %vm8750_vm15, %v8608_v48, %v3942_v21  ;;  %vm3958_vm0 = vweird.f32 %v8596_v19 }
 0xc40   : > { %v8762_v25 = vpop.eup %6246  ;;  %v4030_v17 = vsub.f32 1.0, %v4029_v62  ;;  %v5545_v44 = vmul.f32 -1.702, %v8746_v40  ;;  %v4217_v47 = vpack.c.bf16 %v8611_v16, %v8535_v38  ;;  %v3956_v14 = vmul.f32 %v8669_v31, %v3955_v20  ;;  %v3506_v20 = vpop.f32.mrf.mxu0  ;;  %vm8823_vm8 = vmor %vm3958_vm0, %vm3959_vm14 }
 0xc41   : > { %v6249_v8 = vpop.eup %6248  ;;  %v4045_v22 = vsub.f32 1.0, %v4044_v7  ;;  %6250 = vpow2.f32 %v3654_v46  ;;  %v5542_v41 = vmul.f32 -1.702, %v8755_v0  ;;  %4557 = vmatmul.bf16.gmra.mxu0 %v4216_v28  ;;  %vm4033_vm1 = vweird.f32 %v8637_v59 }
 0xc42   : > { %v4037_v49 = vand.u32 2147483647, %v8637_v59  ;;  %v3999_v48 = vmul.f32 %v8762_v25, %v8694_v55  ;;  %v8777_v21 = vadd.f32 1.0, %v6249_v8  ;;  %v3656_v62 = vmul.f32 1.442695, %v5545_v44  ;;  %4586 = vmatmul.bf16.gmra.mxu1 %v4217_v47  ;;  %v3535_v47 = vpop.f32.mrf.mxu1 }
 0xc43   : > { %v8780_v38 = vmul.f32 %v3996_v36, %v8373_v51  ;;  %vm4048_vm2 = vweird.f32 %v8644_v50  ;;  %v3650_v16 = vmul.f32 1.442695, %v5542_v41  ;;  %v5543_v26 = vmul.f32 -1.702, %v8758_v60 }
 0xc44   : > { %v3951_v7 = vsel %vm8724_vm12, %v3950_v53, %v3946_v6  ;;  %vm8786_vm3 = vcmp.eq.f32.partialorder %v3962_v5, 8.507059e+37  ;;  %v4031_v61 = vmul.f32 %v8696_v2, %v4030_v17  ;;  %v4052_v46 = vand.u32 2147483647, %v8644_v50 }
 0xc45   : > { %6252 = vrcp.f32 %v8777_v21  ;;  %v3957_v51 = vadd.f32 %v8669_v31, %v3956_v14  ;;  %v4040_v36 = vor.u32 1.1754944e-38, %v4039_v3  ;;  %v4046_v28 = vmul.f32 %v8716_v35, %v4045_v22 }
 0xc46   : > { %v4054_v44 = vand.u32 2147483648, %v8644_v50  ;;  %vm8796_vm4 = vcmp.eq.f32.partialorder %v4037_v49, 8.507059e+37  ;;  %v4000_v4 = vsub.f32 1.0, %v3999_v48  ;;  %6254 = vpow2.f32 %v3656_v62 }
 0xc47   : > { %v3652_v5 = vmul.f32 1.442695, %v5543_v26  ;;  %v8801_v6 = vadd.f32 %v3506_v20, %v8088_v42  ;;  %v6251_v17 = vpop.eup %6250  ;;  %v8804_v8 = vmul.f32 %v3951_v7, %v8405_v9  ;;  %vm4034_vm5 = vweird.f32 %v8696_v2  ;;  %v3448_v9 = vpop.f32.mrf.mxu2 }
 0xc48   : > { %vm4049_vm6 = vweird.f32 %v8716_v35  ;;  %6256 = vpow2.f32 %v3650_v16  ;;  %v4032_v3 = vadd.f32 %v8696_v2, %v4031_v61  ;;  %vm8809_vm7 = vcmp.eq.f32.partialorder %v4052_v46, 8.507059e+37  ;;  %vm8843_vm9 = vmor %vm4033_vm1, %vm4034_vm5 }
 0xc49   : > { %v8813_v22 = vadd.f32 1.0, %v6251_v17  ;;  %v5548_v42 = vmul.f32 -1.702, %v8801_v6  ;;  %v8817_v41 = vadd.f32 %v3535_v47, %v8090_v10  ;;  %v4047_v48 = vadd.f32 %v8716_v35, %v4046_v28  ;;  %vm8861_vm11 = vmor %vm4048_vm2, %vm4049_vm6 }
 0xc4a   : > { %6258 = vpow2.f32 %v3652_v5  ;;  %v4214_v62 = vpack.c.bf16 %v8699_v23, %v8543_v39  ;;  %v4215_v16 = vpack.c.bf16 %v8719_v15, %v8577_v56  ;;  %v3961_v26 = vsel %vm8823_vm8, %v8669_v31, %v3957_v51  ;;  %v3477_v5 = vpop.f32.mrf.mxu3 }
 0xc4b   : > { %v8832_v10 = vpop.eup %6252  ;;  %v4055_v19 = vor.u32 1.1754944e-38, %v4054_v44  ;;  %v4001_v20 = vmul.f32 %v8762_v25, %v4000_v4  ;;  %6260 = vrcp.f32 %v8813_v22  ;;  %vm4003_vm10 = vweird.f32 %v8694_v55 }
 0xc4c   : > { %v4007_v56 = vand.u32 2147483647, %v8694_v55  ;;  %v4014_v31 = vmul.f32 %v8832_v10, %v8777_v21  ;;  %4499 = vmatmul.bf16.gmra.mxu2 %v4214_v62  ;;  %4528 = vmatmul.bf16.gmra.mxu3 %v4215_v16  ;;  %v8852_v23 = vadd.f32 %v3448_v9, %v8102_v58  ;;  %v6255_v15 = vpop.eup %6254  ;;  %v4036_v59 = vsel %vm8843_vm9, %v8696_v2, %v4032_v3 }
 0xc4d   : > { %v4009_v61 = vand.u32 2147483648, %v8694_v55  ;;  %v3662_v46 = vmul.f32 1.442695, %v5548_v42  ;;  %v5549_v51 = vmul.f32 -1.702, %v8817_v41  ;;  %v3966_v28 = vsel %vm8786_vm3, %v8731_v34, %v3961_v26 }
 0xc4e   : > { %v6257_v58 = vpop.eup %6256  ;;  %v4051_v2 = vsel %vm8861_vm11, %v8716_v35, %v4047_v48  ;;  %vm4004_vm12 = vweird.f32 %v8762_v25  ;;  %v8874_v50 = vadd.f32 1.0, %v6255_v15  ;;  %v4002_v44 = vadd.f32 %v8762_v25, %v4001_v20 }
 0xc4f   : > { %v4015_v47 = vsub.f32 1.0, %v4014_v31  ;;  %v8877_v4 = vadd.f32 1.0, %v6257_v58  ;;  %6262 = vpow2.f32 %v3662_v46  ;;  %v4041_v1 = vsel %vm8796_vm4, %v4040_v36, %v4036_v59  ;;  %vm8900_vm14 = vmor %vm4003_vm10, %vm4004_vm12 }
 0xc50   : > { %v6259_v17 = vpop.eup %6258  ;;  %6264 = vrcp.f32 %v8874_v50  ;;  %v3664_v34 = vmul.f32 1.442695, %v5549_v51  ;;  %v5546_v35 = vmul.f32 -1.702, %v8852_v23  ;;  %vm8885_vm13 = vcmp.eq.f32.partialorder %v4007_v56, 8.507059e+37 }
 0xc51   : > { %v8883_v3 = vpop.eup %6260  ;;  %v4010_v9 = vor.u32 1.1754944e-38, %v4009_v61  ;;  %v4022_v49 = vand.u32 2147483647, %v8777_v21  ;;  %6266 = vrcp.f32 %v8877_v4  ;;  %v8892_v48 = vmul.f32 %v3966_v28, %v8429_v52 }
 0xc52   : > { %v4056_v36 = vsel %vm8809_vm7, %v4055_v19, %v4051_v2  ;;  %v4089_v62 = vmul.f32 %v8883_v3, %v8813_v22  ;;  %v8907_v16 = vadd.f32 %v3477_v5, %v8104_v32  ;;  %v8910_v52 = vmul.f32 %v4041_v1, %v8509_v43 }
 0xc53   : > { %v4006_v14 = vsel %vm8900_vm14, %v8762_v25, %v4002_v44  ;;  %v4016_v26 = vmul.f32 %v8832_v10, %v4015_v47  ;;  %v8916_v55 = vadd.f32 1.0, %v6259_v17  ;;  %v4024_v19 = vand.u32 2147483648, %v8777_v21 }
 0xc54   : > { %v4090_v20 = vsub.f32 1.0, %v4089_v62  ;;  %6268 = vpow2.f32 %v3664_v34  ;;  %v3658_v39 = vmul.f32 1.442695, %v5546_v35  ;;  %v8920_v32 = vmul.f32 %v4056_v36, %v8512_v11 }
 0xc55   : > { %v6263_v56 = vpop.eup %6262  ;;  %vm4018_vm15 = vweird.f32 %v8777_v21  ;;  %vm8923_vm0 = vcmp.eq.f32.partialorder %v4022_v49, 8.507059e+37  ;;  %6270 = vrcp.f32 %v8916_v55  ;;  %v4011_v31 = vsel %vm8885_vm13, %v4010_v9, %v4006_v14 }
 0xc56   : > { %v8928_v25 = vpop.eup %6264  ;;  %vm4019_vm1 = vweird.f32 %v8832_v10  ;;  %v4091_v15 = vmul.f32 %v8883_v3, %v4090_v20  ;;  %v5547_v11 = vmul.f32 -1.702, %v8907_v16  ;;  %v4017_v7 = vadd.f32 %v8832_v10, %v4016_v26 }
 0xc57   : > { %v8935_v59 = vpop.eup %6266  ;;  %v4104_v61 = vmul.f32 %v8928_v25, %v8874_v50  ;;  %v8940_v46 = vadd.f32 1.0, %v6263_v56  ;;  %6272 = vpow2.f32 %v3658_v39  ;;  %v4025_v51 = vor.u32 1.1754944e-38, %v4024_v19  ;;  %vm8956_vm3 = vmor %vm4018_vm15, %vm4019_vm1 }
 0xc58   : > { %vm4094_vm2 = vweird.f32 %v8883_v3  ;;  %v4097_v58 = vand.u32 2147483647, %v8813_v22  ;;  %v4099_v28 = vand.u32 2147483648, %v8813_v22  ;;  %v4092_v2 = vadd.f32 %v8883_v3, %v4091_v15 }
 0xc59   : > { %v4105_v44 = vsub.f32 1.0, %v4104_v61  ;;  %v4059_v47 = vmul.f32 %v8935_v59, %v8877_v4  ;;  %6274 = vrcp.f32 %v8940_v46  ;;  %v8950_v17 = vmul.f32 %v4011_v31, %v8567_v37 }
 0xc5a   : > { %v6269_v5 = vpop.eup %6268  ;;  %vm4093_vm4 = vweird.f32 %v8813_v22  ;;  %v4112_v34 = vand.u32 2147483647, %v8874_v50  ;;  %v4114_v35 = vand.u32 2147483648, %v8874_v50  ;;  %v4021_v37 = vsel %vm8956_vm3, %v8832_v10, %v4017_v7  ;;  %v4553_v22 = vpop.f32.mrf.mxu0 }
 0xc5b   : > { %v8963_v42 = vpop.eup %6270  ;;  %v4106_v9 = vmul.f32 %v8928_v25, %v4105_v44  ;;  %v8969_v49 = vadd.f32 1.0, %v6269_v5  ;;  %v3660_v21 = vmul.f32 1.442695, %v5547_v11  ;;  %vm8973_vm5 = vmor %vm4093_vm4, %vm4094_vm2  ;;  %vm8977_vm6 = vcmp.eq.f32.partialorder %v4097_v58, 8.507059e+37 }
 0xc5c   : > { %v4100_v53 = vor.u32 1.1754944e-38, %v4099_v28  ;;  %vm4108_vm7 = vweird.f32 %v8874_v50  ;;  %v4069_v10 = vand.u32 2147483648, %v8877_v4  ;;  %v4096_v14 = vsel %vm8973_vm5, %v8883_v3, %v4092_v2 }
 0xc5d   : > { %v6273_v62 = vpop.eup %6272  ;;  %v4060_v26 = vsub.f32 1.0, %v4059_v47  ;;  %v4067_v19 = vand.u32 2147483647, %v8877_v4  ;;  %6276 = vrcp.f32 %v8969_v49  ;;  %v4026_v20 = vsel %vm8923_vm0, %v4025_v51, %v4021_v37  ;;  %v4495_v31 = vpop.f32.mrf.mxu2 }
 0xc5e   : > { %v4107_v39 = vadd.f32 %v8928_v25, %v4106_v9  ;;  %vm4109_vm8 = vweird.f32 %v8928_v25  ;;  %v4074_v56 = vmul.f32 %v8963_v42, %v8916_v55  ;;  %vm8996_vm9 = vcmp.eq.f32.partialorder %v4112_v34, 8.507059e+37 }
 0xc5f   : > { %v8994_v15 = vpop.eup %6274  ;;  %v4115_v11 = vor.u32 1.1754944e-38, %v4114_v35  ;;  %v9000_v7 = vadd.f32 1.0, %v6273_v62  ;;  %6278 = vpow2.f32 %v3660_v21  ;;  %v4101_v43 = vsel %vm8977_vm6, %v4100_v53, %v4096_v14  ;;  %vm9013_vm11 = vmor %vm4108_vm7, %vm4109_vm8 }
 0xc60   : > { %vm4063_vm10 = vweird.f32 %v8877_v4  ;;  %v9005_v61 = vor.u32 1.1754944e-38, %v4069_v10  ;;  %v4149_v51 = vmul.f32 %v8994_v15, %v8940_v46  ;;  %v4157_v58 = vand.u32 2147483647, %v8940_v46 }
 0xc61   : > { %v4199_v28 = vmul.f32 %v4026_v20, %v8626_v33  ;;  %v4061_v44 = vmul.f32 %v8935_v59, %v4060_v26  ;;  %v4082_v47 = vand.u32 2147483647, %v8916_v55  ;;  %v4084_v5 = vand.u32 2147483648, %v8916_v55  ;;  %v4524_v35 = vpop.f32.mrf.mxu3 }
 0xc62   : > { %v4111_v1 = vsel %vm9013_vm11, %v8928_v25, %v4107_v39  ;;  %vm4064_vm12 = vweird.f32 %v8935_v59  ;;  %v4075_v34 = vsub.f32 1.0, %v4074_v56  ;;  %v4150_v33 = vsub.f32 1.0, %v4149_v51  ;;  %v9037_v25 = vld [vmem:[%s1030_s15] ss:$0 sm:$0xff]  ;;  %s9407_s15 = sld [smem:[#allocation28_spill]] }
 0xc63   : > { %v9024_v50 = vpop.eup %6276  ;;  %v9027_v37 = vmul.f32 %v4101_v43, %v8704_v45  ;;  %vm4153_vm13 = vweird.f32 %v8940_v46  ;;  %v4159_v9 = vand.u32 2147483648, %v8940_v46  ;;  %6280 = vrcp.f32 %v9000_v7  ;;  %vm9087_vm5 = vmor %vm4063_vm10, %vm4064_vm12 }
 0xc64   : > { %vm4079_vm14 = vweird.f32 %v8963_v42  ;;  %v4151_v21 = vmul.f32 %v8994_v15, %v4150_v33  ;;  %vm4154_vm15 = vweird.f32 %v8994_v15  ;;  %vm9042_vm0 = vcmp.eq.f32.partialorder %v4157_v58, 8.507059e+37 }
 0xc65   : > { %v4164_v36 = vmul.f32 %v9024_v50, %v8969_v49  ;;  %v6279_v53 = vpop.eup %6278  ;;  %v4116_v10 = vsel %vm8996_vm9, %v4115_v11, %v4111_v1  ;;  %v4062_v62 = vadd.f32 %v8935_v59, %v4061_v44  ;;  %v4174_v14 = vand.u32 2147483648, %v8969_v49  ;;  %v4582_v11 = vpop.f32.mrf.mxu1  ;;  %vm9067_vm3 = vmor %vm4153_vm13, %vm4154_vm15 }
 0xc66   : > { %v4220_v26 = vpack.c.bf16 %v8910_v52, %v8736_v29  ;;  %vm9054_vm1 = vcmp.eq.f32.partialorder %v4067_v19, 8.507059e+37  ;;  %v4076_v39 = vmul.f32 %v8963_v42, %v4075_v34  ;;  %vm4078_vm2 = vweird.f32 %v8916_v55  ;;  %v4497_v44 = vpop.f32.mrf.mxu2 }
 0xc67   : > { %v4152_v56 = vadd.f32 %v8994_v15, %v4151_v21  ;;  %v4165_v43 = vsub.f32 1.0, %v4164_v36  ;;  %v9061_v3 = vadd.f32 1.0, %v6279_v53  ;;  %v4221_v52 = vpack.c.bf16 %v8920_v32, %v8780_v38  ;;  %vm9118_vm10 = vmor %vm4078_vm2, %vm4079_vm14 }
 0xc68   : > { %4562 = vmatmul.bf16.gmra.mxu0 %v4220_v26  ;;  %v4218_v19 = vpack.c.bf16 %v8950_v17, %v8804_v8  ;;  %v4219_v51 = vpack.c.bf16 %v4199_v28, %v8892_v48  ;;  %v4496_v58 = vadd.f32 %v9037_v25, %v4495_v31  ;;  %vm4169_vm4 = vweird.f32 %v9024_v50  ;;  %p5678_p3 = scmp.ne.s32.totalorder %s9407_s15, 1 }
 0xc69   : > { %v4156_v2 = vsel %vm9067_vm3, %v8994_v15, %v4152_v56  ;;  %v4166_v46 = vmul.f32 %v9024_v50, %v4165_v43  ;;  %6282 = vrcp.f32 %v9061_v3  ;;  %v6281_v1 = vpop.eup %6280  ;;  %v4160_v8 = vor.u32 1.1754944e-38, %v4159_v9  ;;  %4591 = vmatmul.bf16.gmra.mxu1 %v4221_v52  ;;  %v4526_v21 = vpop.f32.mrf.mxu3  ;;  %s9408_s16 = sld [smem:[#allocation47_spill]] (!%p5678_p3) }
 0xc6a   : > { %vm4168_vm6 = vweird.f32 %v8969_v49  ;;  %v4172_v48 = vand.u32 2147483647, %v8969_v49  ;;  %4504 = vmatmul.bf16.gmra.mxu2 %v4218_v19  ;;  %v4525_v32 = vadd.f32 %v4524_v35, %v4496_v58  ;;  %v9094_v17 = vmul.f32 %v4116_v10, %v8746_v40  ;;  %4533 = vmatmul.bf16.gmra.mxu3 %v4219_v51  ;;  %s9409_s27 = sld [smem:[#allocation48_spill]] (!%p5678_p3) }
 0xc6b   : > { %v4066_v31 = vsel %vm9087_vm5, %v8935_v59, %v4062_v62  ;;  %v4167_v4 = vadd.f32 %v9024_v50, %v4166_v46  ;;  %v4119_v15 = vmul.f32 %v6281_v1, %v9000_v7  ;;  %v4077_v28 = vadd.f32 %v8963_v42, %v4076_v39  ;;  %vm4170_vm7 = vmor %vm4168_vm6, %vm4169_vm4 }
 0xc6c   : > { %v4161_v49 = vsel %vm9042_vm0, %v4160_v8, %v4156_v2  ;;  %v4554_v34 = vadd.f32 %v4553_v22, %v4525_v32  ;;  %v4498_v40 = vadd.f32 %v9037_v25, %v4497_v44  ;;  %v4175_v35 = vor.u32 1.1754944e-38, %v4174_v14  ;;  %v4555_v22 = vpop.f32.mrf.mxu0 }
 0xc6d   : > { %v4171_v33 = vsel %vm4170_vm7, %v9024_v50, %v4167_v4  ;;  %v4120_v59 = vsub.f32 1.0, %v4119_v15  ;;  %v4127_v9 = vand.u32 2147483647, %v9000_v7  ;;  %vm4173_vm8 = vcmp.eq.f32.partialorder %v4172_v48, 8.507059e+37 }
 0xc6e   : > { %v4129_v36 = vand.u32 2147483648, %v9000_v7  ;;  %v4583_v53 = vadd.f32 %v4582_v11, %v4554_v34  ;;  %v4527_v10 = vadd.f32 %v4526_v21, %v4498_v40  ;;  %v4208_v62 = vmul.f32 %v4161_v49, %v8801_v6 }
 0xc6f   : > { %v6283_v45 = vpop.eup %6282  ;;  %v4176_v26 = vsel %vm4173_vm8, %v4175_v35, %v4171_v33  ;;  %v4121_v39 = vmul.f32 %v6281_v1, %v4120_v59  ;;  %vm4124_vm9 = vweird.f32 %v6281_v1  ;;  %v4071_v50 = vsel %vm9054_vm1, %v9005_v61, %v4066_v31  ;;  %v4584_v61 = vpop.f32.mrf.mxu1 }
 0xc70   : > { %v4134_v56 = vmul.f32 %v6283_v45, %v9061_v3  ;;  %v9124_v6 = vadd.f32 %v4583_v53, %v7894_v18  ;;  %v4556_v43 = vadd.f32 %v4555_v22, %v4527_v10  ;;  %v4081_v11 = vsel %vm9118_vm10, %v8963_v42, %v4077_v28 }
 0xc71   : > { %v4122_v20 = vadd.f32 %v6281_v1, %v4121_v39  ;;  %vm4123_vm11 = vweird.f32 %v9000_v7  ;;  %vm4128_vm12 = vcmp.eq.f32.partialorder %v4127_v9, 8.507059e+37  ;;  %v4209_v29 = vmul.f32 %v4176_v26, %v8817_v41 }
 0xc72   : > { %vm4125_vm13 = vmor %vm4123_vm11, %vm4124_vm9  ;;  %v4130_v52 = vor.u32 1.1754944e-38, %v4129_v36  ;;  %v4135_v19 = vsub.f32 1.0, %v4134_v56  ;;  %4610 = vst [vmem:[#allocation2 + $0x30] sm:$0xff] %v9124_v6  ;;  %v4585_v51 = vadd.f32 %v4584_v61, %v4556_v43  ;;  %v4142_v58 = vand.u32 2147483647, %v9061_v3 }
 0xc73   : > { %v4126_v18 = vsel %vm4125_vm13, %v6281_v1, %v4122_v20  ;;  %v4144_v2 = vand.u32 2147483648, %v9061_v3  ;;  %v4224_v42 = vpack.c.bf16 %v4208_v62, %v9027_v37  ;;  %vm4139_vm14 = vweird.f32 %v6283_v45 }
 0xc74   : > { %v4131_v46 = vsel %vm4128_vm12, %v4130_v52, %v4126_v18  ;;  %v4136_v44 = vmul.f32 %v6283_v45, %v4135_v19  ;;  %v9136_v7 = vadd.f32 %v4585_v51, %v7898_v54  ;;  %v4202_v41 = vmul.f32 %v4071_v50, %v8755_v0 }
 0xc75   : > { %v4085_v38 = vor.u32 1.1754944e-38, %v4084_v5  ;;  %v4206_v8 = vmul.f32 %v4131_v46, %v8852_v23  ;;  %vm4083_vm15 = vcmp.eq.f32.partialorder %v4082_v47, 8.507059e+37  ;;  %vm4138_vm0 = vweird.f32 %v9061_v3 }
 0xc76   : > { %v4137_v1 = vadd.f32 %v6283_v45, %v4136_v44  ;;  %v4225_v37 = vpack.c.bf16 %v4209_v29, %v9094_v17  ;;  %4611 = vst [vmem:[#allocation2] sm:$0xff] %v9136_v7  ;;  %vm4140_vm1 = vmor %vm4138_vm0, %vm4139_vm14  ;;  %v4145_v54 = vor.u32 1.1754944e-38, %v4144_v2  ;;  %vm4143_vm2 = vcmp.eq.f32.partialorder %v4142_v58, 8.507059e+37 }
 0xc77   : > { %v4086_v48 = vsel %vm4083_vm15, %v4085_v38, %v4081_v11  ;;  %v4222_v32 = vpack.c.bf16 %v4206_v8, %v4202_v41 }
 0xc78   : > { %v4141_v0 = vsel %vm4140_vm1, %v6283_v45, %v4137_v1  ;;  %4567 = vmatmul.bf16.gmra.mxu0 %v4224_v42  ;;  %v4203_v23 = vmul.f32 %v4086_v48, %v8758_v60 }
 0xc79   : > { %v4146_v5 = vsel %vm4143_vm2, %v4145_v54, %v4141_v0  ;;  %4596 = vmatmul.bf16.gmra.mxu1 %v4225_v37 }
 0xc7a   : > { %v4207_v55 = vmul.f32 %v4146_v5, %v8907_v16  ;;  %4509 = vmatmul.bf16.gmra.mxu2 %v4222_v32 }
 0xc7c   : > { %v4223_v47 = vpack.c.bf16 %v4207_v55, %v4203_v23 }
 0xc7e   : > { %4538 = vmatmul.bf16.gmra.mxu3 %v4223_v47 }
 0xcbe   : > { %v4558_v4 = vpop.f32.mrf.mxu0 }
 0xcbf   : > { %v4587_v28 = vpop.f32.mrf.mxu1 }
 0xcc6   : > { %v4560_v59 = vpop.f32.mrf.mxu0 }
 0xcc7   : > { %v4589_v21 = vpop.f32.mrf.mxu1 }
 0xccf   : > { %v4500_v3 = vpop.f32.mrf.mxu2  ;;  %v4529_v17 = vpop.f32.mrf.mxu3 }
 0xcd0   : > { %v4501_v31 = vadd.f32 %v9037_v25, %v4500_v3 }
 0xcd2   : > { %v4530_v15 = vadd.f32 %v4529_v17, %v4501_v31 }
 0xcd4   : > { %v4559_v49 = vadd.f32 %v4558_v4, %v4530_v15 }
 0xcd6   : > { %v4588_v34 = vadd.f32 %v4587_v28, %v4559_v49 }
 0xcd7   : > { %v4502_v40 = vpop.f32.mrf.mxu2  ;;  %v4531_v16 = vpop.f32.mrf.mxu3 }
 0xcd8   : > { %v9151_v33 = vadd.f32 %v4588_v34, %v7904_v24  ;;  %v4503_v60 = vadd.f32 %v9037_v25, %v4502_v40 }
 0xcda   : > { %4612 = vst [vmem:[#allocation2 + $0x18] sm:$0xff] %v9151_v33  ;;  %v4532_v35 = vadd.f32 %v4531_v16, %v4503_v60 }
 0xcdc   : > { %v4561_v9 = vadd.f32 %v4560_v59, %v4532_v35 }
 0xcde   : > { %v4590_v36 = vadd.f32 %v4589_v21, %v4561_v9 }
 0xce0   : > { %v9156_v53 = vadd.f32 %v4590_v36, %v7908_v57 }
 0xce2   : > { %4613 = vst [vmem:[#allocation2 + $0x10] sm:$0xff] %v9156_v53 }
 0xce5   : > { %v4563_v62 = vpop.f32.mrf.mxu0 }
 0xce6   : > { %v4592_v39 = vpop.f32.mrf.mxu1 }
 0xced   : > { %v4505_v10 = vpop.f32.mrf.mxu2  ;;  %v4534_v24 = vpop.f32.mrf.mxu3 }
 0xcee   : > { %v4506_v45 = vadd.f32 %v9037_v25, %v4505_v10  ;;  %v4565_v20 = vpop.f32.mrf.mxu0  ;;  %v4594_v29 = vpop.f32.mrf.mxu1 }
 0xcf0   : > { %v4535_v26 = vadd.f32 %v4534_v24, %v4506_v45 }
 0xcf2   : > { %v4564_v22 = vadd.f32 %v4563_v62, %v4535_v26 }
 0xcf4   : > { %v4593_v50 = vadd.f32 %v4592_v39, %v4564_v22 }
 0xcf5   : > { %v4507_v14 = vpop.f32.mrf.mxu2  ;;  %v4536_v11 = vpop.f32.mrf.mxu3 }
 0xcf6   : > { %v9161_v56 = vadd.f32 %v4593_v50, %v7914_v63  ;;  %v4508_v43 = vadd.f32 %v9037_v25, %v4507_v14  ;;  %v4568_v58 = vpop.f32.mrf.mxu0  ;;  %v4597_v42 = vpop.f32.mrf.mxu1 }
 0xcf8   : > { %4614 = vst [vmem:[#allocation2 + $0x8] sm:$0xff] %v9161_v56  ;;  %v4537_v57 = vadd.f32 %v4536_v11, %v4508_v43 }
 0xcfa   : > { %v4566_v61 = vadd.f32 %v4565_v20, %v4537_v57 }
 0xcfc   : > { %v4595_v52 = vadd.f32 %v4594_v29, %v4566_v61 }
 0xcfd   : > { %v4510_v19 = vpop.f32.mrf.mxu2 }
 0xcfe   : > { %v4607_v51 = vadd.f32 %v4595_v52, %v7920_v27  ;;  %v4511_v18 = vadd.f32 %v9037_v25, %v4510_v19  ;;  %v4570_v27 = vpop.f32.mrf.mxu0  ;;  %v4599_v54 = vpop.f32.mrf.mxu1 }
 0xd00   : > { %4615 = vst [vmem:[#allocation2 + $0x20] sm:$0xff] %v4607_v51 }
 0xd01   : > { %v4539_v2 = vpop.f32.mrf.mxu3 }
 0xd02   : > { %v4540_v63 = vadd.f32 %v4539_v2, %v4511_v18 }
 0xd04   : > { %v4569_v46 = vadd.f32 %v4568_v58, %v4540_v63 }
 0xd05   : > { %v4512_v44 = vpop.f32.mrf.mxu2 }
 0xd06   : > { %v4598_v41 = vadd.f32 %v4597_v42, %v4569_v46  ;;  %v4513_v38 = vadd.f32 %v9037_v25, %v4512_v44 }
 0xd08   : > { %v9169_v8 = vadd.f32 %v4598_v41, %v7927_v12 }
 0xd09   : > { %v4541_v1 = vpop.f32.mrf.mxu3 }
 0xd0a   : > { %4616 = vst [vmem:[#allocation2 + $0x28] sm:$0xff] %v9169_v8  ;;  %v4542_v37 = vadd.f32 %v4541_v1, %v4513_v38 }
 0xd0c   : > { %v4571_v48 = vadd.f32 %v4570_v27, %v4542_v37 }
 0xd0e   : > { %v4600_v32 = vadd.f32 %v4599_v54, %v4571_v48  ;;  %4621 = sbr.rel (%p5678_p3) target bundleno = 3945 (0xf69), region = 156 }
 0xd10   : > { %v4609_v0 = vadd.f32 %v4600_v32, %v7940_v13 }
 0xd12   : > { %4617 = vst [vmem:[#allocation2 + $0x38] sm:$0xff] %v4609_v0 }
 0xd13   : > { %v4624_v5 = vlaneseq  ;;  %v4622_v12 = vld [vmem:[#allocation9] sm:$0xf]  ;;  %vm4717_vm3 = vcmask 1041409   ;;  %vm4719_vm4 = vcmask 1042434   ;;  %vm4721_vm5 = vcmask 1043459  }
 0xd14   : > { %v4636_v25 = vperm.slane %v4622_v12, 1  ;;  %v4623_v55 = vperm.slane %v4622_v12, 0  ;;  %v4649_v47 = vperm.slane %v4622_v12, 2  ;;  %v4662_v13 = vperm.slane %v4622_v12, 3 }
 0xd15   : > { %v4625_v23 = vshrl.u32 %v4624_v5, 7  ;;  %vm4724_vm6 = vcmask 1043456  }
 0xd17   : > { %6296 = vset.pattern.permute.xlu1 %v4625_v23  ;;  %6294 = vset.pattern.permute.xlu0 %v4625_v23  ;;  %v4632_v3 = vadd.s32 8, %v4625_v23 }
 0xd18   : > { %6297 = vset.pattern.permute.xlu2 %v4625_v23 }
 0xd1f   : > { %4641 = vperm.xlu1 %6296, %v4636_v25   ;;  %4628 = vperm.xlu0 %6294, %v4623_v55  }
 0xd20   : > { %4654 = vperm.xlu2 %6297, %v4649_v47  }
 0xd27   : > { %6298 = vset.pattern.permute.xlu1 %v4632_v3  ;;  %6295 = vset.pattern.permute.xlu0 %v4632_v3 }
 0xd28   : > { %6300 = vset.pattern.permute.xlu2 %v4632_v3 }
 0xd2f   : > { %4647 = vperm.xlu1 %6298, %v4636_v25   ;;  %4634 = vperm.xlu0 %6295, %v4623_v55  }
 0xd30   : > { %4660 = vperm.xlu2 %6300, %v4649_v47  }
 0xd37   : > { %6299 = vset.pattern.permute.xlu1 %v4625_v23 }
 0xd38   : > { %4673 = vperm.xlu2 %6300, %v4662_v13  }
 0xd3f   : > { %4667 = vperm.xlu1 %6299, %v4662_v13  }
 0xd7a   : > { %v4655_v17 = vpop.permute.xlu2 %4654 }
 0xd7b   : > { %v4679_v35 = vmul.f32 %v4655_v17, %v9161_v56 }
 0xd8a   : > { %v4661_v15 = vpop.permute.xlu2 %4660 }
 0xd8b   : > { %v4680_v59 = vmul.f32 %v4661_v15, %v4607_v51 }
 0xd8d   : > { %v4697_v45 = vadd.f32 %v4680_v59, %v4679_v35  ;;  %v5816_v35 = vld [vmem:[#allocation19 + $0x10] sm:$0xff]  ;;  %v5815_v59 = vld [vmem:[#allocation19 + $0x8] sm:$0xff] }
 0xd8f   : > { %v4698_v26 = vrot.slane %v4697_v45, 4 }
 0xd91   : > { %v4629_v31 = vpop.permute.xlu0 %4628  ;;  %v4642_v4 = vpop.permute.xlu1 %4641 }
 0xd92   : > { %v4677_v34 = vmul.f32 %v4642_v4, %v9151_v33  ;;  %v4675_v40 = vmul.f32 %v4629_v31, %v9124_v6  ;;  %v4699_v33 = vadd.f32 %v4698_v26, %v4697_v45  ;;  %v4674_v50 = vpop.permute.xlu2 %4673 }
 0xd93   : > { %v4682_v43 = vmul.f32 %v4674_v50, %v4609_v0 }
 0xd94   : > { %v4700_v56 = vrot.slane %v4699_v33, 2 }
 0xd96   : > { %v4701_v29 = vadd.f32 %v4700_v56, %v4699_v33  ;;  %v6301_v33 = vld [vmem:[%s9408_s16] ss:$0 sm:$0xff] }
 0xd98   : > { %v4702_v58 = vrot.slane %v4701_v29, 1 }
 0xd9a   : > { %v4703_v46 = vadd.f32 %v4702_v58, %v4701_v29 }
 0xda1   : > { %v4648_v28 = vpop.permute.xlu1 %4647  ;;  %v4635_v49 = vpop.permute.xlu0 %4634 }
 0xda2   : > { %v4678_v60 = vmul.f32 %v4648_v28, %v9156_v53  ;;  %v4676_v16 = vmul.f32 %v4635_v49, %v9136_v7  ;;  %v5821_v49 = vld [vmem:[#allocation19 + $0x38] sm:$0xff] }
 0xda3   : > { %4881 = vmatpush.bf16.msra.mxu0 %v5821_v49 }
 0xda4   : > { %v4690_v9 = vadd.f32 %v4678_v60, %v4677_v34  ;;  %v4683_v21 = vadd.f32 %v4676_v16, %v4675_v40  ;;  %v5820_v34 = vld [vmem:[#allocation19 + $0x30] sm:$0xff]  ;;  %v5819_v40 = vld [vmem:[#allocation19 + $0x28] sm:$0xff]  ;;  %v5818_v60 = vld [vmem:[#allocation19 + $0x20] sm:$0xff] }
 0xda5   : > { %v5817_v16 = vld [vmem:[#allocation19 + $0x18] sm:$0xff] }
 0xda6   : > { %v4691_v36 = vrot.slane %v4690_v9, 4  ;;  %v4684_v10 = vrot.slane %v4683_v21, 4 }
 0xda7   : > { %4882 = vmatpush.bf16.msra.mxu0 %v5820_v34 }
 0xda8   : > { %v4692_v24 = vadd.f32 %v4691_v36, %v4690_v9  ;;  %v4685_v62 = vadd.f32 %v4684_v10, %v4683_v21  ;;  %v5814_v10 = vld [vmem:[#allocation19] sm:$0xff] }
 0xdaa   : > { %v4693_v39 = vrot.slane %v4692_v24, 2  ;;  %v4686_v22 = vrot.slane %v4685_v62, 2 }
 0xdab   : > { %4883 = vmatpush.bf16.msra.mxu0 %v5819_v40 }
 0xdac   : > { %v4694_v14 = vadd.f32 %v4693_v39, %v4692_v24  ;;  %v4687_v53 = vadd.f32 %v4686_v22, %v4685_v62 }
 0xdae   : > { %v4695_v57 = vrot.slane %v4694_v14, 1  ;;  %v4688_v20 = vrot.slane %v4687_v53, 1 }
 0xdaf   : > { %4884 = vmatpush.bf16.msra.mxu0 %v5818_v60 }
 0xdb0   : > { %v4696_v19 = vadd.f32 %v4695_v57, %v4694_v14  ;;  %v4689_v51 = vadd.f32 %v4688_v20, %v4687_v53 }
 0xdb1   : > { %v4668_v6 = vpop.permute.xlu1 %4667 }
 0xdb2   : > { %v4681_v7 = vmul.f32 %v4668_v6, %v9169_v8  ;;  %v4718_v42 = vsel %vm4717_vm3, %v4696_v19, %v4689_v51 }
 0xdb3   : > { %v4720_v41 = vsel %vm4719_vm4, %v4703_v46, %v4718_v42  ;;  %4885 = vmatpush.bf16.msra.mxu0 %v5817_v16 }
 0xdb4   : > { %v4704_v11 = vadd.f32 %v4682_v43, %v4681_v7  ;;  %v6302_v43 = vld [vmem:[%s9409_s27] ss:$0 sm:$0xff] }
 0xdb6   : > { %v4705_v61 = vrot.slane %v4704_v11, 4 }
 0xdb7   : > { %4886 = vmatpush.bf16.msra.mxu0 %v5816_v35 }
 0xdb8   : > { %v4706_v52 = vadd.f32 %v4705_v61, %v4704_v11 }
 0xdba   : > { %v4707_v18 = vrot.slane %v4706_v52, 2 }
 0xdbb   : > { %4887 = vmatpush.bf16.msra.mxu0 %v5815_v59 }
 0xdbc   : > { %v4708_v2 = vadd.f32 %v4707_v18, %v4706_v52 }
 0xdbe   : > { %v4709_v63 = vrot.slane %v4708_v2, 1 }
 0xdbf   : > { %4888 = vmatpush.bf16.msra.mxu0 %v5814_v10 }
 0xdc0   : > { %v4710_v44 = vadd.f32 %v4709_v63, %v4708_v2 }
 0xdc2   : > { %v4722_v38 = vsel %vm4721_vm5, %v4710_v44, %v4720_v41 }
 0xdc3   : > { %v4725_v8 = vsel %vm4724_vm6, %v4722_v38, 0.0 }
 0xdc4   : > { %4726 = vadd.xlane.f32.xlu0 %v4725_v8 }
 0xe37   : > { %v4727_v1 = vpop.xlane.xlu0 %4726 }
 0xe38   : > { %v4728_v37 = vmul.f32 %v4727_v1, %v7172_v30 }
 0xe3a   : > { %v4730_v27 = vrot.slane %v4728_v37, 1  ;;  %v4731_v48 = vrot.slane %v4728_v37, 2  ;;  %v4732_v54 = vrot.slane %v4728_v37, 3  ;;  %v4737_v32 = vsub.f32 %v4689_v51, %v4728_v37 }
 0xe3c   : > { %v4738_v0 = vsub.f32 %v4696_v19, %v4730_v27  ;;  %v4739_v5 = vsub.f32 %v4703_v46, %v4731_v48  ;;  %v4740_v23 = vsub.f32 %v4710_v44, %v4732_v54  ;;  %v4741_v47 = vmul.f32 %v4737_v32, %v4737_v32 }
 0xe3e   : > { %v4742_v12 = vmul.f32 %v4738_v0, %v4738_v0  ;;  %v4743_v25 = vmul.f32 %v4739_v5, %v4739_v5  ;;  %v4744_v55 = vmul.f32 %v4740_v23, %v4740_v23 }
 0xe40   : > { %v4749_v3 = vrot.slane %v4742_v12, 7  ;;  %v4751_v13 = vrot.slane %v4743_v25, 6  ;;  %v4753_v31 = vrot.slane %v4744_v55, 5 }
 0xe42   : > { %v4750_v17 = vsel %vm4717_vm3, %v4749_v3, %v4741_v47 }
 0xe43   : > { %v4752_v4 = vsel %vm4719_vm4, %v4751_v13, %v4750_v17 }
 0xe44   : > { %v4754_v15 = vsel %vm4721_vm5, %v4753_v31, %v4752_v4 }
 0xe45   : > { %v4756_v28 = vsel %vm4724_vm6, %v4754_v15, 0.0 }
 0xe46   : > { %4757 = vadd.xlane.f32.xlu1 %v4756_v28 }
 0xeb9   : > { %v4758_v9 = vpop.xlane.xlu1 %4757 }
 0xeba   : > { %v4759_v21 = vmul.f32 %v4758_v9, %v7172_v30 }
 0xebc   : > { %v4760_v36 = vadd.f32 1e-05, %v4759_v21 }
 0xebe   : > { %6303 = vrsqrt.f32 %v4760_v36  ;;  %vm4767_vm8 = vweird.f32 %v4760_v36 }
 0xec4   : > { %v6304_v45 = vpop.eup %6303 }
 0xec5   : > { %v4762_v24 = vmul.f32 %v6304_v45, %v4760_v36  ;;  %vm4768_vm7 = vweird.f32 %v6304_v45 }
 0xec6   : > { %vm4769_vm9 = vmor %vm4767_vm8, %vm4768_vm7 }
 0xec7   : > { %v4763_v62 = vmul.f32 %v6304_v45, %v4762_v24 }
 0xec9   : > { %v4764_v26 = vmul.f32 0.5, %v4763_v62 }
 0xecb   : > { %v4765_v39 = vsub.f32 1.5, %v4764_v26 }
 0xecd   : > { %v4766_v22 = vmul.f32 %v6304_v45, %v4765_v39 }
 0xecf   : > { %v4770_v50 = vsel %vm4769_vm9, %v6304_v45, %v4766_v22 }
 0xed0   : > { %v4772_v30 = vrot.slane %v4770_v50, 1  ;;  %v4773_v6 = vrot.slane %v4770_v50, 2  ;;  %v4774_v14 = vrot.slane %v4770_v50, 3  ;;  %v4779_v53 = vmul.f32 %v4770_v50, %v4737_v32 }
 0xed2   : > { %v4780_v7 = vmul.f32 %v4772_v30, %v4738_v0  ;;  %v4781_v56 = vmul.f32 %v4773_v6, %v4739_v5  ;;  %v4782_v11 = vmul.f32 %v4774_v14, %v4740_v23  ;;  %v4786_v57 = vmul.f32 %v6301_v33, %v4779_v53 }
 0xed4   : > { %v4787_v20 = vmul.f32 %v6301_v33, %v4780_v7  ;;  %v4788_v61 = vmul.f32 %v6301_v33, %v4781_v56  ;;  %v4789_v29 = vmul.f32 %v6301_v33, %v4782_v11  ;;  %v4793_v52 = vadd.f32 %v6302_v43, %v4786_v57 }
 0xed6   : > { %v4794_v19 = vadd.f32 %v6302_v43, %v4787_v20  ;;  %v4795_v51 = vadd.f32 %v6302_v43, %v4788_v61  ;;  %v4796_v18 = vadd.f32 %v6302_v43, %v4789_v29  ;;  %v4797_v58 = vpack.c.bf16 %v4793_v52, %v4793_v52 }
 0xed8   : > { %v4798_v2 = vpack.c.bf16 %v4794_v19, %v4794_v19  ;;  %v4799_v63 = vpack.c.bf16 %v4795_v51, %v4795_v51  ;;  %v4800_v42 = vpack.c.bf16 %v4796_v18, %v4796_v18  ;;  %v4821_v38 = vunpack.c.l.b16 %v4797_v58 }
 0xeda   : > { %v4822_v46 = vunpack.c.l.b16 %v4798_v2  ;;  %v4823_v44 = vunpack.c.l.b16 %v4799_v63  ;;  %v4824_v41 = vunpack.c.l.b16 %v4800_v42 }
 0xedc   : > { %v4825_v8 = vrot.slane %v4822_v46, 7  ;;  %v4827_v1 = vrot.slane %v4823_v44, 6  ;;  %v4829_v27 = vrot.slane %v4824_v41, 5 }
 0xede   : > { %v4826_v37 = vsel %vm4717_vm3, %v4825_v8, %v4821_v38 }
 0xedf   : > { %v4828_v48 = vsel %vm4719_vm4, %v4827_v1, %v4826_v37 }
 0xee0   : > { %v4830_v54 = vsel %vm4721_vm5, %v4829_v27, %v4828_v48 }
 0xee1   : > { %v4831_v32 = vpack.c.b16 %v4830_v54, %v4830_v54 }
 0xee3   : > { %4889 = vmatmul.bf16.vlgmr.msra.gmra.mxu0 %v4831_v32 }
 0xf60   : > { %v4890_v0 = vpop.f32.mrf.mxu0 }
 0xf61   : > { %4894 = vst [vmem:[#allocation20] sm:$0xf] %v4890_v0 }
 0xf68   : > { %v4892_v5 = vpop.f32.mrf.mxu0 }
 0xf69 PF: > { %p5920_p4 = scmp.eq.s32.totalorder %s6942_s2, 1  ;;  %s9410_s21 = sld [smem:[#allocation49_spill]] }
 0xf6a   : > { %s6812_s3 = smov [#allocation20]  }
 0xf6b   : > { %s4903_s28 = sshll.u32 %s6812_s3, 4  ;;  %s4904_s28 = int_to_ptr.vmem [resolvable:$true] %s4903_s28 }
 0xf6f   : > { %s4905_s10 = sshll.u32 %s9410_s21, 4  ;;  %s4906_s10 = int_to_ptr.hbm [resolvable:$true] %s4905_s10 }
 0xf70   : > { %5865 = dma.vmem_to_hbm [thread:$0]  (%p5920_p4), %s4904_s28, 64, %s4906_s10, [#allocation5]  }
 0xf71   : > { %6768 = dma.done.wait (%p5920_p4), [#allocation5], 64  }
 0xf72   : > { %6770 = vsyncadd (%p5920_p4), [#allocation5], 4294967232 }
 0xf73 PF: > { %s9411_s23 = sld [smem:[#allocation29_spill]]  ;;  %s9415_s30 = smov %s6781_s20 }
 0xf74   : > { %s9412_s0 = sld [smem:[#allocation27_spill]]  ;;  %s9417_s21 = smov %s6789_s1 }
 0xf75   : > { %s9413_s24 = sld [smem:[#allocation32_spill]] }
 0xf76   : > { %s9414_s2 = sld [smem:[#allocation31_spill]] }
 0xf79   : > { %s33_s22 = sadd.s32 1, %s9411_s23  }
 0xf7a   : > { %p30_p5 = scmp.ge.s32.totalorder %s33_s22, 4  }
 0xf7b   : > { %s9416_s20 = smov %s9413_s24 }
 0xf7c   : > { %s9418_s1 = smov %s9414_s2  ;;  %32 = sbr.rel (!%p30_p5) target bundleno = 24 (0x18), region = 252 }
 0xf81   :  { %4919 = vsyncpa [#allocation4], 1 }
 0xf82   :  { %4921 = vsyncpa [#allocation4 + $0x1], 1 }
 0xf83   :  { %4922 = vsyncpa [#allocation7], 1 }
 0xf84   :  { %4923 = vsyncpa [#allocation10], 1 }
 0xf85   :  { %4924 = vsyncpa [#allocation5], 1 }
 0xf86   :  { %4926 = vsyncpa [#allocation5 + $0x1], 1 }

</bundles_post_ra>
